<compile_context>
chip_gen: v7x
topology: tpu7x:2x2x1
jax: 0.10.0
libtpu: 0.0.40
codegen_flags: <defaults>
</compile_context>

<pallas_src>
import functools

import jax
import jax.numpy as jnp
from jax import lax
from jax.experimental import pallas as pl
from jax.experimental.pallas import tpu as pltpu


def _round_up(x, m):
    return ((x + m - 1) // m) * m


def _cdiv(a, b):
    return (a + b - 1) // b


def _m_tiling(m, max_tile):
    """Pick M padding + tile size (multiple of 16) + tile count."""
    mp = _round_up(max(m, 1), 16)
    nt = _cdiv(mp, max_tile)
    tile = _round_up(_cdiv(mp, nt), 16)
    mp = tile * nt
    return mp, tile, nt


_VMEM_LIMIT = 32 * 1024 * 1024  # safe on v5e/v6e (128 MiB) and v7x (64 MiB)


# ---------------------------------------------------------------------------
# Pallas kernel 1: M-tiled matmul + bias (+ ReLU)   (the 3 conv layers)
# ---------------------------------------------------------------------------
def _mm_bias_act_kernel(x_ref, w_ref, b_ref, o_ref, *, relu):
    acc = jnp.dot(x_ref[...], w_ref[...], preferred_element_type=jnp.float32)
    acc = acc + b_ref[...]                       # (tile, N) + (1, N)
    if relu:
        acc = jnp.maximum(acc, 0.0)
    o_ref[...] = acc.astype(o_ref.dtype)


def matmul_bias_act(x, w, b, *, relu, out_dtype, max_tile=512):
    """y = act(x @ w + b).  x:(M,K) bf16, w:(K,N) bf16, b:(1,N) f32."""
    M, K = x.shape
    K2, N = w.shape
    assert K == K2 and b.shape == (1, N)
    Mp, tile, nt = _m_tiling(M, max_tile)
    if Mp != M:
        x = jnp.pad(x, ((0, Mp - M), (0, 0)))

    flops = 2 * Mp * K * N
    bytes_accessed = (Mp * K * 2 + K * N * 2 + N * 4
                      + Mp * N * jnp.dtype(out_dtype).itemsize)

    out = pl.pallas_call(
        functools.partial(_mm_bias_act_kernel, relu=relu),
        out_shape=jax.ShapeDtypeStruct((Mp, N), out_dtype),
        grid=(nt,),
        in_specs=[
            pl.BlockSpec((tile, K), lambda i: (i, 0)),
            pl.BlockSpec((K, N), lambda i: (0, 0)),
            pl.BlockSpec((1, N), lambda i: (0, 0)),
        ],
        out_specs=pl.BlockSpec((tile, N), lambda i: (i, 0)),
        compiler_params=pltpu.CompilerParams(
            dimension_semantics=("parallel",),
            vmem_limit_bytes=_VMEM_LIMIT),
        cost_estimate=pl.CostEstimate(flops=flops, transcendentals=0,
                                      bytes_accessed=bytes_accessed),
    )(x, w, b)
    return out[:M]


# ---------------------------------------------------------------------------
# Pallas kernel 2: fused FC(3136->512)+ReLU and concatenated (actor|critic)
# ---------------------------------------------------------------------------
def _mlp_heads_kernel(x_ref, wf_ref, bf_ref, wh_ref, bh_ref, o_ref):
    hid = jnp.dot(x_ref[...], wf_ref[...], preferred_element_type=jnp.float32)
    hid = jnp.maximum(hid + bf_ref[...], 0.0)
    out = jnp.dot(hid.astype(wh_ref.dtype), wh_ref[...],
                  preferred_element_type=jnp.float32)
    o_ref[...] = (out + bh_ref[...]).astype(o_ref.dtype)


def mlp_heads(x, wf, bf, wh, bh, *, max_tile=256):
    """out = (relu(x @ wf + bf)) @ wh + bh, all in one kernel launch."""
    M, K = x.shape
    Kf, H = wf.shape
    H2, NH = wh.shape
    assert K == Kf and H == H2
    Mp, tile, nt = _m_tiling(M, max_tile)
    if Mp != M:
        x = jnp.pad(x, ((0, Mp - M), (0, 0)))

    flops = 2 * Mp * (K * H + H * NH)
    bytes_accessed = Mp * K * 2 + K * H * 2 + H * NH * 2 + Mp * NH * 4

    out = pl.pallas_call(
        _mlp_heads_kernel,
        out_shape=jax.ShapeDtypeStruct((Mp, NH), jnp.float32),
        grid=(nt,),
        in_specs=[
            pl.BlockSpec((tile, K), lambda i: (i, 0)),
            pl.BlockSpec((K, H), lambda i: (0, 0)),
            pl.BlockSpec((1, H), lambda i: (0, 0)),
            pl.BlockSpec((H, NH), lambda i: (0, 0)),
            pl.BlockSpec((1, NH), lambda i: (0, 0)),
        ],
        out_specs=pl.BlockSpec((tile, NH), lambda i: (i, 0)),
        compiler_params=pltpu.CompilerParams(
            dimension_semantics=("parallel",),
            vmem_limit_bytes=_VMEM_LIMIT),
        cost_estimate=pl.CostEstimate(flops=flops, transcendentals=0,
                                      bytes_accessed=bytes_accessed),
    )(x, wf, bf, wh, bh)
    return out[:M]


# ---------------------------------------------------------------------------
# NHWC im2col (XLA glue: strided slices + channel concat, no transposes)
# ---------------------------------------------------------------------------
def _im2col_nhwc(x, kh, kw, stride):
    B, H, W, C = x.shape
    oh = (H - kh) // stride + 1
    ow = (W - kw) // stride + 1
    cols = []
    for di in range(kh):
        for dj in range(kw):
            cols.append(x[:, di:di + stride * (oh - 1) + 1:stride,
                          dj:dj + stride * (ow - 1) + 1:stride, :])
    cols = jnp.concatenate(cols, axis=-1)            # (B, oh, ow, kh*kw*C)
    return cols.reshape(B * oh * ow, kh * kw * C), oh, ow


def conv2d_relu(x_nhwc, wmat, b, kh, kw, stride):
    """Conv2d(valid, stride) + ReLU via im2col + Pallas matmul.  NHWC in/out."""
    B = x_nhwc.shape[0]
    cols, oh, ow = _im2col_nhwc(x_nhwc, kh, kw, stride)
    Kp = wmat.shape[0]
    if cols.shape[1] != Kp:                          # K padded to 128 multiple
        cols = jnp.pad(cols, ((0, 0), (0, Kp - cols.shape[1])))
    y = matmul_bias_act(cols.astype(wmat.dtype), wmat, b,
                        relu=True, out_dtype=jnp.bfloat16)
    return y.reshape(B, oh, ow, wmat.shape[1])


# ---------------------------------------------------------------------------
# Parameter init — PyTorch layouts (weight-compatible with the nn.Module)
# ---------------------------------------------------------------------------
def init_params(key, input_size, output_size):
    c, h, w = input_size
    if h != 84 or w != 84:
        raise ValueError("module requires 84x84 spatial input")
    keys = jax.random.split(key, 6)

    def conv_w(k, oc, ic, kh, kw):                   # kaiming_uniform, a=0
        fan_in = ic * kh * kw
        bound = (6.0 / fan_in) ** 0.5
        return jax.random.uniform(k, (oc, ic, kh, kw), jnp.float32, -bound, bound)

    def lin_w(k, fout, fin):                         # kaiming_uniform, a=1.0
        bound = (3.0 / fin) ** 0.5
        return jax.random.uniform(k, (fout, fin), jnp.float32, -bound, bound)

    return {
        "w1": conv_w(keys[0], 32, c, 8, 8), "b1": jnp.zeros((32,), jnp.float32),
        "w2": conv_w(keys[1], 64, 32, 4, 4), "b2": jnp.zeros((64,), jnp.float32),
        "w3": conv_w(keys[2], 64, 64, 3, 3), "b3": jnp.zeros((64,), jnp.float32),
        # nn.Linear(3136, 512): weight (512, 3136), input index = NCHW flatten.
        "wfc": lin_w(keys[3], 512, 3136), "bfc": jnp.zeros((512,), jnp.float32),
        "wa": lin_w(keys[4], output_size, 512),
        "ba": jnp.zeros((output_size,), jnp.float32),
        "wc": lin_w(keys[5], 1, 512), "bc": jnp.zeros((1,), jnp.float32),
    }


def prepare_params(p):
    """One-time: transpose / permute / pad / cast weights into MXU matrices."""
    def conv_mat(w):                                  # (OC,IC,KH,KW) -> (K, OC)
        oc, ic, kh, kw = w.shape
        m = w.transpose(2, 3, 1, 0).reshape(kh * kw * ic, oc)   # (di,dj,c) rows
        kp = _round_up(m.shape[0], 128)
        m = jnp.pad(m, ((0, kp - m.shape[0]), (0, 0)))
        return m.astype(jnp.bfloat16)

    # FC: (512, 3136) with NCHW-flatten inputs  ->  (3136, 512) with
    # NHWC-flatten inputs (matches our bf16 NHWC conv3 output), K padded.
    wfc = p["wfc"].T.reshape(64, 7, 7, 512).transpose(1, 2, 0, 3).reshape(3136, 512)
    kfp = _round_up(wfc.shape[0], 128)
    wfc_p = jnp.pad(wfc, ((0, kfp - wfc.shape[0]), (0, 0))).astype(jnp.bfloat16)

    # Fused heads: (512, A+1), N padded to 128 for lane-dense output stores.
    wh = jnp.concatenate([p["wa"], p["wc"]], axis=0).T        # (512, A+1)
    nh = _round_up(wh.shape[1], 128)
    wh_p = jnp.pad(wh, ((0, 0), (0, nh - wh.shape[1]))).astype(jnp.bfloat16)
    bh = jnp.concatenate([p["ba"], p["bc"]]).reshape(1, -1)
    bh_p = jnp.pad(bh, ((0, 0), (0, nh - bh.shape[1])))

    return {
        "w1": conv_mat(p["w1"]), "b1": p["b1"].reshape(1, -1),
        "w2": conv_mat(p["w2"]), "b2": p["b2"].reshape(1, -1),
        "w3": conv_mat(p["w3"]), "b3": p["b3"].reshape(1, -1),
        "wfc": wfc_p, "bfc": p["bfc"].reshape(1, -1),
        "wh": wh_p, "bh": bh_p,
    }


# ---------------------------------------------------------------------------
# Forward pass (== DeepCnnActorCriticNetwork.forward)
# ---------------------------------------------------------------------------
def forward(prep, state, *, output_size):
    # state: (B, C, 84, 84) NCHW f32 (PyTorch layout)
    x = jnp.transpose(state, (0, 2, 3, 1)).astype(jnp.bfloat16)     # NHWC bf16
    x = conv2d_relu(x, prep["w1"], prep["b1"], 8, 8, 4)             # (B,20,20,32)
    x = conv2d_relu(x, prep["w2"], prep["b2"], 4, 4, 2)             # (B, 9, 9,64)
    x = conv2d_relu(x, prep["w3"], prep["b3"], 3, 3, 1)             # (B, 7, 7,64)
    B = x.shape[0]
    feat = x.reshape(B, -1)                                         # (B, 3136)
    kf = prep["wfc"].shape[0]
    if feat.shape[1] != kf:
        feat = jnp.pad(feat, ((0, 0), (0, kf - feat.shape[1])))     # K -> 3200
    out = mlp_heads(feat, prep["wfc"], prep["bfc"], prep["wh"], prep["bh"])
    policy = out[:, :output_size]
    value = out[:, output_size:output_size + 1]
    return policy, value


# ---------------------------------------------------------------------------
# Pure-JAX f32 reference (PyTorch semantics) for a correctness check
# ---------------------------------------------------------------------------
def reference_forward(params, state, output_size):
    def conv(x, w, b, stride):
        y = lax.conv_general_dilated(
            x, w, (stride, stride), "VALID",
            dimension_numbers=("NCHW", "OIHW", "NCHW"))
        return jax.nn.relu(y + b.reshape(1, -1, 1, 1))

    x = conv(state, params["w1"], params["b1"], 4)
    x = conv(x, params["w2"], params["b2"], 2)
    x = conv(x, params["w3"], params["b3"], 1)
    feat = x.reshape(x.shape[0], -1)                 # NCHW flatten (c,h,w)
    hid = jax.nn.relu(feat @ params["wfc"].T + params["bfc"])
    policy = hid @ params["wa"].T + params["ba"]
    value = hid @ params["wc"].T + params["bc"]
    return policy, value


if __name__ == "__main__":
    batch = 2
    input_size = (4, 84, 84)     # module requires 84x84 spatial input
    output_size = 6

    key = jax.random.PRNGKey(0)
    pkey, xkey = jax.random.split(key)
    params = init_params(pkey, input_size, output_size)
    prep = prepare_params(params)
    state = jax.random.normal(xkey, (batch,) + input_size, dtype=jnp.float32)

    fwd = jax.jit(functools.partial(forward, output_size=output_size))
    policy, value = fwd(prep, state)
    jax.block_until_ready((policy, value))

    assert policy.shape == (batch, output_size), policy.shape
    assert value.shape == (batch, 1), value.shape
    assert policy.dtype == jnp.float32 and value.dtype == jnp.float32

    # Correctness vs. f32 reference (bf16 MXU path -> loose relative tolerance)
    p_ref, v_ref = reference_forward(params, state, output_size)
    def rel_err(a, b):
        return float(jnp.max(jnp.abs(a - b)) / (jnp.max(jnp.abs(b)) + 1e-6))
    assert rel_err(policy, p_ref) < 0.1, rel_err(policy, p_ref)
    assert rel_err(value, v_ref) < 0.1, rel_err(value, v_ref)

    print("KERNEL_OK")
</pallas_src>

<mosaic_0001>
module attributes {stable_mosaic.version = 11 : i64} {
  func.func @_mm_bias_act_kernel(%arg0: i32, %arg1: memref<400x256xbf16, #tpu.memory_space<vmem>>, %arg2: memref<256x32xbf16, #tpu.memory_space<vmem>>, %arg3: memref<1x32xf32, #tpu.memory_space<vmem>>, %arg4: memref<400x32xbf16, #tpu.memory_space<vmem>>) attributes {dimension_semantics = [#tpu.dimension_semantics<parallel>], iteration_bounds = array<i64: 2>, scalar_prefetch = 0 : i64, scratch_operands = 0 : i64, tpu.core_type = #tpu.core_type<tc>, window_params = [{transform_indices = @transform_0, window_bounds = array<i64: 400, 256>}, {pipeline_mode = #tpu.pipeline_mode<synchronous>, transform_indices = @transform_1, window_bounds = array<i64: 256, 32>}, {pipeline_mode = #tpu.pipeline_mode<synchronous>, transform_indices = @transform_2, window_bounds = array<i64: 1, 32>}, {transform_indices = @transform_3, window_bounds = array<i64: 400, 32>}]} {
    %c0 = arith.constant 0 : index
    %c0_0 = arith.constant 0 : index
    %0 = vector.load %arg1[%c0, %c0_0] : memref<400x256xbf16, #tpu.memory_space<vmem>>, vector<400x256xbf16>
    %c0_1 = arith.constant 0 : index
    %c0_2 = arith.constant 0 : index
    %1 = vector.load %arg2[%c0_1, %c0_2] : memref<256x32xbf16, #tpu.memory_space<vmem>>, vector<256x32xbf16>
    %cst = arith.constant dense<0.000000e+00> : vector<400x32xf32>
    %2 = tpu.matmul %0, %1, %cst {dimension_numbers = #tpu.dot_dimension_numbers<[1], [0], [0], [1], [0, 0, 1, 1], [], []>} : vector<400x256xbf16>, vector<256x32xbf16>, vector<400x32xf32> -> vector<400x32xf32>
    %c0_3 = arith.constant 0 : index
    %c0_4 = arith.constant 0 : index
    %3 = vector.load %arg3[%c0_3, %c0_4] : memref<1x32xf32, #tpu.memory_space<vmem>>, vector<1x32xf32>
    %4 = vector.broadcast %3 : vector<1x32xf32> to vector<400x32xf32>
    %5 = arith.addf %2, %4 : vector<400x32xf32>
    %cst_5 = arith.constant 0.000000e+00 : f32
    %6 = vector.broadcast %cst_5 : f32 to vector<400x32xf32>
    %7 = arith.maximumf %5, %6 : vector<400x32xf32>
    %8 = arith.truncf %7 : vector<400x32xf32> to vector<400x32xbf16>
    %c0_6 = arith.constant 0 : index
    %c0_7 = arith.constant 0 : index
    %9 = vector.load %arg4[%c0_6, %c0_7] : memref<400x32xbf16, #tpu.memory_space<vmem>>, vector<400x32xbf16>
    tpu.vector_store %arg4[%c0_6, %c0_7], %8 {strides = array<i32>} : memref<400x32xbf16, #tpu.memory_space<vmem>>, vector<400x32xbf16>,
    return
  }
  func.func @transform_0(%arg0: i32) -> (i32, i32) {
    %c0_i32 = arith.constant 0 : i32
    %c0_i32_0 = arith.constant 0 : i32
    return %arg0, %c0_i32 : i32, i32
  }
  func.func @transform_1(%arg0: i32) -> (i32, i32) {
    %c0_i32 = arith.constant 0 : i32
    %c0_i32_0 = arith.constant 0 : i32
    %c0_i32_1 = arith.constant 0 : i32
    return %c0_i32, %c0_i32_0 : i32, i32
  }
  func.func @transform_2(%arg0: i32) -> (i32, i32) {
    %c0_i32 = arith.constant 0 : i32
    %c0_i32_0 = arith.constant 0 : i32
    %c0_i32_1 = arith.constant 0 : i32
    return %c0_i32, %c0_i32_0 : i32, i32
  }
  func.func @transform_3(%arg0: i32) -> (i32, i32) {
    %c0_i32 = arith.constant 0 : i32
    %c0_i32_0 = arith.constant 0 : i32
    return %arg0, %c0_i32 : i32, i32
  }
}

module attributes {stable_mosaic.version = 11 : i64} {
  func.func @_mm_bias_act_kernel(%arg0: i32, %arg1: memref<176x512xbf16, #tpu.memory_space<vmem>>, %arg2: memref<512x64xbf16, #tpu.memory_space<vmem>>, %arg3: memref<1x64xf32, #tpu.memory_space<vmem>>, %arg4: memref<176x64xbf16, #tpu.memory_space<vmem>>) attributes {dimension_semantics = [#tpu.dimension_semantics<parallel>], iteration_bounds = array<i64: 1>, scalar_prefetch = 0 : i64, scratch_operands = 0 : i64, tpu.core_type = #tpu.core_type<tc>, window_params = [{transform_indices = @transform_0, window_bounds = array<i64: 176, 512>}, {pipeline_mode = #tpu.pipeline_mode<synchronous>, transform_indices = @transform_1, window_bounds = array<i64: 512, 64>}, {pipeline_mode = #tpu.pipeline_mode<synchronous>, transform_indices = @transform_2, window_bounds = array<i64: 1, 64>}, {transform_indices = @transform_3, window_bounds = array<i64: 176, 64>}]} {
    %c0 = arith.constant 0 : index
    %c0_0 = arith.constant 0 : index
    %0 = vector.load %arg1[%c0, %c0_0] : memref<176x512xbf16, #tpu.memory_space<vmem>>, vector<176x512xbf16>
    %c0_1 = arith.constant 0 : index
    %c0_2 = arith.constant 0 : index
    %1 = vector.load %arg2[%c0_1, %c0_2] : memref<512x64xbf16, #tpu.memory_space<vmem>>, vector<512x64xbf16>
    %cst = arith.constant dense<0.000000e+00> : vector<176x64xf32>
    %2 = tpu.matmul %0, %1, %cst {dimension_numbers = #tpu.dot_dimension_numbers<[1], [0], [0], [1], [0, 0, 1, 1], [], []>} : vector<176x512xbf16>, vector<512x64xbf16>, vector<176x64xf32> -> vector<176x64xf32>
    %c0_3 = arith.constant 0 : index
    %c0_4 = arith.constant 0 : index
    %3 = vector.load %arg3[%c0_3, %c0_4] : memref<1x64xf32, #tpu.memory_space<vmem>>, vector<1x64xf32>
    %4 = vector.broadcast %3 : vector<1x64xf32> to vector<176x64xf32>
    %5 = arith.addf %2, %4 : vector<176x64xf32>
    %cst_5 = arith.constant 0.000000e+00 : f32
    %6 = vector.broadcast %cst_5 : f32 to vector<176x64xf32>
    %7 = arith.maximumf %5, %6 : vector<176x64xf32>
    %8 = arith.truncf %7 : vector<176x64xf32> to vector<176x64xbf16>
    %c0_6 = arith.constant 0 : index
    %c0_7 = arith.constant 0 : index
    %9 = vector.load %arg4[%c0_6, %c0_7] : memref<176x64xbf16, #tpu.memory_space<vmem>>, vector<176x64xbf16>
    tpu.vector_store %arg4[%c0_6, %c0_7], %8 {strides = array<i32>} : memref<176x64xbf16, #tpu.memory_space<vmem>>, vector<176x64xbf16>,
    return
  }
  func.func @transform_0(%arg0: i32) -> (i32, i32) {
    %c0_i32 = arith.constant 0 : i32
    %c0_i32_0 = arith.constant 0 : i32
    return %arg0, %c0_i32 : i32, i32
  }
  func.func @transform_1(%arg0: i32) -> (i32, i32) {
    %c0_i32 = arith.constant 0 : i32
    %c0_i32_0 = arith.constant 0 : i32
    %c0_i32_1 = arith.constant 0 : i32
    return %c0_i32, %c0_i32_0 : i32, i32
  }
  func.func @transform_2(%arg0: i32) -> (i32, i32) {
    %c0_i32 = arith.constant 0 : i32
    %c0_i32_0 = arith.constant 0 : i32
    %c0_i32_1 = arith.constant 0 : i32
    return %c0_i32, %c0_i32_0 : i32, i32
  }
  func.func @transform_3(%arg0: i32) -> (i32, i32) {
    %c0_i32 = arith.constant 0 : i32
    %c0_i32_0 = arith.constant 0 : i32
    return %arg0, %c0_i32 : i32, i32
  }
}

module attributes {stable_mosaic.version = 11 : i64} {
  func.func @_mm_bias_act_kernel(%arg0: i32, %arg1: memref<112x640xbf16, #tpu.memory_space<vmem>>, %arg2: memref<640x64xbf16, #tpu.memory_space<vmem>>, %arg3: memref<1x64xf32, #tpu.memory_space<vmem>>, %arg4: memref<112x64xbf16, #tpu.memory_space<vmem>>) attributes {dimension_semantics = [#tpu.dimension_semantics<parallel>], iteration_bounds = array<i64: 1>, scalar_prefetch = 0 : i64, scratch_operands = 0 : i64, tpu.core_type = #tpu.core_type<tc>, window_params = [{transform_indices = @transform_0, window_bounds = array<i64: 112, 640>}, {pipeline_mode = #tpu.pipeline_mode<synchronous>, transform_indices = @transform_1, window_bounds = array<i64: 640, 64>}, {pipeline_mode = #tpu.pipeline_mode<synchronous>, transform_indices = @transform_2, window_bounds = array<i64: 1, 64>}, {transform_indices = @transform_3, window_bounds = array<i64: 112, 64>}]} {
    %c0 = arith.constant 0 : index
    %c0_0 = arith.constant 0 : index
    %0 = vector.load %arg1[%c0, %c0_0] : memref<112x640xbf16, #tpu.memory_space<vmem>>, vector<112x640xbf16>
    %c0_1 = arith.constant 0 : index
    %c0_2 = arith.constant 0 : index
    %1 = vector.load %arg2[%c0_1, %c0_2] : memref<640x64xbf16, #tpu.memory_space<vmem>>, vector<640x64xbf16>
    %cst = arith.constant dense<0.000000e+00> : vector<112x64xf32>
    %2 = tpu.matmul %0, %1, %cst {dimension_numbers = #tpu.dot_dimension_numbers<[1], [0], [0], [1], [0, 0, 1, 1], [], []>} : vector<112x640xbf16>, vector<640x64xbf16>, vector<112x64xf32> -> vector<112x64xf32>
    %c0_3 = arith.constant 0 : index
    %c0_4 = arith.constant 0 : index
    %3 = vector.load %arg3[%c0_3, %c0_4] : memref<1x64xf32, #tpu.memory_space<vmem>>, vector<1x64xf32>
    %4 = vector.broadcast %3 : vector<1x64xf32> to vector<112x64xf32>
    %5 = arith.addf %2, %4 : vector<112x64xf32>
    %cst_5 = arith.constant 0.000000e+00 : f32
    %6 = vector.broadcast %cst_5 : f32 to vector<112x64xf32>
    %7 = arith.maximumf %5, %6 : vector<112x64xf32>
    %8 = arith.truncf %7 : vector<112x64xf32> to vector<112x64xbf16>
    %c0_6 = arith.constant 0 : index
    %c0_7 = arith.constant 0 : index
    %9 = vector.load %arg4[%c0_6, %c0_7] : memref<112x64xbf16, #tpu.memory_space<vmem>>, vector<112x64xbf16>
    tpu.vector_store %arg4[%c0_6, %c0_7], %8 {strides = array<i32>} : memref<112x64xbf16, #tpu.memory_space<vmem>>, vector<112x64xbf16>,
    return
  }
  func.func @transform_0(%arg0: i32) -> (i32, i32) {
    %c0_i32 = arith.constant 0 : i32
    %c0_i32_0 = arith.constant 0 : i32
    return %arg0, %c0_i32 : i32, i32
  }
  func.func @transform_1(%arg0: i32) -> (i32, i32) {
    %c0_i32 = arith.constant 0 : i32
    %c0_i32_0 = arith.constant 0 : i32
    %c0_i32_1 = arith.constant 0 : i32
    return %c0_i32, %c0_i32_0 : i32, i32
  }
  func.func @transform_2(%arg0: i32) -> (i32, i32) {
    %c0_i32 = arith.constant 0 : i32
    %c0_i32_0 = arith.constant 0 : i32
    %c0_i32_1 = arith.constant 0 : i32
    return %c0_i32, %c0_i32_0 : i32, i32
  }
  func.func @transform_3(%arg0: i32) -> (i32, i32) {
    %c0_i32 = arith.constant 0 : i32
    %c0_i32_0 = arith.constant 0 : i32
    return %arg0, %c0_i32 : i32, i32
  }
}

module attributes {stable_mosaic.version = 11 : i64} {
  func.func @_mlp_heads_kernel(%arg0: i32, %arg1: memref<16x3200xbf16, #tpu.memory_space<vmem>>, %arg2: memref<3200x512xbf16, #tpu.memory_space<vmem>>, %arg3: memref<1x512xf32, #tpu.memory_space<vmem>>, %arg4: memref<512x128xbf16, #tpu.memory_space<vmem>>, %arg5: memref<1x128xf32, #tpu.memory_space<vmem>>, %arg6: memref<16x128xf32, #tpu.memory_space<vmem>>) attributes {dimension_semantics = [#tpu.dimension_semantics<parallel>], iteration_bounds = array<i64: 1>, scalar_prefetch = 0 : i64, scratch_operands = 0 : i64, tpu.core_type = #tpu.core_type<tc>, window_params = [{transform_indices = @transform_0, window_bounds = array<i64: 16, 3200>}, {pipeline_mode = #tpu.pipeline_mode<synchronous>, transform_indices = @transform_1, window_bounds = array<i64: 3200, 512>}, {pipeline_mode = #tpu.pipeline_mode<synchronous>, transform_indices = @transform_2, window_bounds = array<i64: 1, 512>}, {pipeline_mode = #tpu.pipeline_mode<synchronous>, transform_indices = @transform_3, window_bounds = array<i64: 512, 128>}, {pipeline_mode = #tpu.pipeline_mode<synchronous>, transform_indices = @transform_4, window_bounds = array<i64: 1, 128>}, {transform_indices = @transform_5, window_bounds = array<i64: 16, 128>}]} {
    %c0 = arith.constant 0 : index
    %c0_0 = arith.constant 0 : index
    %0 = vector.load %arg1[%c0, %c0_0] : memref<16x3200xbf16, #tpu.memory_space<vmem>>, vector<16x3200xbf16>
    %c0_1 = arith.constant 0 : index
    %c0_2 = arith.constant 0 : index
    %1 = vector.load %arg2[%c0_1, %c0_2] : memref<3200x512xbf16, #tpu.memory_space<vmem>>, vector<3200x512xbf16>
    %cst = arith.constant dense<0.000000e+00> : vector<16x512xf32>
    %2 = tpu.matmul %0, %1, %cst {dimension_numbers = #tpu.dot_dimension_numbers<[1], [0], [0], [1], [0, 0, 1, 1], [], []>} : vector<16x3200xbf16>, vector<3200x512xbf16>, vector<16x512xf32> -> vector<16x512xf32>
    %c0_3 = arith.constant 0 : index
    %c0_4 = arith.constant 0 : index
    %3 = vector.load %arg3[%c0_3, %c0_4] : memref<1x512xf32, #tpu.memory_space<vmem>>, vector<1x512xf32>
    %4 = vector.broadcast %3 : vector<1x512xf32> to vector<16x512xf32>
    %5 = arith.addf %2, %4 : vector<16x512xf32>
    %cst_5 = arith.constant 0.000000e+00 : f32
    %6 = vector.broadcast %cst_5 : f32 to vector<16x512xf32>
    %7 = arith.maximumf %5, %6 : vector<16x512xf32>
    %8 = arith.truncf %7 : vector<16x512xf32> to vector<16x512xbf16>
    %c0_6 = arith.constant 0 : index
    %c0_7 = arith.constant 0 : index
    %9 = vector.load %arg4[%c0_6, %c0_7] : memref<512x128xbf16, #tpu.memory_space<vmem>>, vector<512x128xbf16>
    %cst_8 = arith.constant dense<0.000000e+00> : vector<16x128xf32>
    %10 = tpu.matmul %8, %9, %cst_8 {dimension_numbers = #tpu.dot_dimension_numbers<[1], [0], [0], [1], [0, 0, 1, 1], [], []>} : vector<16x512xbf16>, vector<512x128xbf16>, vector<16x128xf32> -> vector<16x128xf32>
    %c0_9 = arith.constant 0 : index
    %c0_10 = arith.constant 0 : index
    %11 = vector.load %arg5[%c0_9, %c0_10] : memref<1x128xf32, #tpu.memory_space<vmem>>, vector<1x128xf32>
    %12 = vector.broadcast %11 : vector<1x128xf32> to vector<16x128xf32>
    %13 = arith.addf %10, %12 : vector<16x128xf32>
    %c0_11 = arith.constant 0 : index
    %c0_12 = arith.constant 0 : index
    %14 = vector.load %arg6[%c0_11, %c0_12] : memref<16x128xf32, #tpu.memory_space<vmem>>, vector<16x128xf32>
    tpu.vector_store %arg6[%c0_11, %c0_12], %13 {strides = array<i32>} : memref<16x128xf32, #tpu.memory_space<vmem>>, vector<16x128xf32>,
    return
  }
  func.func @transform_0(%arg0: i32) -> (i32, i32) {
    %c0_i32 = arith.constant 0 : i32
    %c0_i32_0 = arith.constant 0 : i32
    return %arg0, %c0_i32 : i32, i32
  }
  func.func @transform_1(%arg0: i32) -> (i32, i32) {
    %c0_i32 = arith.constant 0 : i32
    %c0_i32_0 = arith.constant 0 : i32
    %c0_i32_1 = arith.constant 0 : i32
    return %c0_i32, %c0_i32_0 : i32, i32
  }
  func.func @transform_2(%arg0: i32) -> (i32, i32) {
    %c0_i32 = arith.constant 0 : i32
    %c0_i32_0 = arith.constant 0 : i32
    %c0_i32_1 = arith.constant 0 : i32
    return %c0_i32, %c0_i32_0 : i32, i32
  }
  func.func @transform_3(%arg0: i32) -> (i32, i32) {
    %c0_i32 = arith.constant 0 : i32
    %c0_i32_0 = arith.constant 0 : i32
    %c0_i32_1 = arith.constant 0 : i32
    return %c0_i32, %c0_i32_0 : i32, i32
  }
  func.func @transform_4(%arg0: i32) -> (i32, i32) {
    %c0_i32 = arith.constant 0 : i32
    %c0_i32_0 = arith.constant 0 : i32
    %c0_i32_1 = arith.constant 0 : i32
    return %c0_i32, %c0_i32_0 : i32, i32
  }
  func.func @transform_5(%arg0: i32) -> (i32, i32) {
    %c0_i32 = arith.constant 0 : i32
    %c0_i32_0 = arith.constant 0 : i32
    return %arg0, %c0_i32 : i32, i32
  }
}

</mosaic_0001>

<bundles_post_ra>
// kernel: forward.4
= control target key start
LH: loop header
LB: loop body
LE: loop exit
PB: predicated region body
PF: predicated region fallthrough
CT: control target
= control target key end

     0   :  { %s1542_s12 = smov 0   ;;  %s1852_s0 = inlined_call_operand.vmem [shape: bf16[800,256], index: 0, kind: input, shape index: {}]   ;;  %s1853_s1 = inlined_call_operand.vmem [shape: bf16[256,32], index: 1, kind: input, shape index: {}]   ;;  %s1854_s2 = inlined_call_operand.vmem [shape: f32[1,32], index: 2, kind: input, shape index: {}]   ;;  %s1855_s3 = inlined_call_operand.vmem [shape: bf16[800,32], index: 3, kind: output, shape index: {}]  }
   0x1 LB: > { %s1203_s13 = sadd.s32 4294967295, %s1519_s12   ;;  %p1207_p0 = scmp.ge.s32.totalorder %s1519_s12, 1  ;;  %s1519_s12 = sphi %s1542_s12, %s13_s12  }
   0x2   : > { %p139_p1 = scmp.lt.s32.totalorder %s1519_s12, 3 }
   0x4   : > { %p140_p2 = pnand %p1207_p0, %p139_p1 }
   0x5   : > { %v1422_v0 = vld [vmem:[%s1853_s1] sm:$0xff] (!%p140_p2)   ;;  %v1521_v1 = vmov (!%p140_p2), 0   ;;  %s164_s16 = smul.u32 (!%p140_p2), 50, %s1203_s13  ;;  %v1423_v2 = vld [vmem:[%s1853_s1 + $0x8] sm:$0xff] (!%p140_p2)   ;;  %v1424_v3 = vld [vmem:[%s1853_s1 + $0x10] sm:$0xff] (!%p140_p2)   ;;  %vm1096_vm0 = vcmask (!%p140_p2), 257024  }
   0x6   : > { %143 = sbr.rel (%p140_p2) target bundleno = 387 (0x183), region = 32  ;;  %613 = vmatprep.subr.bf16.mxu0 (!%p140_p2), %v1521_v1  ;;  %1381 = vmatprep.subr.bf16.mxu1 (!%p140_p2), %v1521_v1  ;;  %v1425_v4 = vld [vmem:[%s1853_s1 + $0x18] sm:$0xff] (!%p140_p2)   ;;  %v1426_v5 = vld [vmem:[%s1853_s1 + $0x20] sm:$0xff] (!%p140_p2)   ;;  %v1427_v7 = vld [vmem:[%s1853_s1 + $0x28] sm:$0xff] (!%p140_p2)  }
   0x7   : > { %614 = vmatpush1.bf16.msra.mxu0 (!%p140_p2), %v1422_v0  ;;  %1397 = vmatpush1.bf16.msra.mxu1 (!%p140_p2), %v1422_v0  ;;  %p165_p3 = scmp.lt.s32.totalorder (!%p140_p2), %s164_s16, 99  ;;  %v1428_v9 = vld [vmem:[%s1853_s1 + $0x30] sm:$0xff] (!%p140_p2)   ;;  %v1429_v10 = vld [vmem:[%s1853_s1 + $0x38] sm:$0xff] (!%p140_p2)   ;;  %v1430_v11 = vld [vmem:[%s1853_s1 + $0x40] sm:$0xff] (!%p140_p2)  }
   0x8   : > { %615 = vmatprep.subr.bf16.mxu0 (!%p140_p2), %v1521_v1  ;;  %1382 = vmatprep.subr.bf16.mxu1 (!%p140_p2), %v1521_v1  ;;  %v1431_v12 = vld [vmem:[%s1853_s1 + $0x48] sm:$0xff] (!%p140_p2)   ;;  %v1432_v13 = vld [vmem:[%s1853_s1 + $0x50] sm:$0xff] (!%p140_p2)   ;;  %v1433_v14 = vld [vmem:[%s1853_s1 + $0x58] sm:$0xff] (!%p140_p2)  }
   0x9   : > { %v1434_v15 = vld [vmem:[%s1853_s1 + $0x60] sm:$0xff] (!%p140_p2)   ;;  %v1435_v16 = vld [vmem:[%s1853_s1 + $0x68] sm:$0xff] (!%p140_p2)   ;;  %v1436_v17 = vld [vmem:[%s1853_s1 + $0x70] sm:$0xff] (!%p140_p2)  }
   0xa   : > { %v1437_v18 = vld [vmem:[%s1853_s1 + $0x78] sm:$0xff] (!%p140_p2)  }
   0xb   : > { %616 = vmatpush1.bf16.msra.mxu0 (!%p140_p2), %v1423_v2  ;;  %1398 = vmatpush1.bf16.msra.mxu1 (!%p140_p2), %v1423_v2 }
   0xc   : > { %617 = vmatprep.subr.bf16.mxu0 (!%p140_p2), %v1521_v1  ;;  %1383 = vmatprep.subr.bf16.mxu1 (!%p140_p2), %v1521_v1 }
   0xd   : > { %s1857_s16 = smov (!%p165_p3, %s164_s16), 99 }
   0xe   : > { %s1330_s23 = sshll.u32 %s1857_s16, 3  ;;  %s1210_s29 = sshll.u32 %s1857_s16, 2 }
   0xf   : > { %618 = vmatpush1.bf16.msra.mxu0 %v1424_v3  ;;  %1399 = vmatpush1.bf16.msra.mxu1 %v1424_v3  ;;  %s1579_s28 = scalar_lea.vmem %s1852_s0, %s1330_s23  ;;  %v1691_v3 = vld [vmem:[%s1854_s2] ss:$0 sm:$0xff]  ;;  %s1701_s16 = scalar_lea.vmem %s1855_s3, %s1210_s29 }
  0x10   : > { %619 = vmatprep.subr.bf16.mxu0 %v1521_v1  ;;  %1384 = vmatprep.subr.bf16.mxu1 %v1521_v1  ;;  %v1440_v6 = vld [vmem:[%s1579_s28 + $0x4] ss:$8 sps:$4 sm:$0xff]   ;;  %v1443_v8 = vld [vmem:[%s1579_s28 + $0xd4] ss:$8 sps:$4 sm:$0xff]   ;;  %v1438_v19 = vld [vmem:[%s1579_s28] ss:$8 sps:$4 sm:$0xff]  }
  0x11   : > { %645 = vmatprep.mubr.bf16.mxu0 %v1440_v6  ;;  %749 = vmatprep.mubr.bf16.mxu1 %v1443_v8  ;;  %v1441_v20 = vld [vmem:[%s1579_s28 + $0xd0] ss:$8 sps:$4 sm:$0xff]   ;;  %v1444_v21 = vld [vmem:[%s1579_s28 + $0x14] ss:$8 sps:$4 sm:$0xff]   ;;  %v1447_v22 = vld [vmem:[%s1579_s28 + $0xe4] ss:$8 sps:$4 sm:$0xff]  }
  0x12   : > { %v1446_v23 = vld [vmem:[%s1579_s28 + $0x10] ss:$8 sps:$4 sm:$0xff]   ;;  %v1449_v24 = vld [vmem:[%s1579_s28 + $0xe0] ss:$8 sps:$4 sm:$0xff]   ;;  %v1450_v25 = vld [vmem:[%s1579_s28 + $0x24] ss:$8 sps:$4 sm:$0xff]  }
  0x13   : > { %620 = vmatpush1.bf16.msra.mxu0 %v1425_v4  ;;  %1400 = vmatpush1.bf16.msra.mxu1 %v1425_v4  ;;  %v1453_v26 = vld [vmem:[%s1579_s28 + $0xf4] ss:$8 sps:$4 sm:$0xff]   ;;  %v1452_v27 = vld [vmem:[%s1579_s28 + $0x20] ss:$8 sps:$4 sm:$0xff]   ;;  %v1455_v28 = vld [vmem:[%s1579_s28 + $0xf0] ss:$8 sps:$4 sm:$0xff]  }
  0x14   : > { %621 = vmatprep.subr.bf16.mxu0 %v1521_v1  ;;  %1385 = vmatprep.subr.bf16.mxu1 %v1521_v1  ;;  %v1456_v29 = vld [vmem:[%s1579_s28 + $0x34] ss:$8 sps:$4 sm:$0xff]   ;;  %v1459_v30 = vld [vmem:[%s1579_s28 + $0x104] ss:$8 sps:$4 sm:$0xff]   ;;  %v1458_v31 = vld [vmem:[%s1579_s28 + $0x30] ss:$8 sps:$4 sm:$0xff]  }
  0x15   : > { %v1461_v32 = vld [vmem:[%s1579_s28 + $0x100] ss:$8 sps:$4 sm:$0xff]   ;;  %v1462_v33 = vld [vmem:[%s1579_s28 + $0x44] ss:$8 sps:$4 sm:$0xff]   ;;  %v1465_v34 = vld [vmem:[%s1579_s28 + $0x114] ss:$8 sps:$4 sm:$0xff]  }
  0x16   : > { %v1464_v35 = vld [vmem:[%s1579_s28 + $0x40] ss:$8 sps:$4 sm:$0xff]   ;;  %v1467_v36 = vld [vmem:[%s1579_s28 + $0x110] ss:$8 sps:$4 sm:$0xff]   ;;  %v1468_v37 = vld [vmem:[%s1579_s28 + $0x54] ss:$8 sps:$4 sm:$0xff]  }
  0x17   : > { %622 = vmatpush1.bf16.msra.mxu0 %v1426_v5  ;;  %1401 = vmatpush1.bf16.msra.mxu1 %v1426_v5  ;;  %v1471_v38 = vld [vmem:[%s1579_s28 + $0x124] ss:$8 sps:$4 sm:$0xff]   ;;  %v1470_v39 = vld [vmem:[%s1579_s28 + $0x50] ss:$8 sps:$4 sm:$0xff]   ;;  %v1473_v40 = vld [vmem:[%s1579_s28 + $0x120] ss:$8 sps:$4 sm:$0xff]  }
  0x18   : > { %623 = vmatprep.subr.bf16.mxu0 %v1521_v1  ;;  %1386 = vmatprep.subr.bf16.mxu1 %v1521_v1  ;;  %v1474_v41 = vld [vmem:[%s1579_s28 + $0x64] ss:$8 sps:$4 sm:$0xff]   ;;  %v1477_v42 = vld [vmem:[%s1579_s28 + $0x134] ss:$8 sps:$4 sm:$0xff]   ;;  %v1476_v43 = vld [vmem:[%s1579_s28 + $0x60] ss:$8 sps:$4 sm:$0xff]  }
  0x19   : > { %v1479_v44 = vld [vmem:[%s1579_s28 + $0x130] ss:$8 sps:$4 sm:$0xff]   ;;  %v1480_v45 = vld [vmem:[%s1579_s28 + $0x74] ss:$8 sps:$4 sm:$0xff]   ;;  %v1483_v46 = vld [vmem:[%s1579_s28 + $0x144] ss:$8 sps:$4 sm:$0xff]  }
  0x1a   : > { %v1482_v47 = vld [vmem:[%s1579_s28 + $0x70] ss:$8 sps:$4 sm:$0xff]   ;;  %v1485_v48 = vld [vmem:[%s1579_s28 + $0x140] ss:$8 sps:$4 sm:$0xff]   ;;  %v1486_v49 = vld [vmem:[%s1579_s28 + $0x84] ss:$8 sps:$4 sm:$0xff]  }
  0x1b   : > { %624 = vmatpush1.bf16.msra.mxu0 %v1427_v7  ;;  %1402 = vmatpush1.bf16.msra.mxu1 %v1427_v7  ;;  %v1489_v50 = vld [vmem:[%s1579_s28 + $0x154] ss:$8 sps:$4 sm:$0xff]   ;;  %v1488_v51 = vld [vmem:[%s1579_s28 + $0x80] ss:$8 sps:$4 sm:$0xff]   ;;  %v1491_v52 = vld [vmem:[%s1579_s28 + $0x150] ss:$8 sps:$4 sm:$0xff]  }
  0x1c   : > { %625 = vmatprep.subr.bf16.mxu0 %v1521_v1  ;;  %1387 = vmatprep.subr.bf16.mxu1 %v1521_v1  ;;  %v1492_v53 = vld [vmem:[%s1579_s28 + $0x94] ss:$8 sps:$4 sm:$0xff]   ;;  %v1495_v54 = vld [vmem:[%s1579_s28 + $0x164] ss:$8 sps:$4 sm:$0xff]   ;;  %v1494_v55 = vld [vmem:[%s1579_s28 + $0x90] ss:$8 sps:$4 sm:$0xff]  }
  0x1d   : > { %v1497_v56 = vld [vmem:[%s1579_s28 + $0x160] ss:$8 sps:$4 sm:$0xff]   ;;  %v1498_v57 = vld [vmem:[%s1579_s28 + $0xa4] ss:$8 sps:$4 sm:$0xff]   ;;  %v1501_v58 = vld [vmem:[%s1579_s28 + $0x174] ss:$8 sps:$4 sm:$0xff]  }
  0x1e   : > { %v1500_v59 = vld [vmem:[%s1579_s28 + $0xa0] ss:$8 sps:$4 sm:$0xff]   ;;  %v1503_v60 = vld [vmem:[%s1579_s28 + $0x170] ss:$8 sps:$4 sm:$0xff]   ;;  %v1504_v61 = vld [vmem:[%s1579_s28 + $0xb4] ss:$8 sps:$4 sm:$0xff]  }
  0x1f   : > { %626 = vmatpush1.bf16.msra.mxu0 %v1428_v9  ;;  %1403 = vmatpush1.bf16.msra.mxu1 %v1428_v9  ;;  %v1507_v62 = vld [vmem:[%s1579_s28 + $0x184] ss:$8 sps:$4 sm:$0xff]   ;;  %v1506_v63 = vld [vmem:[%s1579_s28 + $0xb0] ss:$8 sps:$4 sm:$0xff]   ;;  %v1509_v0 = vld [vmem:[%s1579_s28 + $0x180] ss:$8 sps:$4 sm:$0xff]  }
  0x20   : > { %627 = vmatprep.subr.bf16.mxu0 %v1521_v1  ;;  %1388 = vmatprep.subr.bf16.mxu1 %v1521_v1  ;;  %v1512_v2 = vld [vmem:[%s1579_s28 + $0xc0] ss:$8 sps:$4 sm:$0xff]  }
  0x23   : > { %628 = vmatpush1.bf16.msra.mxu0 %v1429_v10  ;;  %1404 = vmatpush1.bf16.msra.mxu1 %v1429_v10 }
  0x24   : > { %629 = vmatprep.subr.bf16.mxu0 %v1521_v1  ;;  %1389 = vmatprep.subr.bf16.mxu1 %v1521_v1 }
  0x27   : > { %630 = vmatpush1.bf16.msra.mxu0 %v1430_v11  ;;  %1405 = vmatpush1.bf16.msra.mxu1 %v1430_v11 }
  0x28   : > { %631 = vmatprep.subr.bf16.mxu0 %v1521_v1  ;;  %1390 = vmatprep.subr.bf16.mxu1 %v1521_v1 }
  0x2b   : > { %632 = vmatpush1.bf16.msra.mxu0 %v1431_v12  ;;  %1406 = vmatpush1.bf16.msra.mxu1 %v1431_v12 }
  0x2c   : > { %633 = vmatprep.subr.bf16.mxu0 %v1521_v1  ;;  %1391 = vmatprep.subr.bf16.mxu1 %v1521_v1 }
  0x2f   : > { %634 = vmatpush1.bf16.msra.mxu0 %v1432_v13  ;;  %1407 = vmatpush1.bf16.msra.mxu1 %v1432_v13 }
  0x30   : > { %635 = vmatprep.subr.bf16.mxu0 %v1521_v1  ;;  %1392 = vmatprep.subr.bf16.mxu1 %v1521_v1 }
  0x33   : > { %636 = vmatpush1.bf16.msra.mxu0 %v1433_v14  ;;  %1408 = vmatpush1.bf16.msra.mxu1 %v1433_v14 }
  0x34   : > { %637 = vmatprep.subr.bf16.mxu0 %v1521_v1  ;;  %1393 = vmatprep.subr.bf16.mxu1 %v1521_v1 }
  0x37   : > { %638 = vmatpush1.bf16.msra.mxu0 %v1434_v15  ;;  %1409 = vmatpush1.bf16.msra.mxu1 %v1434_v15 }
  0x38   : > { %639 = vmatprep.subr.bf16.mxu0 %v1521_v1  ;;  %1394 = vmatprep.subr.bf16.mxu1 %v1521_v1 }
  0x3b   : > { %640 = vmatpush1.bf16.msra.mxu0 %v1435_v16  ;;  %1410 = vmatpush1.bf16.msra.mxu1 %v1435_v16 }
  0x3c   : > { %641 = vmatprep.subr.bf16.mxu0 %v1521_v1  ;;  %1395 = vmatprep.subr.bf16.mxu1 %v1521_v1 }
  0x3f   : > { %642 = vmatpush1.bf16.msra.mxu0 %v1436_v17  ;;  %1411 = vmatpush1.bf16.msra.mxu1 %v1436_v17 }
  0x40   : > { %643 = vmatprep.subr.bf16.mxu0 %v1521_v1  ;;  %1396 = vmatprep.subr.bf16.mxu1 %v1521_v1  ;;  %v1510_v1 = vld [vmem:[%s1579_s28 + $0xc4] ss:$8 sps:$4 sm:$0xff]  }
  0x43   : > { %644 = vmatpush1.bf16.msra.mxu0 %v1437_v18  ;;  %1412 = vmatpush1.bf16.msra.mxu1 %v1437_v18 }
  0x46   : > { %646 = vmatmul.mubr.bf16.vlgmr.msra.gmra.mrb[0].mxu0 %v1438_v19  ;;  %750 = vmatmul.mubr.bf16.vlgmr.msra.gmra.mrb[0].mxu1 %v1441_v20 }
  0x47   : > { %653 = vmatprep.mubr.bf16.mxu0 %v1444_v21  ;;  %757 = vmatprep.mubr.bf16.mxu1 %v1447_v22 }
  0x4e   : > { %654 = vmatmul.mubr.bf16.gmra.mrb[4].mxu0 %v1446_v23  ;;  %758 = vmatmul.mubr.bf16.gmra.mrb[4].mxu1 %v1449_v24 }
  0x4f   : > { %661 = vmatprep.mubr.bf16.mxu0 %v1450_v25  ;;  %765 = vmatprep.mubr.bf16.mxu1 %v1453_v26 }
  0x56   : > { %662 = vmatmul.mubr.bf16.gmra.mrb[8].mxu0 %v1452_v27  ;;  %766 = vmatmul.mubr.bf16.gmra.mrb[8].mxu1 %v1455_v28 }
  0x57   : > { %669 = vmatprep.mubr.bf16.mxu0 %v1456_v29  ;;  %773 = vmatprep.mubr.bf16.mxu1 %v1459_v30 }
  0x5e   : > { %670 = vmatmul.mubr.bf16.gmra.mrb[12].mxu0 %v1458_v31  ;;  %774 = vmatmul.mubr.bf16.gmra.mrb[12].mxu1 %v1461_v32 }
  0x5f   : > { %677 = vmatprep.mubr.bf16.mxu0 %v1462_v33  ;;  %781 = vmatprep.mubr.bf16.mxu1 %v1465_v34 }
  0x66   : > { %678 = vmatmul.mubr.bf16.gmra.mrb[16].mxu0 %v1464_v35  ;;  %782 = vmatmul.mubr.bf16.gmra.mrb[16].mxu1 %v1467_v36 }
  0x67   : > { %685 = vmatprep.mubr.bf16.mxu0 %v1468_v37  ;;  %789 = vmatprep.mubr.bf16.mxu1 %v1471_v38 }
  0x6e   : > { %686 = vmatmul.mubr.bf16.gmra.mrb[20].mxu0 %v1470_v39  ;;  %790 = vmatmul.mubr.bf16.gmra.mrb[20].mxu1 %v1473_v40 }
  0x6f   : > { %693 = vmatprep.mubr.bf16.mxu0 %v1474_v41  ;;  %797 = vmatprep.mubr.bf16.mxu1 %v1477_v42 }
  0x76   : > { %694 = vmatmul.mubr.bf16.gmra.mrb[24].mxu0 %v1476_v43  ;;  %798 = vmatmul.mubr.bf16.gmra.mrb[24].mxu1 %v1479_v44 }
  0x77   : > { %701 = vmatprep.mubr.bf16.mxu0 %v1480_v45  ;;  %805 = vmatprep.mubr.bf16.mxu1 %v1483_v46 }
  0x7e   : > { %702 = vmatmul.mubr.bf16.gmra.mrb[28].mxu0 %v1482_v47  ;;  %806 = vmatmul.mubr.bf16.gmra.mrb[28].mxu1 %v1485_v48 }
  0x7f   : > { %709 = vmatprep.mubr.bf16.mxu0 %v1486_v49  ;;  %813 = vmatprep.mubr.bf16.mxu1 %v1489_v50 }
  0x86   : > { %710 = vmatmul.mubr.bf16.gmra.mrb[32].mxu0 %v1488_v51  ;;  %814 = vmatmul.mubr.bf16.gmra.mrb[32].mxu1 %v1491_v52 }
  0x87   : > { %717 = vmatprep.mubr.bf16.mxu0 %v1492_v53  ;;  %821 = vmatprep.mubr.bf16.mxu1 %v1495_v54 }
  0x8e   : > { %718 = vmatmul.mubr.bf16.gmra.mrb[36].mxu0 %v1494_v55  ;;  %822 = vmatmul.mubr.bf16.gmra.mrb[36].mxu1 %v1497_v56 }
  0x8f   : > { %725 = vmatprep.mubr.bf16.mxu0 %v1498_v57  ;;  %829 = vmatprep.mubr.bf16.mxu1 %v1501_v58 }
  0x96   : > { %726 = vmatmul.mubr.bf16.gmra.mrb[40].mxu0 %v1500_v59  ;;  %830 = vmatmul.mubr.bf16.gmra.mrb[40].mxu1 %v1503_v60 }
  0x97   : > { %733 = vmatprep.mubr.bf16.mxu0 %v1504_v61  ;;  %837 = vmatprep.mubr.bf16.mxu1 %v1507_v62 }
  0x9e   : > { %734 = vmatmul.mubr.bf16.gmra.mrb[44].mxu0 %v1506_v63  ;;  %838 = vmatmul.mubr.bf16.gmra.mrb[44].mxu1 %v1509_v0 }
  0x9f   : > { %741 = vmatprep.mubr.bf16.mxu0 %v1510_v1 }
  0xa6   : > { %742 = vmatmul.mubr.bf16.gmra.mrb[48].mxu0 %v1512_v2 }
 0x119   : > { %v647_v4 = vpop.f32.mrb[0].mxu0  ;;  %v751_v5 = vpop.f32.mrb[0].mxu1 }
 0x11a   : > { %v648_v6 = vadd.f32 %v1691_v3, %v647_v4  ;;  %v649_v7 = vpop.f32.mrb[1].mxu0  ;;  %v752_v8 = vadd.f32 %v1691_v3, %v751_v5  ;;  %v753_v9 = vpop.f32.mrb[1].mxu1 }
 0x11b   : > { %v650_v10 = vpop.f32.mrb[2].mxu0  ;;  %v754_v11 = vpop.f32.mrb[2].mxu1 }
 0x11c   : > { %v846_v12 = vmax.f32 %v648_v6, 0.0  ;;  %v651_v13 = vadd.f32 %v1691_v3, %v650_v10  ;;  %v652_v14 = vpop.f32.mrb[3].mxu0  ;;  %v872_v15 = vmax.f32 %v752_v8, 0.0  ;;  %v755_v16 = vadd.f32 %v1691_v3, %v754_v11  ;;  %v756_v17 = vpop.f32.mrb[3].mxu1 }
 0x11e   : > { %v1331_v18 = vpack.c.bf16 %v846_v12, %v846_v12  ;;  %v847_v19 = vmax.f32 %v651_v13, 0.0  ;;  %v1357_v20 = vpack.c.bf16 %v872_v15, %v872_v15  ;;  %v873_v21 = vmax.f32 %v755_v16, 0.0 }
 0x120   : > { %1097 = vst.msk [vmem:[%s1701_s16] sm:$0xf] %vm1096_vm0, %v1331_v18  ;;  %v1332_v22 = vpack.c.bf16 %v847_v19, %v847_v19  ;;  %1123 = vst.msk [vmem:[%s1701_s16 + $0x68] sm:$0xf] %vm1096_vm0, %v1357_v20  ;;  %v1358_v23 = vpack.c.bf16 %v873_v21, %v873_v21 }
 0x121   : > { %v655_v24 = vpop.f32.mrb[4].mxu0  ;;  %v759_v25 = vpop.f32.mrb[4].mxu1 }
 0x122   : > { %1098 = vst.msk [vmem:[%s1701_s16 + $0x4] sm:$0xf] %vm1096_vm0, %v1332_v22  ;;  %1124 = vst.msk [vmem:[%s1701_s16 + $0x6c] sm:$0xf] %vm1096_vm0, %v1358_v23  ;;  %v656_v26 = vadd.f32 %v1691_v3, %v655_v24  ;;  %v657_v27 = vpop.f32.mrb[5].mxu0  ;;  %v760_v28 = vadd.f32 %v1691_v3, %v759_v25  ;;  %v761_v29 = vpop.f32.mrb[5].mxu1 }
 0x123   : > { %v658_v30 = vpop.f32.mrb[6].mxu0  ;;  %v762_v31 = vpop.f32.mrb[6].mxu1 }
 0x124   : > { %v848_v32 = vmax.f32 %v656_v26, 0.0  ;;  %v659_v33 = vadd.f32 %v1691_v3, %v658_v30  ;;  %v660_v34 = vpop.f32.mrb[7].mxu0  ;;  %v874_v35 = vmax.f32 %v760_v28, 0.0  ;;  %v763_v36 = vadd.f32 %v1691_v3, %v762_v31  ;;  %v764_v37 = vpop.f32.mrb[7].mxu1 }
 0x126   : > { %v1333_v38 = vpack.c.bf16 %v848_v32, %v848_v32  ;;  %v849_v39 = vmax.f32 %v659_v33, 0.0  ;;  %v1359_v40 = vpack.c.bf16 %v874_v35, %v874_v35  ;;  %v875_v41 = vmax.f32 %v763_v36, 0.0 }
 0x128   : > { %1099 = vst.msk [vmem:[%s1701_s16 + $0x8] sm:$0xf] %vm1096_vm0, %v1333_v38  ;;  %v1334_v42 = vpack.c.bf16 %v849_v39, %v849_v39  ;;  %1125 = vst.msk [vmem:[%s1701_s16 + $0x70] sm:$0xf] %vm1096_vm0, %v1359_v40  ;;  %v1360_v43 = vpack.c.bf16 %v875_v41, %v875_v41 }
 0x129   : > { %v663_v44 = vpop.f32.mrb[8].mxu0  ;;  %v767_v45 = vpop.f32.mrb[8].mxu1 }
 0x12a   : > { %1100 = vst.msk [vmem:[%s1701_s16 + $0xc] sm:$0xf] %vm1096_vm0, %v1334_v42  ;;  %1126 = vst.msk [vmem:[%s1701_s16 + $0x74] sm:$0xf] %vm1096_vm0, %v1360_v43  ;;  %v664_v46 = vadd.f32 %v1691_v3, %v663_v44  ;;  %v665_v47 = vpop.f32.mrb[9].mxu0  ;;  %v768_v48 = vadd.f32 %v1691_v3, %v767_v45  ;;  %v769_v49 = vpop.f32.mrb[9].mxu1 }
 0x12b   : > { %v666_v50 = vpop.f32.mrb[10].mxu0  ;;  %v770_v51 = vpop.f32.mrb[10].mxu1 }
 0x12c   : > { %v850_v52 = vmax.f32 %v664_v46, 0.0  ;;  %v667_v53 = vadd.f32 %v1691_v3, %v666_v50  ;;  %v668_v54 = vpop.f32.mrb[11].mxu0  ;;  %v876_v55 = vmax.f32 %v768_v48, 0.0  ;;  %v771_v56 = vadd.f32 %v1691_v3, %v770_v51  ;;  %v772_v57 = vpop.f32.mrb[11].mxu1 }
 0x12e   : > { %v1335_v58 = vpack.c.bf16 %v850_v52, %v850_v52  ;;  %v851_v59 = vmax.f32 %v667_v53, 0.0  ;;  %v1361_v60 = vpack.c.bf16 %v876_v55, %v876_v55  ;;  %v877_v61 = vmax.f32 %v771_v56, 0.0 }
 0x130   : > { %1101 = vst.msk [vmem:[%s1701_s16 + $0x10] sm:$0xf] %vm1096_vm0, %v1335_v58  ;;  %v1336_v62 = vpack.c.bf16 %v851_v59, %v851_v59  ;;  %1127 = vst.msk [vmem:[%s1701_s16 + $0x78] sm:$0xf] %vm1096_vm0, %v1361_v60  ;;  %v1362_v63 = vpack.c.bf16 %v877_v61, %v877_v61 }
 0x131   : > { %v671_v0 = vpop.f32.mrb[12].mxu0  ;;  %v775_v1 = vpop.f32.mrb[12].mxu1 }
 0x132   : > { %1102 = vst.msk [vmem:[%s1701_s16 + $0x14] sm:$0xf] %vm1096_vm0, %v1336_v62  ;;  %1128 = vst.msk [vmem:[%s1701_s16 + $0x7c] sm:$0xf] %vm1096_vm0, %v1362_v63  ;;  %v672_v2 = vadd.f32 %v1691_v3, %v671_v0  ;;  %v673_v4 = vpop.f32.mrb[13].mxu0  ;;  %v776_v5 = vadd.f32 %v1691_v3, %v775_v1  ;;  %v777_v6 = vpop.f32.mrb[13].mxu1 }
 0x133   : > { %v674_v7 = vpop.f32.mrb[14].mxu0  ;;  %v778_v8 = vpop.f32.mrb[14].mxu1 }
 0x134   : > { %v852_v9 = vmax.f32 %v672_v2, 0.0  ;;  %v675_v10 = vadd.f32 %v1691_v3, %v674_v7  ;;  %v676_v11 = vpop.f32.mrb[15].mxu0  ;;  %v878_v12 = vmax.f32 %v776_v5, 0.0  ;;  %v779_v13 = vadd.f32 %v1691_v3, %v778_v8  ;;  %v780_v14 = vpop.f32.mrb[15].mxu1 }
 0x136   : > { %v1337_v15 = vpack.c.bf16 %v852_v9, %v852_v9  ;;  %v853_v16 = vmax.f32 %v675_v10, 0.0  ;;  %v1363_v17 = vpack.c.bf16 %v878_v12, %v878_v12  ;;  %v879_v18 = vmax.f32 %v779_v13, 0.0 }
 0x138   : > { %1103 = vst.msk [vmem:[%s1701_s16 + $0x18] sm:$0xf] %vm1096_vm0, %v1337_v15  ;;  %v1338_v19 = vpack.c.bf16 %v853_v16, %v853_v16  ;;  %1129 = vst.msk [vmem:[%s1701_s16 + $0x80] sm:$0xf] %vm1096_vm0, %v1363_v17  ;;  %v1364_v20 = vpack.c.bf16 %v879_v18, %v879_v18 }
 0x139   : > { %v679_v21 = vpop.f32.mrb[16].mxu0  ;;  %v783_v22 = vpop.f32.mrb[16].mxu1 }
 0x13a   : > { %1104 = vst.msk [vmem:[%s1701_s16 + $0x1c] sm:$0xf] %vm1096_vm0, %v1338_v19  ;;  %1130 = vst.msk [vmem:[%s1701_s16 + $0x84] sm:$0xf] %vm1096_vm0, %v1364_v20  ;;  %v680_v23 = vadd.f32 %v1691_v3, %v679_v21  ;;  %v681_v24 = vpop.f32.mrb[17].mxu0  ;;  %v784_v25 = vadd.f32 %v1691_v3, %v783_v22  ;;  %v785_v26 = vpop.f32.mrb[17].mxu1 }
 0x13b   : > { %v682_v27 = vpop.f32.mrb[18].mxu0  ;;  %v786_v28 = vpop.f32.mrb[18].mxu1 }
 0x13c   : > { %v854_v29 = vmax.f32 %v680_v23, 0.0  ;;  %v683_v30 = vadd.f32 %v1691_v3, %v682_v27  ;;  %v684_v31 = vpop.f32.mrb[19].mxu0  ;;  %v880_v32 = vmax.f32 %v784_v25, 0.0  ;;  %v787_v33 = vadd.f32 %v1691_v3, %v786_v28  ;;  %v788_v34 = vpop.f32.mrb[19].mxu1 }
 0x13e   : > { %v1339_v35 = vpack.c.bf16 %v854_v29, %v854_v29  ;;  %v855_v36 = vmax.f32 %v683_v30, 0.0  ;;  %v1365_v37 = vpack.c.bf16 %v880_v32, %v880_v32  ;;  %v881_v38 = vmax.f32 %v787_v33, 0.0 }
 0x140   : > { %1105 = vst.msk [vmem:[%s1701_s16 + $0x20] sm:$0xf] %vm1096_vm0, %v1339_v35  ;;  %v1340_v39 = vpack.c.bf16 %v855_v36, %v855_v36  ;;  %1131 = vst.msk [vmem:[%s1701_s16 + $0x88] sm:$0xf] %vm1096_vm0, %v1365_v37  ;;  %v1366_v40 = vpack.c.bf16 %v881_v38, %v881_v38 }
 0x141   : > { %v687_v41 = vpop.f32.mrb[20].mxu0  ;;  %v791_v42 = vpop.f32.mrb[20].mxu1 }
 0x142   : > { %1106 = vst.msk [vmem:[%s1701_s16 + $0x24] sm:$0xf] %vm1096_vm0, %v1340_v39  ;;  %1132 = vst.msk [vmem:[%s1701_s16 + $0x8c] sm:$0xf] %vm1096_vm0, %v1366_v40  ;;  %v688_v43 = vadd.f32 %v1691_v3, %v687_v41  ;;  %v689_v44 = vpop.f32.mrb[21].mxu0  ;;  %v792_v45 = vadd.f32 %v1691_v3, %v791_v42  ;;  %v793_v46 = vpop.f32.mrb[21].mxu1 }
 0x143   : > { %v690_v47 = vpop.f32.mrb[22].mxu0  ;;  %v794_v48 = vpop.f32.mrb[22].mxu1 }
 0x144   : > { %v856_v49 = vmax.f32 %v688_v43, 0.0  ;;  %v691_v50 = vadd.f32 %v1691_v3, %v690_v47  ;;  %v692_v51 = vpop.f32.mrb[23].mxu0  ;;  %v882_v52 = vmax.f32 %v792_v45, 0.0  ;;  %v795_v53 = vadd.f32 %v1691_v3, %v794_v48  ;;  %v796_v54 = vpop.f32.mrb[23].mxu1 }
 0x146   : > { %v1341_v55 = vpack.c.bf16 %v856_v49, %v856_v49  ;;  %v857_v56 = vmax.f32 %v691_v50, 0.0  ;;  %v1367_v57 = vpack.c.bf16 %v882_v52, %v882_v52  ;;  %v883_v58 = vmax.f32 %v795_v53, 0.0 }
 0x148   : > { %1107 = vst.msk [vmem:[%s1701_s16 + $0x28] sm:$0xf] %vm1096_vm0, %v1341_v55  ;;  %v1342_v59 = vpack.c.bf16 %v857_v56, %v857_v56  ;;  %1133 = vst.msk [vmem:[%s1701_s16 + $0x90] sm:$0xf] %vm1096_vm0, %v1367_v57  ;;  %v1368_v60 = vpack.c.bf16 %v883_v58, %v883_v58 }
 0x149   : > { %v695_v61 = vpop.f32.mrb[24].mxu0  ;;  %v799_v62 = vpop.f32.mrb[24].mxu1 }
 0x14a   : > { %1108 = vst.msk [vmem:[%s1701_s16 + $0x2c] sm:$0xf] %vm1096_vm0, %v1342_v59  ;;  %1134 = vst.msk [vmem:[%s1701_s16 + $0x94] sm:$0xf] %vm1096_vm0, %v1368_v60  ;;  %v696_v63 = vadd.f32 %v1691_v3, %v695_v61  ;;  %v697_v0 = vpop.f32.mrb[25].mxu0  ;;  %v800_v1 = vadd.f32 %v1691_v3, %v799_v62  ;;  %v801_v2 = vpop.f32.mrb[25].mxu1 }
 0x14b   : > { %v698_v4 = vpop.f32.mrb[26].mxu0  ;;  %v802_v5 = vpop.f32.mrb[26].mxu1 }
 0x14c   : > { %v858_v6 = vmax.f32 %v696_v63, 0.0  ;;  %v699_v7 = vadd.f32 %v1691_v3, %v698_v4  ;;  %v700_v8 = vpop.f32.mrb[27].mxu0  ;;  %v884_v9 = vmax.f32 %v800_v1, 0.0  ;;  %v803_v10 = vadd.f32 %v1691_v3, %v802_v5  ;;  %v804_v11 = vpop.f32.mrb[27].mxu1 }
 0x14e   : > { %v1343_v12 = vpack.c.bf16 %v858_v6, %v858_v6  ;;  %v859_v13 = vmax.f32 %v699_v7, 0.0  ;;  %v1369_v14 = vpack.c.bf16 %v884_v9, %v884_v9  ;;  %v885_v15 = vmax.f32 %v803_v10, 0.0 }
 0x150   : > { %1109 = vst.msk [vmem:[%s1701_s16 + $0x30] sm:$0xf] %vm1096_vm0, %v1343_v12  ;;  %v1344_v16 = vpack.c.bf16 %v859_v13, %v859_v13  ;;  %1135 = vst.msk [vmem:[%s1701_s16 + $0x98] sm:$0xf] %vm1096_vm0, %v1369_v14  ;;  %v1370_v17 = vpack.c.bf16 %v885_v15, %v885_v15 }
 0x151   : > { %v703_v18 = vpop.f32.mrb[28].mxu0  ;;  %v807_v19 = vpop.f32.mrb[28].mxu1 }
 0x152   : > { %1110 = vst.msk [vmem:[%s1701_s16 + $0x34] sm:$0xf] %vm1096_vm0, %v1344_v16  ;;  %1136 = vst.msk [vmem:[%s1701_s16 + $0x9c] sm:$0xf] %vm1096_vm0, %v1370_v17  ;;  %v704_v20 = vadd.f32 %v1691_v3, %v703_v18  ;;  %v705_v21 = vpop.f32.mrb[29].mxu0  ;;  %v808_v22 = vadd.f32 %v1691_v3, %v807_v19  ;;  %v809_v23 = vpop.f32.mrb[29].mxu1 }
 0x153   : > { %v706_v24 = vpop.f32.mrb[30].mxu0  ;;  %v810_v25 = vpop.f32.mrb[30].mxu1 }
 0x154   : > { %v860_v26 = vmax.f32 %v704_v20, 0.0  ;;  %v707_v27 = vadd.f32 %v1691_v3, %v706_v24  ;;  %v708_v28 = vpop.f32.mrb[31].mxu0  ;;  %v886_v29 = vmax.f32 %v808_v22, 0.0  ;;  %v811_v30 = vadd.f32 %v1691_v3, %v810_v25  ;;  %v812_v31 = vpop.f32.mrb[31].mxu1 }
 0x156   : > { %v1345_v32 = vpack.c.bf16 %v860_v26, %v860_v26  ;;  %v861_v33 = vmax.f32 %v707_v27, 0.0  ;;  %v1371_v34 = vpack.c.bf16 %v886_v29, %v886_v29  ;;  %v887_v35 = vmax.f32 %v811_v30, 0.0 }
 0x158   : > { %1111 = vst.msk [vmem:[%s1701_s16 + $0x38] sm:$0xf] %vm1096_vm0, %v1345_v32  ;;  %v1346_v36 = vpack.c.bf16 %v861_v33, %v861_v33  ;;  %1137 = vst.msk [vmem:[%s1701_s16 + $0xa0] sm:$0xf] %vm1096_vm0, %v1371_v34  ;;  %v1372_v37 = vpack.c.bf16 %v887_v35, %v887_v35 }
 0x159   : > { %v711_v38 = vpop.f32.mrb[32].mxu0  ;;  %v815_v39 = vpop.f32.mrb[32].mxu1 }
 0x15a   : > { %1112 = vst.msk [vmem:[%s1701_s16 + $0x3c] sm:$0xf] %vm1096_vm0, %v1346_v36  ;;  %1138 = vst.msk [vmem:[%s1701_s16 + $0xa4] sm:$0xf] %vm1096_vm0, %v1372_v37  ;;  %v712_v40 = vadd.f32 %v1691_v3, %v711_v38  ;;  %v713_v41 = vpop.f32.mrb[33].mxu0  ;;  %v816_v42 = vadd.f32 %v1691_v3, %v815_v39  ;;  %v817_v43 = vpop.f32.mrb[33].mxu1 }
 0x15b   : > { %v714_v44 = vpop.f32.mrb[34].mxu0  ;;  %v818_v45 = vpop.f32.mrb[34].mxu1 }
 0x15c   : > { %v862_v46 = vmax.f32 %v712_v40, 0.0  ;;  %v715_v47 = vadd.f32 %v1691_v3, %v714_v44  ;;  %v716_v48 = vpop.f32.mrb[35].mxu0  ;;  %v888_v49 = vmax.f32 %v816_v42, 0.0  ;;  %v819_v50 = vadd.f32 %v1691_v3, %v818_v45  ;;  %v820_v51 = vpop.f32.mrb[35].mxu1 }
 0x15e   : > { %v1347_v52 = vpack.c.bf16 %v862_v46, %v862_v46  ;;  %v863_v53 = vmax.f32 %v715_v47, 0.0  ;;  %v1373_v54 = vpack.c.bf16 %v888_v49, %v888_v49  ;;  %v889_v55 = vmax.f32 %v819_v50, 0.0 }
 0x160   : > { %1113 = vst.msk [vmem:[%s1701_s16 + $0x40] sm:$0xf] %vm1096_vm0, %v1347_v52  ;;  %v1348_v56 = vpack.c.bf16 %v863_v53, %v863_v53  ;;  %1139 = vst.msk [vmem:[%s1701_s16 + $0xa8] sm:$0xf] %vm1096_vm0, %v1373_v54  ;;  %v1374_v57 = vpack.c.bf16 %v889_v55, %v889_v55 }
 0x161   : > { %v719_v58 = vpop.f32.mrb[36].mxu0  ;;  %v823_v59 = vpop.f32.mrb[36].mxu1 }
 0x162   : > { %1114 = vst.msk [vmem:[%s1701_s16 + $0x44] sm:$0xf] %vm1096_vm0, %v1348_v56  ;;  %1140 = vst.msk [vmem:[%s1701_s16 + $0xac] sm:$0xf] %vm1096_vm0, %v1374_v57  ;;  %v720_v60 = vadd.f32 %v1691_v3, %v719_v58  ;;  %v721_v61 = vpop.f32.mrb[37].mxu0  ;;  %v824_v62 = vadd.f32 %v1691_v3, %v823_v59  ;;  %v825_v63 = vpop.f32.mrb[37].mxu1 }
 0x163   : > { %v722_v0 = vpop.f32.mrb[38].mxu0  ;;  %v826_v1 = vpop.f32.mrb[38].mxu1 }
 0x164   : > { %v864_v2 = vmax.f32 %v720_v60, 0.0  ;;  %v723_v4 = vadd.f32 %v1691_v3, %v722_v0  ;;  %v724_v5 = vpop.f32.mrb[39].mxu0  ;;  %v890_v6 = vmax.f32 %v824_v62, 0.0  ;;  %v827_v7 = vadd.f32 %v1691_v3, %v826_v1  ;;  %v828_v8 = vpop.f32.mrb[39].mxu1 }
 0x166   : > { %v1349_v9 = vpack.c.bf16 %v864_v2, %v864_v2  ;;  %v865_v10 = vmax.f32 %v723_v4, 0.0  ;;  %v1375_v11 = vpack.c.bf16 %v890_v6, %v890_v6  ;;  %v891_v12 = vmax.f32 %v827_v7, 0.0 }
 0x168   : > { %1115 = vst.msk [vmem:[%s1701_s16 + $0x48] sm:$0xf] %vm1096_vm0, %v1349_v9  ;;  %v1350_v13 = vpack.c.bf16 %v865_v10, %v865_v10  ;;  %1141 = vst.msk [vmem:[%s1701_s16 + $0xb0] sm:$0xf] %vm1096_vm0, %v1375_v11  ;;  %v1376_v14 = vpack.c.bf16 %v891_v12, %v891_v12 }
 0x169   : > { %v727_v15 = vpop.f32.mrb[40].mxu0  ;;  %v831_v16 = vpop.f32.mrb[40].mxu1 }
 0x16a   : > { %1116 = vst.msk [vmem:[%s1701_s16 + $0x4c] sm:$0xf] %vm1096_vm0, %v1350_v13  ;;  %1142 = vst.msk [vmem:[%s1701_s16 + $0xb4] sm:$0xf] %vm1096_vm0, %v1376_v14  ;;  %v728_v17 = vadd.f32 %v1691_v3, %v727_v15  ;;  %v729_v18 = vpop.f32.mrb[41].mxu0  ;;  %v832_v19 = vadd.f32 %v1691_v3, %v831_v16  ;;  %v833_v20 = vpop.f32.mrb[41].mxu1 }
 0x16b   : > { %v730_v21 = vpop.f32.mrb[42].mxu0  ;;  %v834_v22 = vpop.f32.mrb[42].mxu1 }
 0x16c   : > { %v866_v23 = vmax.f32 %v728_v17, 0.0  ;;  %v731_v24 = vadd.f32 %v1691_v3, %v730_v21  ;;  %v732_v25 = vpop.f32.mrb[43].mxu0  ;;  %v892_v26 = vmax.f32 %v832_v19, 0.0  ;;  %v835_v27 = vadd.f32 %v1691_v3, %v834_v22  ;;  %v836_v28 = vpop.f32.mrb[43].mxu1 }
 0x16e   : > { %v1351_v29 = vpack.c.bf16 %v866_v23, %v866_v23  ;;  %v867_v30 = vmax.f32 %v731_v24, 0.0  ;;  %v1377_v31 = vpack.c.bf16 %v892_v26, %v892_v26  ;;  %v893_v32 = vmax.f32 %v835_v27, 0.0 }
 0x170   : > { %1117 = vst.msk [vmem:[%s1701_s16 + $0x50] sm:$0xf] %vm1096_vm0, %v1351_v29  ;;  %v1352_v33 = vpack.c.bf16 %v867_v30, %v867_v30  ;;  %1143 = vst.msk [vmem:[%s1701_s16 + $0xb8] sm:$0xf] %vm1096_vm0, %v1377_v31  ;;  %v1378_v34 = vpack.c.bf16 %v893_v32, %v893_v32 }
 0x171   : > { %v735_v35 = vpop.f32.mrb[44].mxu0  ;;  %v839_v36 = vpop.f32.mrb[44].mxu1 }
 0x172   : > { %1118 = vst.msk [vmem:[%s1701_s16 + $0x54] sm:$0xf] %vm1096_vm0, %v1352_v33  ;;  %1144 = vst.msk [vmem:[%s1701_s16 + $0xbc] sm:$0xf] %vm1096_vm0, %v1378_v34  ;;  %v736_v37 = vadd.f32 %v1691_v3, %v735_v35  ;;  %v737_v38 = vpop.f32.mrb[45].mxu0  ;;  %v840_v39 = vadd.f32 %v1691_v3, %v839_v36  ;;  %v841_v40 = vpop.f32.mrb[45].mxu1 }
 0x173   : > { %v738_v41 = vpop.f32.mrb[46].mxu0  ;;  %v842_v42 = vpop.f32.mrb[46].mxu1 }
 0x174   : > { %v868_v43 = vmax.f32 %v736_v37, 0.0  ;;  %v739_v44 = vadd.f32 %v1691_v3, %v738_v41  ;;  %v740_v45 = vpop.f32.mrb[47].mxu0  ;;  %v894_v46 = vmax.f32 %v840_v39, 0.0  ;;  %v843_v47 = vadd.f32 %v1691_v3, %v842_v42  ;;  %v844_v48 = vpop.f32.mrb[47].mxu1 }
 0x176   : > { %v1353_v49 = vpack.c.bf16 %v868_v43, %v868_v43  ;;  %v869_v50 = vmax.f32 %v739_v44, 0.0  ;;  %v1379_v51 = vpack.c.bf16 %v894_v46, %v894_v46  ;;  %v895_v52 = vmax.f32 %v843_v47, 0.0 }
 0x178   : > { %1119 = vst.msk [vmem:[%s1701_s16 + $0x58] sm:$0xf] %vm1096_vm0, %v1353_v49  ;;  %v1354_v53 = vpack.c.bf16 %v869_v50, %v869_v50  ;;  %1145 = vst.msk [vmem:[%s1701_s16 + $0xc0] sm:$0xf] %vm1096_vm0, %v1379_v51  ;;  %v1380_v54 = vpack.c.bf16 %v895_v52, %v895_v52 }
 0x179   : > { %v743_v55 = vpop.f32.mrb[48].mxu0 }
 0x17a   : > { %1120 = vst.msk [vmem:[%s1701_s16 + $0x5c] sm:$0xf] %vm1096_vm0, %v1354_v53  ;;  %1146 = vst.msk [vmem:[%s1701_s16 + $0xc4] sm:$0xf] %vm1096_vm0, %v1380_v54  ;;  %v744_v56 = vadd.f32 %v1691_v3, %v743_v55  ;;  %v745_v57 = vpop.f32.mrb[49].mxu0 }
 0x17b   : > { %v746_v58 = vpop.f32.mrb[50].mxu0 }
 0x17c   : > { %v870_v59 = vmax.f32 %v744_v56, 0.0  ;;  %v747_v60 = vadd.f32 %v1691_v3, %v746_v58  ;;  %v748_v61 = vpop.f32.mrb[51].mxu0 }
 0x17e   : > { %v1355_v62 = vpack.c.bf16 %v870_v59, %v870_v59  ;;  %v871_v63 = vmax.f32 %v747_v60, 0.0 }
 0x180   : > { %1121 = vst.msk [vmem:[%s1701_s16 + $0x60] sm:$0xf] %vm1096_vm0, %v1355_v62  ;;  %v1356_v0 = vpack.c.bf16 %v871_v63, %v871_v63 }
 0x182   : > { %1122 = vst.msk [vmem:[%s1701_s16 + $0x64] sm:$0xf] %vm1096_vm0, %v1356_v0 }
 0x183 PF: > { %s13_s12 = sadd.s32 1, %s1519_s12  }
 0x184   : > { %p10_p4 = scmp.ge.s32.totalorder %s13_s12, 4  }
 0x186   :  { %12 = sbr.rel (!%p10_p4) target bundleno = 1 (0x1), region = 62 }

// kernel: forward.5
= control target key start
LH: loop header
LB: loop body
LE: loop exit
PB: predicated region body
PF: predicated region fallthrough
CT: control target
= control target key end

     0   :  { %vm894_vm0 = vcmask 519168   ;;  %s1667_s1 = inlined_call_operand.vmem [shape: bf16[512,64], index: 1, kind: input, shape index: {}]   ;;  %s1668_s0 = inlined_call_operand.vmem [shape: bf16[176,512], index: 0, kind: input, shape index: {}]   ;;  %s1669_s2 = inlined_call_operand.vmem [shape: f32[1,64], index: 2, kind: input, shape index: {}]   ;;  %s1670_s3 = inlined_call_operand.vmem [shape: bf16[176,64], index: 3, kind: output, shape index: {}]  }
   0x1   :  { %v1206_v0 = vld [vmem:[%s1667_s1 + $0x40] sm:$0xff]   ;;  %v1210_v4 = vld [vmem:[%s1667_s1 + $0x48] sm:$0xff]   ;;  %v1214_v8 = vld [vmem:[%s1667_s1 + $0x50] sm:$0xff]  }
   0x2   :  { %v1207_v1 = vld [vmem:[%s1667_s1 + $0xc0] sm:$0xff]   ;;  %1042 = vmatprep.subr.bf16.mxu0 %v1206_v0  ;;  %v1211_v5 = vld [vmem:[%s1667_s1 + $0xc8] sm:$0xff]   ;;  %v1215_v9 = vld [vmem:[%s1667_s1 + $0xd0] sm:$0xff]  }
   0x3   :  { %v1208_v2 = vld [vmem:[%s1667_s1] sm:$0xff]   ;;  %1124 = vmatprep.subr.bf16.mxu1 %v1207_v1  ;;  %v1212_v6 = vld [vmem:[%s1667_s1 + $0x8] sm:$0xff]   ;;  %v1216_v10 = vld [vmem:[%s1667_s1 + $0x10] sm:$0xff]  }
   0x4   :  { %v1209_v3 = vld [vmem:[%s1667_s1 + $0x80] sm:$0xff]   ;;  %1043 = vmatpush3.bf16.msra.mxu0 %v1208_v2  ;;  %v1213_v7 = vld [vmem:[%s1667_s1 + $0x88] sm:$0xff]   ;;  %v1217_v11 = vld [vmem:[%s1667_s1 + $0x90] sm:$0xff]  }
   0x5   :  { %1125 = vmatpush3.bf16.msra.mxu1 %v1209_v3  ;;  %1044 = vmatprep.subr.bf16.mxu0 %v1210_v4  ;;  %v1218_v12 = vld [vmem:[%s1667_s1 + $0x58] sm:$0xff]   ;;  %v1222_v16 = vld [vmem:[%s1667_s1 + $0x60] sm:$0xff]   ;;  %v1226_v20 = vld [vmem:[%s1667_s1 + $0x68] sm:$0xff]  }
   0x6   :  { %1126 = vmatprep.subr.bf16.mxu1 %v1211_v5  ;;  %v1219_v13 = vld [vmem:[%s1667_s1 + $0xd8] sm:$0xff]   ;;  %v1223_v17 = vld [vmem:[%s1667_s1 + $0xe0] sm:$0xff]   ;;  %v1227_v21 = vld [vmem:[%s1667_s1 + $0xe8] sm:$0xff]  }
   0x7   :  { %v1220_v14 = vld [vmem:[%s1667_s1 + $0x18] sm:$0xff]   ;;  %v1224_v18 = vld [vmem:[%s1667_s1 + $0x20] sm:$0xff]   ;;  %v1228_v22 = vld [vmem:[%s1667_s1 + $0x28] sm:$0xff]  }
   0x8   :  { %1045 = vmatpush3.bf16.msra.mxu0 %v1212_v6  ;;  %v1221_v15 = vld [vmem:[%s1667_s1 + $0x98] sm:$0xff]   ;;  %v1225_v19 = vld [vmem:[%s1667_s1 + $0xa0] sm:$0xff]   ;;  %v1229_v23 = vld [vmem:[%s1667_s1 + $0xa8] sm:$0xff]  }
   0x9   :  { %1127 = vmatpush3.bf16.msra.mxu1 %v1213_v7  ;;  %1046 = vmatprep.subr.bf16.mxu0 %v1214_v8  ;;  %v1230_v24 = vld [vmem:[%s1667_s1 + $0x70] sm:$0xff]   ;;  %v1234_v28 = vld [vmem:[%s1667_s1 + $0x78] sm:$0xff]  }
   0xa   :  { %1128 = vmatprep.subr.bf16.mxu1 %v1215_v9  ;;  %v1231_v25 = vld [vmem:[%s1667_s1 + $0xf0] sm:$0xff]   ;;  %v1235_v29 = vld [vmem:[%s1667_s1 + $0xf8] sm:$0xff]  }
   0xb   :  { %v1232_v26 = vld [vmem:[%s1667_s1 + $0x30] sm:$0xff]   ;;  %v1236_v30 = vld [vmem:[%s1667_s1 + $0x38] sm:$0xff]  }
   0xc   :  { %1047 = vmatpush3.bf16.msra.mxu0 %v1216_v10  ;;  %v1233_v27 = vld [vmem:[%s1667_s1 + $0xb0] sm:$0xff]   ;;  %v1237_v31 = vld [vmem:[%s1667_s1 + $0xb8] sm:$0xff]  }
   0xd   :  { %1129 = vmatpush3.bf16.msra.mxu1 %v1217_v11  ;;  %1048 = vmatprep.subr.bf16.mxu0 %v1218_v12  ;;  %v1238_v32 = vld [vmem:[%s1668_s0] ss:$16 sps:$4 sm:$0xff]   ;;  %v1240_v33 = vld [vmem:[%s1668_s0 + $0x4] ss:$16 sps:$4 sm:$0xff]   ;;  %v1241_v34 = vld [vmem:[%s1668_s0 + $0x8] ss:$16 sps:$4 sm:$0xff]  }
   0xe   :  { %1130 = vmatprep.subr.bf16.mxu1 %v1219_v13  ;;  %v1243_v35 = vld [vmem:[%s1668_s0 + $0xc] ss:$16 sps:$4 sm:$0xff]   ;;  %574 = vmatprep.mubr.bf16.mxu0 %v1240_v33  ;;  %v1244_v36 = vld [vmem:[%s1668_s0 + $0x24] ss:$16 sps:$4 sm:$0xff]   ;;  %v1248_v38 = vld [vmem:[%s1668_s0 + $0x20] ss:$16 sps:$4 sm:$0xff]  }
   0xf   :  { %695 = vmatprep.mubr.bf16.mxu1 %v1243_v35  ;;  %v1246_v37 = vld [vmem:[%s1668_s0 + $0x2c] ss:$16 sps:$4 sm:$0xff]   ;;  %v1249_v39 = vld [vmem:[%s1668_s0 + $0x28] ss:$16 sps:$4 sm:$0xff]   ;;  %v1250_v40 = vld [vmem:[%s1668_s0 + $0x44] ss:$16 sps:$4 sm:$0xff]  }
  0x10   :  { %1049 = vmatpush3.bf16.msra.mxu0 %v1220_v14  ;;  %v1252_v41 = vld [vmem:[%s1668_s0 + $0x4c] ss:$16 sps:$4 sm:$0xff]   ;;  %v1254_v42 = vld [vmem:[%s1668_s0 + $0x40] ss:$16 sps:$4 sm:$0xff]   ;;  %v1255_v43 = vld [vmem:[%s1668_s0 + $0x48] ss:$16 sps:$4 sm:$0xff]  }
  0x11   :  { %1131 = vmatpush3.bf16.msra.mxu1 %v1221_v15  ;;  %1050 = vmatprep.subr.bf16.mxu0 %v1222_v16  ;;  %v1256_v44 = vld [vmem:[%s1668_s0 + $0x64] ss:$16 sps:$4 sm:$0xff]   ;;  %v1258_v45 = vld [vmem:[%s1668_s0 + $0x6c] ss:$16 sps:$4 sm:$0xff]   ;;  %v1260_v46 = vld [vmem:[%s1668_s0 + $0x60] ss:$16 sps:$4 sm:$0xff]  }
  0x12   :  { %1132 = vmatprep.subr.bf16.mxu1 %v1223_v17  ;;  %v1261_v47 = vld [vmem:[%s1668_s0 + $0x68] ss:$16 sps:$4 sm:$0xff]   ;;  %v1262_v48 = vld [vmem:[%s1668_s0 + $0x84] ss:$16 sps:$4 sm:$0xff]   ;;  %v1264_v49 = vld [vmem:[%s1668_s0 + $0x8c] ss:$16 sps:$4 sm:$0xff]  }
  0x13   :  { %v1266_v50 = vld [vmem:[%s1668_s0 + $0x80] ss:$16 sps:$4 sm:$0xff]   ;;  %v1267_v51 = vld [vmem:[%s1668_s0 + $0x88] ss:$16 sps:$4 sm:$0xff]   ;;  %v1268_v52 = vld [vmem:[%s1668_s0 + $0xa4] ss:$16 sps:$4 sm:$0xff]  }
  0x14   :  { %1051 = vmatpush3.bf16.msra.mxu0 %v1224_v18  ;;  %v1270_v53 = vld [vmem:[%s1668_s0 + $0xac] ss:$16 sps:$4 sm:$0xff]   ;;  %v1272_v54 = vld [vmem:[%s1668_s0 + $0xa0] ss:$16 sps:$4 sm:$0xff]   ;;  %v1273_v55 = vld [vmem:[%s1668_s0 + $0xa8] ss:$16 sps:$4 sm:$0xff]  }
  0x15   :  { %1133 = vmatpush3.bf16.msra.mxu1 %v1225_v19  ;;  %1052 = vmatprep.subr.bf16.mxu0 %v1226_v20  ;;  %v1274_v56 = vld [vmem:[%s1668_s0 + $0xc4] ss:$16 sps:$4 sm:$0xff]   ;;  %v1276_v57 = vld [vmem:[%s1668_s0 + $0xcc] ss:$16 sps:$4 sm:$0xff]   ;;  %v1278_v58 = vld [vmem:[%s1668_s0 + $0xc0] ss:$16 sps:$4 sm:$0xff]  }
  0x16   :  { %1134 = vmatprep.subr.bf16.mxu1 %v1227_v21  ;;  %v1279_v59 = vld [vmem:[%s1668_s0 + $0xc8] ss:$16 sps:$4 sm:$0xff]   ;;  %v1280_v60 = vld [vmem:[%s1668_s0 + $0xe4] ss:$16 sps:$4 sm:$0xff]   ;;  %v1282_v61 = vld [vmem:[%s1668_s0 + $0xec] ss:$16 sps:$4 sm:$0xff]  }
  0x17   :  { %v1284_v62 = vld [vmem:[%s1668_s0 + $0xe0] ss:$16 sps:$4 sm:$0xff]   ;;  %v1285_v63 = vld [vmem:[%s1668_s0 + $0xe8] ss:$16 sps:$4 sm:$0xff]   ;;  %v1286_v0 = vld [vmem:[%s1668_s0 + $0x104] ss:$16 sps:$4 sm:$0xff]  }
  0x18   :  { %1053 = vmatpush3.bf16.msra.mxu0 %v1228_v22  ;;  %v1288_v1 = vld [vmem:[%s1668_s0 + $0x10c] ss:$16 sps:$4 sm:$0xff]   ;;  %v1290_v2 = vld [vmem:[%s1668_s0 + $0x100] ss:$16 sps:$4 sm:$0xff]   ;;  %v1291_v3 = vld [vmem:[%s1668_s0 + $0x108] ss:$16 sps:$4 sm:$0xff]  }
  0x19   :  { %1135 = vmatpush3.bf16.msra.mxu1 %v1229_v23  ;;  %1054 = vmatprep.subr.bf16.mxu0 %v1230_v24  ;;  %v1292_v4 = vld [vmem:[%s1668_s0 + $0x124] ss:$16 sps:$4 sm:$0xff]   ;;  %v1294_v5 = vld [vmem:[%s1668_s0 + $0x12c] ss:$16 sps:$4 sm:$0xff]   ;;  %v1296_v6 = vld [vmem:[%s1668_s0 + $0x120] ss:$16 sps:$4 sm:$0xff]  }
  0x1a   :  { %1136 = vmatprep.subr.bf16.mxu1 %v1231_v25  ;;  %v1297_v7 = vld [vmem:[%s1668_s0 + $0x128] ss:$16 sps:$4 sm:$0xff]   ;;  %v1298_v8 = vld [vmem:[%s1668_s0 + $0x144] ss:$16 sps:$4 sm:$0xff]   ;;  %v1300_v9 = vld [vmem:[%s1668_s0 + $0x14c] ss:$16 sps:$4 sm:$0xff]  }
  0x1b   :  { %v1302_v10 = vld [vmem:[%s1668_s0 + $0x140] ss:$16 sps:$4 sm:$0xff]   ;;  %v1303_v11 = vld [vmem:[%s1668_s0 + $0x148] ss:$16 sps:$4 sm:$0xff]  }
  0x1c   :  { %1055 = vmatpush3.bf16.msra.mxu0 %v1232_v26  ;;  %v1555_v14 = vld [vmem:[%s1669_s2] ss:$0 sm:$0xff] }
  0x1d   :  { %1137 = vmatpush3.bf16.msra.mxu1 %v1233_v27  ;;  %1056 = vmatprep.subr.bf16.mxu0 %v1234_v28 }
  0x1e   :  { %1138 = vmatprep.subr.bf16.mxu1 %v1235_v29 }
  0x20   :  { %1057 = vmatpush3.bf16.msra.mxu0 %v1236_v30 }
  0x21   :  { %1139 = vmatpush3.bf16.msra.mxu1 %v1237_v31 }
  0x23   :  { %575 = vmatmul.mubr.bf16.vlgmr.msra.gmra.mrb[0].mxu0 %v1238_v32 }
  0x24   :  { %696 = vmatmul.mubr.bf16.vlgmr.msra.gmra.mrb[0].mxu1 %v1241_v34  ;;  %582 = vmatprep.mubr.bf16.mxu0 %v1244_v36 }
  0x25   :  { %703 = vmatprep.mubr.bf16.mxu1 %v1246_v37 }
  0x2b   :  { %583 = vmatmul.mubr.bf16.gmra.mrb[4].mxu0 %v1248_v38 }
  0x2c   :  { %704 = vmatmul.mubr.bf16.gmra.mrb[4].mxu1 %v1249_v39  ;;  %590 = vmatprep.mubr.bf16.mxu0 %v1250_v40 }
  0x2d   :  { %711 = vmatprep.mubr.bf16.mxu1 %v1252_v41 }
  0x33   :  { %591 = vmatmul.mubr.bf16.gmra.mrb[8].mxu0 %v1254_v42 }
  0x34   :  { %712 = vmatmul.mubr.bf16.gmra.mrb[8].mxu1 %v1255_v43  ;;  %598 = vmatprep.mubr.bf16.mxu0 %v1256_v44 }
  0x35   :  { %719 = vmatprep.mubr.bf16.mxu1 %v1258_v45 }
  0x3b   :  { %599 = vmatmul.mubr.bf16.gmra.mrb[12].mxu0 %v1260_v46 }
  0x3c   :  { %720 = vmatmul.mubr.bf16.gmra.mrb[12].mxu1 %v1261_v47  ;;  %606 = vmatprep.mubr.bf16.mxu0 %v1262_v48 }
  0x3d   :  { %727 = vmatprep.mubr.bf16.mxu1 %v1264_v49 }
  0x43   :  { %607 = vmatmul.mubr.bf16.gmra.mrb[16].mxu0 %v1266_v50 }
  0x44   :  { %728 = vmatmul.mubr.bf16.gmra.mrb[16].mxu1 %v1267_v51  ;;  %614 = vmatprep.mubr.bf16.mxu0 %v1268_v52 }
  0x45   :  { %735 = vmatprep.mubr.bf16.mxu1 %v1270_v53 }
  0x4b   :  { %615 = vmatmul.mubr.bf16.gmra.mrb[20].mxu0 %v1272_v54 }
  0x4c   :  { %736 = vmatmul.mubr.bf16.gmra.mrb[20].mxu1 %v1273_v55  ;;  %622 = vmatprep.mubr.bf16.mxu0 %v1274_v56 }
  0x4d   :  { %743 = vmatprep.mubr.bf16.mxu1 %v1276_v57 }
  0x53   :  { %623 = vmatmul.mubr.bf16.gmra.mrb[24].mxu0 %v1278_v58 }
  0x54   :  { %744 = vmatmul.mubr.bf16.gmra.mrb[24].mxu1 %v1279_v59  ;;  %630 = vmatprep.mubr.bf16.mxu0 %v1280_v60 }
  0x55   :  { %751 = vmatprep.mubr.bf16.mxu1 %v1282_v61 }
  0x5b   :  { %631 = vmatmul.mubr.bf16.gmra.mrb[28].mxu0 %v1284_v62 }
  0x5c   :  { %752 = vmatmul.mubr.bf16.gmra.mrb[28].mxu1 %v1285_v63  ;;  %638 = vmatprep.mubr.bf16.mxu0 %v1286_v0 }
  0x5d   :  { %759 = vmatprep.mubr.bf16.mxu1 %v1288_v1 }
  0x63   :  { %639 = vmatmul.mubr.bf16.gmra.mrb[32].mxu0 %v1290_v2 }
  0x64   :  { %760 = vmatmul.mubr.bf16.gmra.mrb[32].mxu1 %v1291_v3  ;;  %646 = vmatprep.mubr.bf16.mxu0 %v1292_v4 }
  0x65   :  { %767 = vmatprep.mubr.bf16.mxu1 %v1294_v5 }
  0x6b   :  { %647 = vmatmul.mubr.bf16.gmra.mrb[36].mxu0 %v1296_v6 }
  0x6c   :  { %768 = vmatmul.mubr.bf16.gmra.mrb[36].mxu1 %v1297_v7  ;;  %654 = vmatprep.mubr.bf16.mxu0 %v1298_v8 }
  0x6d   :  { %775 = vmatprep.mubr.bf16.mxu1 %v1300_v9 }
  0x73   :  { %655 = vmatmul.mubr.bf16.gmra.mrb[40].mxu0 %v1302_v10 }
  0x74   :  { %776 = vmatmul.mubr.bf16.gmra.mrb[40].mxu1 %v1303_v11 }
  0xf6   :  { %v1058_v12 = vpop.f32.mrb[0].mxu0 }
  0xf7   :  { %v1140_v13 = vpop.f32.mrb[0].mxu1  ;;  %v1059_v15 = vpop.f32.mrb[1].mxu0 }
  0xf8   :  { %v1060_v16 = vadd.f32 %v1059_v15, %v1058_v12  ;;  %v1141_v17 = vpop.f32.mrb[1].mxu1  ;;  %v1061_v18 = vpop.f32.mrb[2].mxu0 }
  0xf9   :  { %v1142_v19 = vadd.f32 %v1141_v17, %v1140_v13  ;;  %v1143_v20 = vpop.f32.mrb[2].mxu1  ;;  %v1062_v21 = vpop.f32.mrb[3].mxu0 }
  0xfa   :  { %v577_v22 = vadd.f32 %v1060_v16, %v1555_v14  ;;  %v1063_v23 = vadd.f32 %v1062_v21, %v1061_v18  ;;  %v1144_v24 = vpop.f32.mrb[3].mxu1 }
  0xfb   :  { %v1145_v25 = vadd.f32 %v1144_v24, %v1143_v20 }
  0xfc   :  { %v698_v26 = vadd.f32 %v1142_v19, %v577_v22  ;;  %v580_v27 = vadd.f32 %v1063_v23, %v1555_v14 }
  0xfe   :  { %v784_v28 = vmax.f32 %v698_v26, 0.0  ;;  %v701_v29 = vadd.f32 %v1145_v25, %v580_v27  ;;  %v1064_v30 = vpop.f32.mrb[4].mxu0 }
  0xff   :  { %v1146_v31 = vpop.f32.mrb[4].mxu1  ;;  %v1065_v32 = vpop.f32.mrb[5].mxu0 }
 0x100   :  { %v1020_v33 = vpack.c.bf16 %v784_v28, %v784_v28  ;;  %v785_v34 = vmax.f32 %v701_v29, 0.0  ;;  %v1066_v35 = vadd.f32 %v1065_v32, %v1064_v30  ;;  %v1147_v36 = vpop.f32.mrb[5].mxu1  ;;  %v1067_v37 = vpop.f32.mrb[6].mxu0 }
 0x101   :  { %v1148_v38 = vadd.f32 %v1147_v36, %v1146_v31  ;;  %v1149_v39 = vpop.f32.mrb[6].mxu1  ;;  %v1068_v40 = vpop.f32.mrb[7].mxu0 }
 0x102   :  { %895 = vst.msk [vmem:[%s1670_s3] sm:$0xf] %vm894_vm0, %v1020_v33  ;;  %v1021_v41 = vpack.c.bf16 %v785_v34, %v785_v34  ;;  %v585_v42 = vadd.f32 %v1066_v35, %v1555_v14  ;;  %v1069_v43 = vadd.f32 %v1068_v40, %v1067_v37  ;;  %v1150_v44 = vpop.f32.mrb[7].mxu1 }
 0x103   :  { %v1151_v45 = vadd.f32 %v1150_v44, %v1149_v39 }
 0x104   :  { %896 = vst.msk [vmem:[%s1670_s3 + $0x4] sm:$0xf] %vm894_vm0, %v1021_v41  ;;  %v706_v46 = vadd.f32 %v1148_v38, %v585_v42  ;;  %v588_v47 = vadd.f32 %v1069_v43, %v1555_v14 }
 0x106   :  { %v786_v48 = vmax.f32 %v706_v46, 0.0  ;;  %v709_v49 = vadd.f32 %v1151_v45, %v588_v47  ;;  %v1070_v50 = vpop.f32.mrb[8].mxu0 }
 0x107   :  { %v1152_v51 = vpop.f32.mrb[8].mxu1  ;;  %v1071_v52 = vpop.f32.mrb[9].mxu0 }
 0x108   :  { %v1022_v53 = vpack.c.bf16 %v786_v48, %v786_v48  ;;  %v787_v54 = vmax.f32 %v709_v49, 0.0  ;;  %v1072_v55 = vadd.f32 %v1071_v52, %v1070_v50  ;;  %v1153_v56 = vpop.f32.mrb[9].mxu1  ;;  %v1073_v57 = vpop.f32.mrb[10].mxu0 }
 0x109   :  { %v1154_v58 = vadd.f32 %v1153_v56, %v1152_v51  ;;  %v1155_v59 = vpop.f32.mrb[10].mxu1  ;;  %v1074_v60 = vpop.f32.mrb[11].mxu0 }
 0x10a   :  { %897 = vst.msk [vmem:[%s1670_s3 + $0x8] sm:$0xf] %vm894_vm0, %v1022_v53  ;;  %v1023_v61 = vpack.c.bf16 %v787_v54, %v787_v54  ;;  %v593_v62 = vadd.f32 %v1072_v55, %v1555_v14  ;;  %v1075_v63 = vadd.f32 %v1074_v60, %v1073_v57  ;;  %v1156_v0 = vpop.f32.mrb[11].mxu1 }
 0x10b   :  { %v1157_v1 = vadd.f32 %v1156_v0, %v1155_v59 }
 0x10c   :  { %898 = vst.msk [vmem:[%s1670_s3 + $0xc] sm:$0xf] %vm894_vm0, %v1023_v61  ;;  %v714_v2 = vadd.f32 %v1154_v58, %v593_v62  ;;  %v596_v3 = vadd.f32 %v1075_v63, %v1555_v14 }
 0x10e   :  { %v788_v4 = vmax.f32 %v714_v2, 0.0  ;;  %v717_v5 = vadd.f32 %v1157_v1, %v596_v3  ;;  %v1076_v6 = vpop.f32.mrb[12].mxu0 }
 0x10f   :  { %v1158_v7 = vpop.f32.mrb[12].mxu1  ;;  %v1077_v8 = vpop.f32.mrb[13].mxu0 }
 0x110   :  { %v1024_v9 = vpack.c.bf16 %v788_v4, %v788_v4  ;;  %v789_v10 = vmax.f32 %v717_v5, 0.0  ;;  %v1078_v11 = vadd.f32 %v1077_v8, %v1076_v6  ;;  %v1159_v12 = vpop.f32.mrb[13].mxu1  ;;  %v1079_v13 = vpop.f32.mrb[14].mxu0 }
 0x111   :  { %v1160_v15 = vadd.f32 %v1159_v12, %v1158_v7  ;;  %v1161_v16 = vpop.f32.mrb[14].mxu1  ;;  %v1080_v17 = vpop.f32.mrb[15].mxu0 }
 0x112   :  { %899 = vst.msk [vmem:[%s1670_s3 + $0x10] sm:$0xf] %vm894_vm0, %v1024_v9  ;;  %v1025_v18 = vpack.c.bf16 %v789_v10, %v789_v10  ;;  %v601_v19 = vadd.f32 %v1078_v11, %v1555_v14  ;;  %v1081_v20 = vadd.f32 %v1080_v17, %v1079_v13  ;;  %v1162_v21 = vpop.f32.mrb[15].mxu1 }
 0x113   :  { %v1163_v22 = vadd.f32 %v1162_v21, %v1161_v16 }
 0x114   :  { %900 = vst.msk [vmem:[%s1670_s3 + $0x14] sm:$0xf] %vm894_vm0, %v1025_v18  ;;  %v722_v23 = vadd.f32 %v1160_v15, %v601_v19  ;;  %v604_v24 = vadd.f32 %v1081_v20, %v1555_v14 }
 0x116   :  { %v790_v25 = vmax.f32 %v722_v23, 0.0  ;;  %v725_v26 = vadd.f32 %v1163_v22, %v604_v24  ;;  %v1082_v27 = vpop.f32.mrb[16].mxu0 }
 0x117   :  { %v1164_v28 = vpop.f32.mrb[16].mxu1  ;;  %v1083_v29 = vpop.f32.mrb[17].mxu0 }
 0x118   :  { %v1026_v30 = vpack.c.bf16 %v790_v25, %v790_v25  ;;  %v791_v31 = vmax.f32 %v725_v26, 0.0  ;;  %v1084_v32 = vadd.f32 %v1083_v29, %v1082_v27  ;;  %v1165_v33 = vpop.f32.mrb[17].mxu1  ;;  %v1085_v34 = vpop.f32.mrb[18].mxu0 }
 0x119   :  { %v1166_v35 = vadd.f32 %v1165_v33, %v1164_v28  ;;  %v1167_v36 = vpop.f32.mrb[18].mxu1  ;;  %v1086_v37 = vpop.f32.mrb[19].mxu0 }
 0x11a   :  { %901 = vst.msk [vmem:[%s1670_s3 + $0x18] sm:$0xf] %vm894_vm0, %v1026_v30  ;;  %v1027_v38 = vpack.c.bf16 %v791_v31, %v791_v31  ;;  %v609_v39 = vadd.f32 %v1084_v32, %v1555_v14  ;;  %v1087_v40 = vadd.f32 %v1086_v37, %v1085_v34  ;;  %v1168_v41 = vpop.f32.mrb[19].mxu1 }
 0x11b   :  { %v1169_v42 = vadd.f32 %v1168_v41, %v1167_v36 }
 0x11c   :  { %902 = vst.msk [vmem:[%s1670_s3 + $0x1c] sm:$0xf] %vm894_vm0, %v1027_v38  ;;  %v730_v43 = vadd.f32 %v1166_v35, %v609_v39  ;;  %v612_v44 = vadd.f32 %v1087_v40, %v1555_v14 }
 0x11e   :  { %v792_v45 = vmax.f32 %v730_v43, 0.0  ;;  %v733_v46 = vadd.f32 %v1169_v42, %v612_v44  ;;  %v1088_v47 = vpop.f32.mrb[20].mxu0 }
 0x11f   :  { %v1170_v48 = vpop.f32.mrb[20].mxu1  ;;  %v1089_v49 = vpop.f32.mrb[21].mxu0 }
 0x120   :  { %v1028_v50 = vpack.c.bf16 %v792_v45, %v792_v45  ;;  %v793_v51 = vmax.f32 %v733_v46, 0.0  ;;  %v1090_v52 = vadd.f32 %v1089_v49, %v1088_v47  ;;  %v1171_v53 = vpop.f32.mrb[21].mxu1  ;;  %v1091_v54 = vpop.f32.mrb[22].mxu0 }
 0x121   :  { %v1172_v55 = vadd.f32 %v1171_v53, %v1170_v48  ;;  %v1173_v56 = vpop.f32.mrb[22].mxu1  ;;  %v1092_v57 = vpop.f32.mrb[23].mxu0 }
 0x122   :  { %903 = vst.msk [vmem:[%s1670_s3 + $0x20] sm:$0xf] %vm894_vm0, %v1028_v50  ;;  %v1029_v58 = vpack.c.bf16 %v793_v51, %v793_v51  ;;  %v617_v59 = vadd.f32 %v1090_v52, %v1555_v14  ;;  %v1093_v60 = vadd.f32 %v1092_v57, %v1091_v54  ;;  %v1174_v61 = vpop.f32.mrb[23].mxu1 }
 0x123   :  { %v1175_v62 = vadd.f32 %v1174_v61, %v1173_v56 }
 0x124   :  { %904 = vst.msk [vmem:[%s1670_s3 + $0x24] sm:$0xf] %vm894_vm0, %v1029_v58  ;;  %v738_v63 = vadd.f32 %v1172_v55, %v617_v59  ;;  %v620_v0 = vadd.f32 %v1093_v60, %v1555_v14 }
 0x126   :  { %v794_v1 = vmax.f32 %v738_v63, 0.0  ;;  %v741_v2 = vadd.f32 %v1175_v62, %v620_v0  ;;  %v1094_v3 = vpop.f32.mrb[24].mxu0 }
 0x127   :  { %v1176_v4 = vpop.f32.mrb[24].mxu1  ;;  %v1095_v5 = vpop.f32.mrb[25].mxu0 }
 0x128   :  { %v1030_v6 = vpack.c.bf16 %v794_v1, %v794_v1  ;;  %v795_v7 = vmax.f32 %v741_v2, 0.0  ;;  %v1096_v8 = vadd.f32 %v1095_v5, %v1094_v3  ;;  %v1177_v9 = vpop.f32.mrb[25].mxu1  ;;  %v1097_v10 = vpop.f32.mrb[26].mxu0 }
 0x129   :  { %v1178_v11 = vadd.f32 %v1177_v9, %v1176_v4  ;;  %v1179_v12 = vpop.f32.mrb[26].mxu1  ;;  %v1098_v13 = vpop.f32.mrb[27].mxu0 }
 0x12a   :  { %905 = vst.msk [vmem:[%s1670_s3 + $0x28] sm:$0xf] %vm894_vm0, %v1030_v6  ;;  %v1031_v15 = vpack.c.bf16 %v795_v7, %v795_v7  ;;  %v625_v16 = vadd.f32 %v1096_v8, %v1555_v14  ;;  %v1099_v17 = vadd.f32 %v1098_v13, %v1097_v10  ;;  %v1180_v18 = vpop.f32.mrb[27].mxu1 }
 0x12b   :  { %v1181_v19 = vadd.f32 %v1180_v18, %v1179_v12 }
 0x12c   :  { %906 = vst.msk [vmem:[%s1670_s3 + $0x2c] sm:$0xf] %vm894_vm0, %v1031_v15  ;;  %v746_v20 = vadd.f32 %v1178_v11, %v625_v16  ;;  %v628_v21 = vadd.f32 %v1099_v17, %v1555_v14 }
 0x12e   :  { %v796_v22 = vmax.f32 %v746_v20, 0.0  ;;  %v749_v23 = vadd.f32 %v1181_v19, %v628_v21  ;;  %v1100_v24 = vpop.f32.mrb[28].mxu0 }
 0x12f   :  { %v1182_v25 = vpop.f32.mrb[28].mxu1  ;;  %v1101_v26 = vpop.f32.mrb[29].mxu0 }
 0x130   :  { %v1032_v27 = vpack.c.bf16 %v796_v22, %v796_v22  ;;  %v797_v28 = vmax.f32 %v749_v23, 0.0  ;;  %v1102_v29 = vadd.f32 %v1101_v26, %v1100_v24  ;;  %v1183_v30 = vpop.f32.mrb[29].mxu1  ;;  %v1103_v31 = vpop.f32.mrb[30].mxu0 }
 0x131   :  { %v1184_v32 = vadd.f32 %v1183_v30, %v1182_v25  ;;  %v1185_v33 = vpop.f32.mrb[30].mxu1  ;;  %v1104_v34 = vpop.f32.mrb[31].mxu0 }
 0x132   :  { %907 = vst.msk [vmem:[%s1670_s3 + $0x30] sm:$0xf] %vm894_vm0, %v1032_v27  ;;  %v1033_v35 = vpack.c.bf16 %v797_v28, %v797_v28  ;;  %v633_v36 = vadd.f32 %v1102_v29, %v1555_v14  ;;  %v1105_v37 = vadd.f32 %v1104_v34, %v1103_v31  ;;  %v1186_v38 = vpop.f32.mrb[31].mxu1 }
 0x133   :  { %v1187_v39 = vadd.f32 %v1186_v38, %v1185_v33 }
 0x134   :  { %908 = vst.msk [vmem:[%s1670_s3 + $0x34] sm:$0xf] %vm894_vm0, %v1033_v35  ;;  %v754_v40 = vadd.f32 %v1184_v32, %v633_v36  ;;  %v636_v41 = vadd.f32 %v1105_v37, %v1555_v14 }
 0x136   :  { %v798_v42 = vmax.f32 %v754_v40, 0.0  ;;  %v757_v43 = vadd.f32 %v1187_v39, %v636_v41  ;;  %v1106_v44 = vpop.f32.mrb[32].mxu0 }
 0x137   :  { %v1188_v45 = vpop.f32.mrb[32].mxu1  ;;  %v1107_v46 = vpop.f32.mrb[33].mxu0 }
 0x138   :  { %v1034_v47 = vpack.c.bf16 %v798_v42, %v798_v42  ;;  %v799_v48 = vmax.f32 %v757_v43, 0.0  ;;  %v1108_v49 = vadd.f32 %v1107_v46, %v1106_v44  ;;  %v1189_v50 = vpop.f32.mrb[33].mxu1  ;;  %v1109_v51 = vpop.f32.mrb[34].mxu0 }
 0x139   :  { %v1190_v52 = vadd.f32 %v1189_v50, %v1188_v45  ;;  %v1191_v53 = vpop.f32.mrb[34].mxu1  ;;  %v1110_v54 = vpop.f32.mrb[35].mxu0 }
 0x13a   :  { %909 = vst.msk [vmem:[%s1670_s3 + $0x38] sm:$0xf] %vm894_vm0, %v1034_v47  ;;  %v1035_v55 = vpack.c.bf16 %v799_v48, %v799_v48  ;;  %v641_v56 = vadd.f32 %v1108_v49, %v1555_v14  ;;  %v1111_v57 = vadd.f32 %v1110_v54, %v1109_v51  ;;  %v1192_v58 = vpop.f32.mrb[35].mxu1 }
 0x13b   :  { %v1193_v59 = vadd.f32 %v1192_v58, %v1191_v53 }
 0x13c   :  { %910 = vst.msk [vmem:[%s1670_s3 + $0x3c] sm:$0xf] %vm894_vm0, %v1035_v55  ;;  %v762_v60 = vadd.f32 %v1190_v52, %v641_v56  ;;  %v644_v61 = vadd.f32 %v1111_v57, %v1555_v14 }
 0x13e   :  { %v800_v62 = vmax.f32 %v762_v60, 0.0  ;;  %v765_v63 = vadd.f32 %v1193_v59, %v644_v61  ;;  %v1112_v0 = vpop.f32.mrb[36].mxu0 }
 0x13f   :  { %v1194_v1 = vpop.f32.mrb[36].mxu1  ;;  %v1113_v2 = vpop.f32.mrb[37].mxu0 }
 0x140   :  { %v1036_v3 = vpack.c.bf16 %v800_v62, %v800_v62  ;;  %v801_v4 = vmax.f32 %v765_v63, 0.0  ;;  %v1114_v5 = vadd.f32 %v1113_v2, %v1112_v0  ;;  %v1195_v6 = vpop.f32.mrb[37].mxu1  ;;  %v1115_v7 = vpop.f32.mrb[38].mxu0 }
 0x141   :  { %v1196_v8 = vadd.f32 %v1195_v6, %v1194_v1  ;;  %v1197_v9 = vpop.f32.mrb[38].mxu1  ;;  %v1116_v10 = vpop.f32.mrb[39].mxu0 }
 0x142   :  { %911 = vst.msk [vmem:[%s1670_s3 + $0x40] sm:$0xf] %vm894_vm0, %v1036_v3  ;;  %v1037_v11 = vpack.c.bf16 %v801_v4, %v801_v4  ;;  %v649_v12 = vadd.f32 %v1114_v5, %v1555_v14  ;;  %v1117_v13 = vadd.f32 %v1116_v10, %v1115_v7  ;;  %v1198_v15 = vpop.f32.mrb[39].mxu1 }
 0x143   :  { %v1199_v16 = vadd.f32 %v1198_v15, %v1197_v9 }
 0x144   :  { %912 = vst.msk [vmem:[%s1670_s3 + $0x44] sm:$0xf] %vm894_vm0, %v1037_v11  ;;  %v770_v17 = vadd.f32 %v1196_v8, %v649_v12  ;;  %v652_v18 = vadd.f32 %v1117_v13, %v1555_v14 }
 0x146   :  { %v802_v19 = vmax.f32 %v770_v17, 0.0  ;;  %v773_v20 = vadd.f32 %v1199_v16, %v652_v18  ;;  %v1118_v21 = vpop.f32.mrb[40].mxu0 }
 0x147   :  { %v1200_v22 = vpop.f32.mrb[40].mxu1  ;;  %v1119_v23 = vpop.f32.mrb[41].mxu0 }
 0x148   :  { %v1038_v24 = vpack.c.bf16 %v802_v19, %v802_v19  ;;  %v803_v25 = vmax.f32 %v773_v20, 0.0  ;;  %v1120_v26 = vadd.f32 %v1119_v23, %v1118_v21  ;;  %v1201_v27 = vpop.f32.mrb[41].mxu1  ;;  %v1121_v28 = vpop.f32.mrb[42].mxu0 }
 0x149   :  { %v1202_v29 = vadd.f32 %v1201_v27, %v1200_v22  ;;  %v1203_v30 = vpop.f32.mrb[42].mxu1  ;;  %v1122_v31 = vpop.f32.mrb[43].mxu0 }
 0x14a   :  { %913 = vst.msk [vmem:[%s1670_s3 + $0x48] sm:$0xf] %vm894_vm0, %v1038_v24  ;;  %v1039_v32 = vpack.c.bf16 %v803_v25, %v803_v25  ;;  %v657_v33 = vadd.f32 %v1120_v26, %v1555_v14  ;;  %v1123_v34 = vadd.f32 %v1122_v31, %v1121_v28  ;;  %v1204_v35 = vpop.f32.mrb[43].mxu1 }
 0x14b   :  { %v1205_v36 = vadd.f32 %v1204_v35, %v1203_v30 }
 0x14c   :  { %914 = vst.msk [vmem:[%s1670_s3 + $0x4c] sm:$0xf] %vm894_vm0, %v1039_v32  ;;  %v778_v37 = vadd.f32 %v1202_v29, %v657_v33  ;;  %v660_v38 = vadd.f32 %v1123_v34, %v1555_v14 }
 0x14e   :  { %v804_v39 = vmax.f32 %v778_v37, 0.0  ;;  %v781_v40 = vadd.f32 %v1205_v36, %v660_v38 }
 0x150   :  { %v1040_v41 = vpack.c.bf16 %v804_v39, %v804_v39  ;;  %v805_v42 = vmax.f32 %v781_v40, 0.0 }
 0x152   :  { %915 = vst.msk [vmem:[%s1670_s3 + $0x50] sm:$0xf] %vm894_vm0, %v1040_v41  ;;  %v1041_v43 = vpack.c.bf16 %v805_v42, %v805_v42 }
 0x154   :  { %916 = vst.msk [vmem:[%s1670_s3 + $0x54] sm:$0xf] %vm894_vm0, %v1041_v43 }

// kernel: forward.6
= control target key start
LH: loop header
LB: loop body
LE: loop exit
PB: predicated region body
PF: predicated region fallthrough
CT: control target
= control target key end

     0   :  { %v1308_v24 = vmov 0.0   ;;  %vm1309_vm0 = vmmov 0   ;;  %vm903_vm1 = vcmask 519168   ;;  %s1679_s1 = inlined_call_operand.vmem [shape: bf16[640,64], index: 1, kind: input, shape index: {}]   ;;  %s1680_s0 = inlined_call_operand.vmem [shape: bf16[112,640], index: 0, kind: input, shape index: {}]   ;;  %s1681_s2 = inlined_call_operand.vmem [shape: f32[1,64], index: 2, kind: input, shape index: {}]   ;;  %s1682_s3 = inlined_call_operand.vmem [shape: bf16[112,64], index: 3, kind: output, shape index: {}]  }
   0x1   :  { %v1219_v0 = vld [vmem:[%s1679_s1 + $0x40] sm:$0xff]   ;;  %v1221_v2 = vld [vmem:[%s1679_s1 + $0x48] sm:$0xff]   ;;  %v1223_v4 = vld [vmem:[%s1679_s1 + $0x50] sm:$0xff]  }
   0x2   :  { %v1220_v1 = vld [vmem:[%s1679_s1] sm:$0xff]   ;;  %1201 = vmatprep.subr.bf16.mxu1 %v1219_v0  ;;  %1026 = vmatprep.subr.bf16.mxu0 %v1219_v0  ;;  %v1222_v3 = vld [vmem:[%s1679_s1 + $0x8] sm:$0xff]   ;;  %v1224_v5 = vld [vmem:[%s1679_s1 + $0x10] sm:$0xff]  }
   0x3   :  { %1209 = vmatpush3.bf16.msra.mxu1 %v1220_v1  ;;  %1027 = vmatpush3.bf16.msra.mxu0 %v1220_v1  ;;  %v1225_v6 = vld [vmem:[%s1679_s1 + $0x58] sm:$0xff]   ;;  %v1227_v8 = vld [vmem:[%s1679_s1 + $0x60] sm:$0xff]   ;;  %v1229_v10 = vld [vmem:[%s1679_s1 + $0x68] sm:$0xff]  }
   0x4   :  { %1202 = vmatprep.subr.bf16.mxu1 %v1221_v2  ;;  %1028 = vmatprep.subr.bf16.mxu0 %v1221_v2  ;;  %v1226_v7 = vld [vmem:[%s1679_s1 + $0x18] sm:$0xff]   ;;  %v1228_v9 = vld [vmem:[%s1679_s1 + $0x20] sm:$0xff]   ;;  %v1230_v12 = vld [vmem:[%s1679_s1 + $0x28] sm:$0xff]  }
   0x5   :  { %v1237_v11 = vld [vmem:[%s1680_s0 + $0xa4] ss:$20 sps:$4 sm:$0xff]   ;;  %v1231_v14 = vld [vmem:[%s1679_s1 + $0x70] sm:$0xff]   ;;  %v1244_v23 = vld [vmem:[%s1679_s1 + $0xc8] sm:$0xff]  }
   0x6   :  { %v1241_v13 = vld [vmem:[%s1680_s0 + $0x4] ss:$20 sps:$4 sm:$0xff]   ;;  %630 = vmatprep.mubr.bf16.mxu1 %v1237_v11  ;;  %v1232_v15 = vld [vmem:[%s1679_s1 + $0x30] sm:$0xff]   ;;  %v1248_v25 = vld [vmem:[%s1680_s0 + $0x2c] ss:$20 sps:$4 sm:$0xff]  }
   0x7   :  { %1210 = vmatpush3.bf16.msra.mxu1 %v1222_v3  ;;  %1029 = vmatpush3.bf16.msra.mxu0 %v1222_v3  ;;  %v1233_v16 = vld [vmem:[%s1679_s1 + $0x78] sm:$0xff]   ;;  %v1238_v18 = vld [vmem:[%s1679_s1 + $0xc0] sm:$0xff]   ;;  %v1245_v27 = vld [vmem:[%s1679_s1 + $0x88] sm:$0xff]  }
   0x8   :  { %1203 = vmatprep.subr.bf16.mxu1 %v1223_v4  ;;  %1030 = vmatprep.subr.bf16.mxu0 %v1223_v4  ;;  %v1234_v17 = vld [vmem:[%s1679_s1 + $0x38] sm:$0xff]   ;;  %v1235_v19 = vld [vmem:[%s1680_s0 + $0xa0] ss:$20 sps:$4 sm:$0xff]   ;;  %v1246_v28 = vld [vmem:[%s1679_s1 + $0x108] sm:$0xff]  }
   0x9   :  { %598 = vmatprep.mubr.bf16.mxu0 %v1241_v13  ;;  %v1239_v20 = vld [vmem:[%s1680_s0] ss:$20 sps:$4 sm:$0xff]   ;;  %v1251_v31 = vld [vmem:[%s1680_s0 + $0x28] ss:$20 sps:$4 sm:$0xff]   ;;  %v1263_v41 = vld [vmem:[%s1680_s0 + $0x50] ss:$20 sps:$4 sm:$0xff]  }
   0xa   :  { %v1242_v21 = vld [vmem:[%s1679_s1 + $0x80] sm:$0xff]   ;;  %v1247_v29 = vld [vmem:[%s1679_s1 + $0xd0] sm:$0xff]   ;;  %v1256_v32 = vld [vmem:[%s1680_s0 + $0xc8] ss:$20 sps:$4 sm:$0xff]  }
   0xb   :  { %1211 = vmatpush3.bf16.msra.mxu1 %v1224_v5  ;;  %1031 = vmatpush3.bf16.msra.mxu0 %v1224_v5  ;;  %v1243_v22 = vld [vmem:[%s1679_s1 + $0x100] sm:$0xff]   ;;  %v1250_v30 = vld [vmem:[%s1679_s1 + $0x90] sm:$0xff]   ;;  %v1255_v34 = vld [vmem:[%s1679_s1 + $0xd8] sm:$0xff]  }
   0xc   :  { %1204 = vmatprep.subr.bf16.mxu1 %v1225_v6  ;;  %1032 = vmatprep.subr.bf16.mxu0 %v1225_v6  ;;  %v1253_v26 = vld [vmem:[%s1680_s0 + $0xcc] ss:$20 sps:$4 sm:$0xff]   ;;  %v1252_v33 = vld [vmem:[%s1679_s1 + $0x110] sm:$0xff]   ;;  %v1257_v37 = vld [vmem:[%s1679_s1 + $0x98] sm:$0xff]  }
   0xd   :  { %v1260_v35 = vld [vmem:[%s1680_s0 + $0x54] ss:$20 sps:$4 sm:$0xff]   ;;  %v1258_v38 = vld [vmem:[%s1679_s1 + $0x118] sm:$0xff]   ;;  %v1259_v39 = vld [vmem:[%s1679_s1 + $0xe0] sm:$0xff]  }
   0xe   :  { %v1265_v36 = vld [vmem:[%s1680_s0 + $0xf4] ss:$20 sps:$4 sm:$0xff]   ;;  %v1262_v40 = vld [vmem:[%s1679_s1 + $0xa0] sm:$0xff]   ;;  %v1272_v45 = vld [vmem:[%s1680_s0 + $0x7c] ss:$20 sps:$4 sm:$0xff]  }
   0xf   :  { %1212 = vmatpush3.bf16.msra.mxu1 %v1226_v7  ;;  %1033 = vmatpush3.bf16.msra.mxu0 %v1226_v7  ;;  %v1268_v42 = vld [vmem:[%s1680_s0 + $0xf0] ss:$20 sps:$4 sm:$0xff]   ;;  %v1267_v44 = vld [vmem:[%s1679_s1 + $0xe8] sm:$0xff]   ;;  %v1277_v53 = vld [vmem:[%s1679_s1 + $0xf8] sm:$0xff]  }
  0x10   :  { %1205 = vmatprep.subr.bf16.mxu1 %v1227_v8  ;;  %1034 = vmatprep.subr.bf16.mxu0 %v1227_v8  ;;  %v1264_v43 = vld [vmem:[%s1679_s1 + $0x120] sm:$0xff]   ;;  %v1269_v47 = vld [vmem:[%s1679_s1 + $0xa8] sm:$0xff]   ;;  %v1271_v49 = vld [vmem:[%s1679_s1 + $0xf0] sm:$0xff]  }
  0x11   :  { %v1281_v46 = vld [vmem:[%s1680_s0 + $0xc] ss:$20 sps:$4 sm:$0xff]   ;;  %v1274_v50 = vld [vmem:[%s1679_s1 + $0xb0] sm:$0xff]   ;;  %v1278_v54 = vld [vmem:[%s1679_s1 + $0xb8] sm:$0xff]  }
  0x12   :  { %v1270_v48 = vld [vmem:[%s1679_s1 + $0x128] sm:$0xff]   ;;  %v1276_v52 = vld [vmem:[%s1679_s1 + $0x130] sm:$0xff]   ;;  %v1282_v55 = vld [vmem:[%s1679_s1 + $0x138] sm:$0xff]  }
  0x13   :  { %1213 = vmatpush3.bf16.msra.mxu1 %v1228_v9  ;;  %1035 = vmatpush3.bf16.msra.mxu0 %v1228_v9  ;;  %v1275_v51 = vld [vmem:[%s1680_s0 + $0x78] ss:$20 sps:$4 sm:$0xff]   ;;  %v1279_v56 = vld [vmem:[%s1680_s0 + $0x8] ss:$20 sps:$4 sm:$0xff]   ;;  %v1283_v57 = vld [vmem:[%s1680_s0 + $0x10] ss:$20 sps:$4 sm:$0xff]  }
  0x14   :  { %1206 = vmatprep.subr.bf16.mxu1 %v1229_v10  ;;  %1036 = vmatprep.subr.bf16.mxu0 %v1229_v10  ;;  %v1284_v58 = vld [vmem:[%s1680_s0 + $0x34] ss:$20 sps:$4 sm:$0xff]   ;;  %v1286_v59 = vld [vmem:[%s1680_s0 + $0x30] ss:$20 sps:$4 sm:$0xff]   ;;  %v1287_v60 = vld [vmem:[%s1680_s0 + $0x38] ss:$20 sps:$4 sm:$0xff]  }
  0x15   :  { %v1288_v61 = vld [vmem:[%s1680_s0 + $0x5c] ss:$20 sps:$4 sm:$0xff]   ;;  %v1290_v62 = vld [vmem:[%s1680_s0 + $0x58] ss:$20 sps:$4 sm:$0xff]   ;;  %v1291_v63 = vld [vmem:[%s1680_s0 + $0x60] ss:$20 sps:$4 sm:$0xff]  }
  0x16   :  { %v1292_v0 = vld [vmem:[%s1680_s0 + $0x84] ss:$20 sps:$4 sm:$0xff]   ;;  %v1294_v1 = vld [vmem:[%s1680_s0 + $0x80] ss:$20 sps:$4 sm:$0xff]   ;;  %v1295_v2 = vld [vmem:[%s1680_s0 + $0x88] ss:$20 sps:$4 sm:$0xff]  }
  0x17   :  { %1214 = vmatpush3.bf16.msra.mxu1 %v1230_v12  ;;  %1037 = vmatpush3.bf16.msra.mxu0 %v1230_v12  ;;  %v1296_v3 = vld [vmem:[%s1680_s0 + $0xac] ss:$20 sps:$4 sm:$0xff]   ;;  %v1298_v4 = vld [vmem:[%s1680_s0 + $0xa8] ss:$20 sps:$4 sm:$0xff]   ;;  %v1299_v5 = vld [vmem:[%s1680_s0 + $0xb0] ss:$20 sps:$4 sm:$0xff]  }
  0x18   :  { %1207 = vmatprep.subr.bf16.mxu1 %v1231_v14  ;;  %1038 = vmatprep.subr.bf16.mxu0 %v1231_v14  ;;  %v1300_v6 = vld [vmem:[%s1680_s0 + $0xd4] ss:$20 sps:$4 sm:$0xff]   ;;  %v1302_v7 = vld [vmem:[%s1680_s0 + $0xd0] ss:$20 sps:$4 sm:$0xff]   ;;  %v1303_v8 = vld [vmem:[%s1680_s0 + $0xd8] ss:$20 sps:$4 sm:$0xff]  }
  0x19   :  { %v1304_v9 = vld [vmem:[%s1680_s0 + $0xfc] ss:$20 sps:$4 sm:$0xff]   ;;  %v1306_v10 = vld [vmem:[%s1680_s0 + $0xf8] ss:$20 sps:$4 sm:$0xff]   ;;  %v1307_v11 = vld [vmem:[%s1680_s0 + $0x100] ss:$20 sps:$4 sm:$0xff]  }
  0x1b   :  { %1215 = vmatpush3.bf16.msra.mxu1 %v1232_v15  ;;  %1039 = vmatpush3.bf16.msra.mxu0 %v1232_v15 }
  0x1c   :  { %1208 = vmatprep.subr.bf16.mxu1 %v1233_v16  ;;  %1040 = vmatprep.subr.bf16.mxu0 %v1233_v16 }
  0x1f   :  { %1216 = vmatpush3.bf16.msra.mxu1 %v1234_v17  ;;  %1041 = vmatpush3.bf16.msra.mxu0 %v1234_v17 }
  0x20   :  { %1084 = vmatprep.subr.bf16.mxu1 %v1238_v18  ;;  %1157 = vmatprep.subr.bf16.mxu0 %v1308_v24 }
  0x22   :  { %631 = vmatmul.mubr.bf16.vlgmr.msra.gmra.mrb[0].mxu1 %v1235_v19  ;;  %599 = vmatmul.mubr.bf16.vlgmr.msra.gmra.mrb[0].mxu0 %v1239_v20 }
  0x23   :  { %1085 = vmatpush3.bf16.msra.mxu1 %v1242_v21  ;;  %1158 = vmatpush3.bf16.msra.mxu0 %v1243_v22 }
  0x24   :  { %1086 = vmatprep.subr.bf16.mxu1 %v1244_v23  ;;  %1159 = vmatprep.subr.bf16.mxu0 %v1308_v24 }
  0x25   :  { %606 = vmatprep.mubr.bf16.mxu0 %v1248_v25  ;;  %638 = vmatprep.mubr.bf16.mxu1 %v1253_v26 }
  0x27   :  { %1087 = vmatpush3.bf16.msra.mxu1 %v1245_v27  ;;  %1160 = vmatpush3.bf16.msra.mxu0 %v1246_v28 }
  0x28   :  { %1088 = vmatprep.subr.bf16.mxu1 %v1247_v29  ;;  %1161 = vmatprep.subr.bf16.mxu0 %v1308_v24 }
  0x2a   :  { %607 = vmatmul.mubr.bf16.gmra.mrb[4].mxu0 %v1251_v31  ;;  %639 = vmatmul.mubr.bf16.gmra.mrb[4].mxu1 %v1256_v32 }
  0x2b   :  { %1089 = vmatpush3.bf16.msra.mxu1 %v1250_v30  ;;  %1162 = vmatpush3.bf16.msra.mxu0 %v1252_v33 }
  0x2c   :  { %1090 = vmatprep.subr.bf16.mxu1 %v1255_v34  ;;  %1163 = vmatprep.subr.bf16.mxu0 %v1308_v24 }
  0x2d   :  { %614 = vmatprep.mubr.bf16.mxu0 %v1260_v35  ;;  %646 = vmatprep.mubr.bf16.mxu1 %v1265_v36 }
  0x2f   :  { %1091 = vmatpush3.bf16.msra.mxu1 %v1257_v37  ;;  %1164 = vmatpush3.bf16.msra.mxu0 %v1258_v38 }
  0x30   :  { %1092 = vmatprep.subr.bf16.mxu1 %v1259_v39  ;;  %1165 = vmatprep.subr.bf16.mxu0 %v1308_v24 }
  0x32   :  { %615 = vmatmul.mubr.bf16.gmra.mrb[8].mxu0 %v1263_v41  ;;  %647 = vmatmul.mubr.bf16.gmra.mrb[8].mxu1 %v1268_v42 }
  0x33   :  { %1093 = vmatpush3.bf16.msra.mxu1 %v1262_v40  ;;  %1166 = vmatpush3.bf16.msra.mxu0 %v1264_v43 }
  0x34   :  { %1094 = vmatprep.subr.bf16.mxu1 %v1267_v44  ;;  %1167 = vmatprep.subr.bf16.mxu0 %v1308_v24 }
  0x35   :  { %622 = vmatprep.mubr.bf16.mxu0 %v1272_v45  ;;  %687 = vmatprep.mubr.bf16.mxu1 %v1281_v46 }
  0x37   :  { %1095 = vmatpush3.bf16.msra.mxu1 %v1269_v47  ;;  %1168 = vmatpush3.bf16.msra.mxu0 %v1270_v48 }
  0x38   :  { %1096 = vmatprep.subr.bf16.mxu1 %v1271_v49  ;;  %1169 = vmatprep.subr.bf16.mxu0 %v1308_v24 }
  0x3a   :  { %623 = vmatmul.mubr.bf16.gmra.mrb[12].mxu0 %v1275_v51 }
  0x3b   :  { %1097 = vmatpush3.bf16.msra.mxu1 %v1274_v50  ;;  %1170 = vmatpush3.bf16.msra.mxu0 %v1276_v52 }
  0x3c   :  { %1098 = vmatprep.subr.bf16.mxu1 %v1277_v53  ;;  %1171 = vmatprep.subr.bf16.mxu0 %v1308_v24 }
  0x3d   :  { %1173 = vmatprep.mubr.msk.bf16.mxu0 %vm1309_vm0, %v1308_v24 }
  0x3f   :  { %1099 = vmatpush3.bf16.msra.mxu1 %v1278_v54  ;;  %1172 = vmatpush3.bf16.msra.mxu0 %v1282_v55 }
  0x42   :  { %688 = vmatmul.mubr.bf16.vlgmr.msra.gmra.mrb[12].mxu1 %v1279_v56  ;;  %1174 = vmatmul.mubr.bf16.vlgmr.msra.gmra.mrb[16].mxu0 %v1283_v57  ;;  %v1598_v56 = vld [vmem:[%s1681_s2] ss:$0 sm:$0xff] }
  0x43   :  { %695 = vmatprep.mubr.bf16.mxu1 %v1284_v58  ;;  %1177 = vmatprep.mubr.msk.bf16.mxu0 %vm1309_vm0, %v1308_v24 }
  0x4a   :  { %696 = vmatmul.mubr.bf16.gmra.mrb[16].mxu1 %v1286_v59  ;;  %1178 = vmatmul.mubr.bf16.gmra.mrb[20].mxu0 %v1287_v60 }
  0x4b   :  { %703 = vmatprep.mubr.bf16.mxu1 %v1288_v61  ;;  %1181 = vmatprep.mubr.msk.bf16.mxu0 %vm1309_vm0, %v1308_v24 }
  0x52   :  { %704 = vmatmul.mubr.bf16.gmra.mrb[20].mxu1 %v1290_v62  ;;  %1182 = vmatmul.mubr.bf16.gmra.mrb[24].mxu0 %v1291_v63 }
  0x53   :  { %711 = vmatprep.mubr.bf16.mxu1 %v1292_v0  ;;  %1185 = vmatprep.mubr.msk.bf16.mxu0 %vm1309_vm0, %v1308_v24 }
  0x5a   :  { %712 = vmatmul.mubr.bf16.gmra.mrb[24].mxu1 %v1294_v1  ;;  %1186 = vmatmul.mubr.bf16.gmra.mrb[28].mxu0 %v1295_v2 }
  0x5b   :  { %719 = vmatprep.mubr.bf16.mxu1 %v1296_v3  ;;  %1189 = vmatprep.mubr.msk.bf16.mxu0 %vm1309_vm0, %v1308_v24 }
  0x62   :  { %720 = vmatmul.mubr.bf16.gmra.mrb[28].mxu1 %v1298_v4  ;;  %1190 = vmatmul.mubr.bf16.gmra.mrb[32].mxu0 %v1299_v5 }
  0x63   :  { %727 = vmatprep.mubr.bf16.mxu1 %v1300_v6  ;;  %1193 = vmatprep.mubr.msk.bf16.mxu0 %vm1309_vm0, %v1308_v24 }
  0x6a   :  { %728 = vmatmul.mubr.bf16.gmra.mrb[32].mxu1 %v1302_v7  ;;  %1194 = vmatmul.mubr.bf16.gmra.mrb[36].mxu0 %v1303_v8 }
  0x6b   :  { %735 = vmatprep.mubr.bf16.mxu1 %v1304_v9  ;;  %1197 = vmatprep.mubr.msk.bf16.mxu0 %vm1309_vm0, %v1308_v24 }
  0x72   :  { %736 = vmatmul.mubr.bf16.gmra.mrb[36].mxu1 %v1306_v10  ;;  %1198 = vmatmul.mubr.bf16.gmra.mrb[40].mxu0 %v1307_v11 }
  0xf5   :  { %v1066_v12 = vpop.f32.mrb[0].mxu1  ;;  %v1042_v13 = vpop.f32.mrb[0].mxu0 }
  0xf6   :  { %v1067_v14 = vpop.f32.mrb[1].mxu1  ;;  %v1043_v15 = vpop.f32.mrb[1].mxu0 }
  0xf7   :  { %v1577_v16 = vadd.f32 %v1067_v14, %v1066_v12  ;;  %v1069_v17 = vpop.f32.mrb[2].mxu1  ;;  %v1044_v18 = vadd.f32 %v1043_v15, %v1042_v13  ;;  %v1045_v19 = vpop.f32.mrb[2].mxu0 }
  0xf8   :  { %v1070_v20 = vpop.f32.mrb[3].mxu1  ;;  %v1046_v21 = vpop.f32.mrb[3].mxu0 }
  0xf9   :  { %v1579_v22 = vadd.f32 %v1070_v20, %v1069_v17  ;;  %v1047_v23 = vadd.f32 %v1046_v21, %v1045_v19  ;;  %v601_v59 = vadd.f32 %v1044_v18, %v1598_v56 }
  0xfb   :  { %v604_v1 = vadd.f32 %v1047_v23, %v1598_v56 }
  0xfd   :  { %v1048_v24 = vpop.f32.mrb[4].mxu0  ;;  %v1072_v25 = vpop.f32.mrb[4].mxu1 }
  0xfe   :  { %v1049_v26 = vpop.f32.mrb[5].mxu0  ;;  %v1073_v27 = vpop.f32.mrb[5].mxu1 }
  0xff   :  { %v1050_v28 = vadd.f32 %v1049_v26, %v1048_v24  ;;  %v1051_v29 = vpop.f32.mrb[6].mxu0  ;;  %v1581_v30 = vadd.f32 %v1073_v27, %v1072_v25  ;;  %v1075_v31 = vpop.f32.mrb[6].mxu1 }
 0x100   :  { %v1052_v32 = vpop.f32.mrb[7].mxu0  ;;  %v1076_v33 = vpop.f32.mrb[7].mxu1 }
 0x101   :  { %v1053_v34 = vadd.f32 %v1052_v32, %v1051_v29  ;;  %v1583_v35 = vadd.f32 %v1076_v33, %v1075_v31  ;;  %v609_v12 = vadd.f32 %v1050_v28, %v1598_v56 }
 0x103   :  { %v612_v21 = vadd.f32 %v1053_v34, %v1598_v56 }
 0x105   :  { %v1054_v36 = vpop.f32.mrb[8].mxu0  ;;  %v1078_v37 = vpop.f32.mrb[8].mxu1 }
 0x106   :  { %v1055_v38 = vpop.f32.mrb[9].mxu0  ;;  %v1079_v39 = vpop.f32.mrb[9].mxu1 }
 0x107   :  { %v1056_v40 = vadd.f32 %v1055_v38, %v1054_v36  ;;  %v1057_v41 = vpop.f32.mrb[10].mxu0  ;;  %v1585_v42 = vadd.f32 %v1079_v39, %v1078_v37  ;;  %v1081_v43 = vpop.f32.mrb[10].mxu1 }
 0x108   :  { %v1058_v44 = vpop.f32.mrb[11].mxu0  ;;  %v1082_v45 = vpop.f32.mrb[11].mxu1 }
 0x109   :  { %v1587_v46 = vadd.f32 %v1058_v44, %v1057_v41  ;;  %v1589_v47 = vadd.f32 %v1082_v45, %v1081_v43  ;;  %v617_v36 = vadd.f32 %v1056_v40, %v1598_v56 }
 0x10d   :  { %v1060_v48 = vpop.f32.mrb[12].mxu0 }
 0x10e   :  { %v1061_v49 = vpop.f32.mrb[13].mxu0 }
 0x10f   :  { %v1591_v50 = vadd.f32 %v1061_v49, %v1060_v48  ;;  %v1063_v51 = vpop.f32.mrb[14].mxu0  ;;  %v620_v48 = vadd.f32 %v1587_v46, %v1598_v56 }
 0x110   :  { %v1064_v52 = vpop.f32.mrb[15].mxu0 }
 0x111   :  { %v1593_v53 = vadd.f32 %v1064_v52, %v1063_v51 }
 0x115   :  { %v1100_v54 = vpop.f32.mrb[12].mxu1  ;;  %v778_v55 = vpop.f32.mrb[16].mxu0 }
 0x116   :  { %v1101_v57 = vpop.f32.mrb[13].mxu1  ;;  %v1175_v58 = vpop.f32.mrb[17].mxu0 }
 0x117   :  { %v1102_v60 = vadd.f32 %v1101_v57, %v1100_v54  ;;  %v1103_v61 = vpop.f32.mrb[14].mxu1  ;;  %v781_v62 = vpop.f32.mrb[18].mxu0 }
 0x118   :  { %v1104_v63 = vpop.f32.mrb[15].mxu1  ;;  %v1176_v0 = vpop.f32.mrb[19].mxu0 }
 0x119   :  { %v690_v2 = vadd.f32 %v1102_v60, %v601_v59  ;;  %v1105_v3 = vadd.f32 %v1104_v63, %v1103_v61  ;;  %v625_v61 = vadd.f32 %v1591_v50, %v1598_v56 }
 0x11b   :  { %v779_v4 = vadd.f32 %v778_v55, %v690_v2  ;;  %v693_v5 = vadd.f32 %v1105_v3, %v604_v1 }
 0x11d   :  { %v833_v6 = vmax.f32 %v779_v4, 0.0  ;;  %v782_v7 = vadd.f32 %v781_v62, %v693_v5  ;;  %v1106_v8 = vpop.f32.mrb[16].mxu1  ;;  %v786_v9 = vpop.f32.mrb[20].mxu0  ;;  %v628_v5 = vadd.f32 %v1593_v53, %v1598_v56 }
 0x11e   :  { %v1107_v10 = vpop.f32.mrb[17].mxu1  ;;  %v1179_v11 = vpop.f32.mrb[21].mxu0 }
 0x11f   :  { %v1012_v13 = vpack.c.bf16 %v833_v6, %v833_v6  ;;  %v834_v14 = vmax.f32 %v782_v7, 0.0  ;;  %v1108_v15 = vadd.f32 %v1107_v10, %v1106_v8  ;;  %v1109_v17 = vpop.f32.mrb[18].mxu1  ;;  %v789_v18 = vpop.f32.mrb[22].mxu0 }
 0x120   :  { %v1110_v19 = vpop.f32.mrb[19].mxu1  ;;  %v1180_v20 = vpop.f32.mrb[23].mxu0 }
 0x121   :  { %904 = vst.msk [vmem:[%s1682_s3] sm:$0xf] %vm903_vm1, %v1012_v13  ;;  %v1013_v23 = vpack.c.bf16 %v834_v14, %v834_v14  ;;  %v698_v24 = vadd.f32 %v1108_v15, %v609_v12  ;;  %v1111_v25 = vadd.f32 %v1110_v19, %v1109_v17  ;;  %v633_v15 = vadd.f32 %v1577_v16, %v1598_v56 }
 0x123   :  { %905 = vst.msk [vmem:[%s1682_s3 + $0x4] sm:$0xf] %vm903_vm1, %v1013_v23  ;;  %v787_v26 = vadd.f32 %v786_v9, %v698_v24  ;;  %v701_v27 = vadd.f32 %v1111_v25, %v612_v21  ;;  %v636_v25 = vadd.f32 %v1579_v22, %v1598_v56 }
 0x125   :  { %v835_v28 = vmax.f32 %v787_v26, 0.0  ;;  %v790_v29 = vadd.f32 %v789_v18, %v701_v27  ;;  %v1112_v31 = vpop.f32.mrb[20].mxu1  ;;  %v794_v32 = vpop.f32.mrb[24].mxu0 }
 0x126   :  { %v1113_v33 = vpop.f32.mrb[21].mxu1  ;;  %v1183_v34 = vpop.f32.mrb[25].mxu0 }
 0x127   :  { %v1014_v37 = vpack.c.bf16 %v835_v28, %v835_v28  ;;  %v836_v38 = vmax.f32 %v790_v29, 0.0  ;;  %v1114_v39 = vadd.f32 %v1113_v33, %v1112_v31  ;;  %v1115_v41 = vpop.f32.mrb[22].mxu1  ;;  %v797_v43 = vpop.f32.mrb[26].mxu0 }
 0x128   :  { %v1116_v44 = vpop.f32.mrb[23].mxu1  ;;  %v1184_v45 = vpop.f32.mrb[27].mxu0 }
 0x129   :  { %906 = vst.msk [vmem:[%s1682_s3 + $0x8] sm:$0xf] %vm903_vm1, %v1014_v37  ;;  %v1015_v49 = vpack.c.bf16 %v836_v38, %v836_v38  ;;  %v706_v51 = vadd.f32 %v1114_v39, %v617_v36  ;;  %v1117_v52 = vadd.f32 %v1116_v44, %v1115_v41  ;;  %v641_v37 = vadd.f32 %v1581_v30, %v1598_v56 }
 0x12b   :  { %907 = vst.msk [vmem:[%s1682_s3 + $0xc] sm:$0xf] %vm903_vm1, %v1015_v49  ;;  %v795_v40 = vadd.f32 %v794_v32, %v706_v51  ;;  %v709_v54 = vadd.f32 %v1117_v52, %v620_v48  ;;  %v644_v49 = vadd.f32 %v1583_v35, %v1598_v56 }
 0x12d   :  { %v837_v55 = vmax.f32 %v795_v40, 0.0  ;;  %v798_v57 = vadd.f32 %v797_v43, %v709_v54  ;;  %v1118_v58 = vpop.f32.mrb[24].mxu1  ;;  %v802_v59 = vpop.f32.mrb[28].mxu0 }
 0x12e   :  { %v1119_v46 = vpop.f32.mrb[25].mxu1  ;;  %v1187_v60 = vpop.f32.mrb[29].mxu0 }
 0x12f   :  { %v1016_v62 = vpack.c.bf16 %v837_v55, %v837_v55  ;;  %v838_v63 = vmax.f32 %v798_v57, 0.0  ;;  %v1120_v0 = vadd.f32 %v1119_v46, %v1118_v58  ;;  %v1121_v1 = vpop.f32.mrb[26].mxu1  ;;  %v805_v2 = vpop.f32.mrb[30].mxu0  ;;  %v649_v60 = vadd.f32 %v1585_v42, %v1598_v56 }
 0x130   :  { %v1122_v3 = vpop.f32.mrb[27].mxu1  ;;  %v1188_v4 = vpop.f32.mrb[31].mxu0 }
 0x131   :  { %908 = vst.msk [vmem:[%s1682_s3 + $0x10] sm:$0xf] %vm903_vm1, %v1016_v62  ;;  %v1017_v6 = vpack.c.bf16 %v838_v63, %v838_v63  ;;  %v714_v7 = vadd.f32 %v1120_v0, %v625_v61  ;;  %v1123_v8 = vadd.f32 %v1122_v3, %v1121_v1  ;;  %v652_v4 = vadd.f32 %v1589_v47, %v1598_v56 }
 0x133   :  { %909 = vst.msk [vmem:[%s1682_s3 + $0x14] sm:$0xf] %vm903_vm1, %v1017_v6  ;;  %v803_v50 = vadd.f32 %v802_v59, %v714_v7  ;;  %v717_v9 = vadd.f32 %v1123_v8, %v628_v5 }
 0x135   :  { %v839_v10 = vmax.f32 %v803_v50, 0.0  ;;  %v806_v11 = vadd.f32 %v805_v2, %v717_v9  ;;  %v1124_v12 = vpop.f32.mrb[28].mxu1  ;;  %v810_v13 = vpop.f32.mrb[32].mxu0 }
 0x136   :  { %v1125_v53 = vpop.f32.mrb[29].mxu1  ;;  %v1191_v14 = vpop.f32.mrb[33].mxu0 }
 0x137   :  { %v1018_v17 = vpack.c.bf16 %v839_v10, %v839_v10  ;;  %v840_v18 = vmax.f32 %v806_v11, 0.0  ;;  %v1126_v19 = vadd.f32 %v1125_v53, %v1124_v12  ;;  %v1127_v20 = vpop.f32.mrb[30].mxu1  ;;  %v813_v21 = vpop.f32.mrb[34].mxu0 }
 0x138   :  { %v1128_v23 = vpop.f32.mrb[31].mxu1  ;;  %v1192_v24 = vpop.f32.mrb[35].mxu0 }
 0x139   :  { %910 = vst.msk [vmem:[%s1682_s3 + $0x18] sm:$0xf] %vm903_vm1, %v1018_v17  ;;  %v1019_v26 = vpack.c.bf16 %v840_v18, %v840_v18  ;;  %v722_v27 = vadd.f32 %v1126_v19, %v633_v15  ;;  %v1129_v28 = vadd.f32 %v1128_v23, %v1127_v20 }
 0x13b   :  { %911 = vst.msk [vmem:[%s1682_s3 + $0x1c] sm:$0xf] %vm903_vm1, %v1019_v26  ;;  %v811_v16 = vadd.f32 %v810_v13, %v722_v27  ;;  %v725_v29 = vadd.f32 %v1129_v28, %v636_v25 }
 0x13d   :  { %v841_v31 = vmax.f32 %v811_v16, 0.0  ;;  %v814_v32 = vadd.f32 %v813_v21, %v725_v29  ;;  %v1130_v33 = vpop.f32.mrb[32].mxu1  ;;  %v818_v34 = vpop.f32.mrb[36].mxu0 }
 0x13e   :  { %v1131_v22 = vpop.f32.mrb[33].mxu1  ;;  %v1195_v36 = vpop.f32.mrb[37].mxu0 }
 0x13f   :  { %v1020_v38 = vpack.c.bf16 %v841_v31, %v841_v31  ;;  %v842_v39 = vmax.f32 %v814_v32, 0.0  ;;  %v1132_v41 = vadd.f32 %v1131_v22, %v1130_v33  ;;  %v1133_v43 = vpop.f32.mrb[34].mxu1  ;;  %v821_v44 = vpop.f32.mrb[38].mxu0 }
 0x140   :  { %v1134_v45 = vpop.f32.mrb[35].mxu1  ;;  %v1196_v48 = vpop.f32.mrb[39].mxu0 }
 0x141   :  { %912 = vst.msk [vmem:[%s1682_s3 + $0x20] sm:$0xf] %vm903_vm1, %v1020_v38  ;;  %v1021_v51 = vpack.c.bf16 %v842_v39, %v842_v39  ;;  %v730_v52 = vadd.f32 %v1132_v41, %v641_v37  ;;  %v1135_v40 = vadd.f32 %v1134_v45, %v1133_v43 }
 0x143   :  { %913 = vst.msk [vmem:[%s1682_s3 + $0x24] sm:$0xf] %vm903_vm1, %v1021_v51  ;;  %v819_v30 = vadd.f32 %v818_v34, %v730_v52  ;;  %v733_v54 = vadd.f32 %v1135_v40, %v644_v49 }
 0x145   :  { %v843_v55 = vmax.f32 %v819_v30, 0.0  ;;  %v822_v57 = vadd.f32 %v821_v44, %v733_v54  ;;  %v1136_v58 = vpop.f32.mrb[36].mxu1  ;;  %v826_v59 = vpop.f32.mrb[40].mxu0 }
 0x146   :  { %v1137_v35 = vpop.f32.mrb[37].mxu1  ;;  %v1199_v46 = vpop.f32.mrb[41].mxu0 }
 0x147   :  { %v1022_v61 = vpack.c.bf16 %v843_v55, %v843_v55  ;;  %v844_v62 = vmax.f32 %v822_v57, 0.0  ;;  %v1138_v63 = vadd.f32 %v1137_v35, %v1136_v58  ;;  %v1139_v0 = vpop.f32.mrb[38].mxu1  ;;  %v829_v1 = vpop.f32.mrb[42].mxu0 }
 0x148   :  { %v1140_v2 = vpop.f32.mrb[39].mxu1  ;;  %v1200_v3 = vpop.f32.mrb[43].mxu0 }
 0x149   :  { %914 = vst.msk [vmem:[%s1682_s3 + $0x28] sm:$0xf] %vm903_vm1, %v1022_v61  ;;  %v1023_v5 = vpack.c.bf16 %v844_v62, %v844_v62  ;;  %v738_v6 = vadd.f32 %v1138_v63, %v649_v60  ;;  %v1141_v7 = vadd.f32 %v1140_v2, %v1139_v0 }
 0x14b   :  { %915 = vst.msk [vmem:[%s1682_s3 + $0x2c] sm:$0xf] %vm903_vm1, %v1023_v5  ;;  %v827_v42 = vadd.f32 %v826_v59, %v738_v6  ;;  %v741_v8 = vadd.f32 %v1141_v7, %v652_v4 }
 0x14d   :  { %v845_v50 = vmax.f32 %v827_v42, 0.0  ;;  %v830_v9 = vadd.f32 %v829_v1, %v741_v8 }
 0x14f   :  { %v1024_v10 = vpack.c.bf16 %v845_v50, %v845_v50  ;;  %v846_v11 = vmax.f32 %v830_v9, 0.0 }
 0x151   :  { %916 = vst.msk [vmem:[%s1682_s3 + $0x30] sm:$0xf] %vm903_vm1, %v1024_v10  ;;  %v1025_v47 = vpack.c.bf16 %v846_v11, %v846_v11 }
 0x153   :  { %917 = vst.msk [vmem:[%s1682_s3 + $0x34] sm:$0xf] %vm903_vm1, %v1025_v47 }

// kernel: forward.7
= control target key start
LH: loop header
LB: loop body
LE: loop exit
PB: predicated region body
PF: predicated region fallthrough
CT: control target
= control target key end

     0   :  { %s11366_s1 = inlined_call_operand.vmem [shape: bf16[3200,512], index: 1, kind: input, shape index: {}]   ;;  %s11367_s0 = inlined_call_operand.vmem [shape: bf16[16,3200], index: 0, kind: input, shape index: {}]   ;;  %s11368_s3 = inlined_call_operand.vmem [shape: bf16[512,128], index: 3, kind: input, shape index: {}]   ;;  %s11369_s2 = inlined_call_operand.vmem [shape: f32[1,512], index: 2, kind: input, shape index: {}]   ;;  %s11370_s4 = inlined_call_operand.vmem [shape: f32[1,128], index: 4, kind: input, shape index: {}]   ;;  %s11371_s5 = inlined_call_operand.vmem [shape: f32[16,128], index: 5, kind: output, shape index: {}]  }
   0x1   :  { %v7483_v0 = vld [vmem:[%s11366_s1 + $0x4] ss:$16 sps:$4 sm:$0xff]   ;;  %v7485_v1 = vld [vmem:[%s11366_s1 + $0xc] ss:$16 sps:$4 sm:$0xff]   ;;  %v7487_v2 = vld [vmem:[%s11366_s1] ss:$16 sps:$4 sm:$0xff]  }
   0x2   :  { %4995 = vmatprep.subr.bf16.mxu0 %v7483_v0  ;;  %v7488_v3 = vld [vmem:[%s11366_s1 + $0x8] ss:$16 sps:$4 sm:$0xff]   ;;  %5554 = vmatprep.subr.bf16.mxu1 %v7485_v1  ;;  %v7489_v4 = vld [vmem:[%s11366_s1 + $0x24] ss:$16 sps:$4 sm:$0xff]   ;;  %v7491_v5 = vld [vmem:[%s11366_s1 + $0x2c] ss:$16 sps:$4 sm:$0xff]  }
   0x3   :  { %4996 = vmatpush1.bf16.msra.mxu0 %v7487_v2  ;;  %5555 = vmatpush1.bf16.msra.mxu1 %v7488_v3  ;;  %v7493_v6 = vld [vmem:[%s11366_s1 + $0x20] ss:$16 sps:$4 sm:$0xff]   ;;  %v7494_v7 = vld [vmem:[%s11366_s1 + $0x28] ss:$16 sps:$4 sm:$0xff]   ;;  %v7495_v8 = vld [vmem:[%s11366_s1 + $0x44] ss:$16 sps:$4 sm:$0xff]  }
   0x4   :  { %4997 = vmatprep.subr.bf16.mxu0 %v7489_v4  ;;  %5556 = vmatprep.subr.bf16.mxu1 %v7491_v5  ;;  %v7497_v9 = vld [vmem:[%s11366_s1 + $0x4c] ss:$16 sps:$4 sm:$0xff]   ;;  %v7499_v10 = vld [vmem:[%s11366_s1 + $0x40] ss:$16 sps:$4 sm:$0xff]   ;;  %v7500_v11 = vld [vmem:[%s11366_s1 + $0x48] ss:$16 sps:$4 sm:$0xff]  }
   0x5   :  { %v7501_v12 = vld [vmem:[%s11366_s1 + $0x64] ss:$16 sps:$4 sm:$0xff]   ;;  %v7503_v13 = vld [vmem:[%s11366_s1 + $0x6c] ss:$16 sps:$4 sm:$0xff]   ;;  %v7505_v14 = vld [vmem:[%s11366_s1 + $0x60] ss:$16 sps:$4 sm:$0xff]  }
   0x6   :  { %v7506_v15 = vld [vmem:[%s11366_s1 + $0x68] ss:$16 sps:$4 sm:$0xff]   ;;  %v7507_v16 = vld [vmem:[%s11366_s1 + $0x84] ss:$16 sps:$4 sm:$0xff]   ;;  %v7509_v17 = vld [vmem:[%s11366_s1 + $0x8c] ss:$16 sps:$4 sm:$0xff]  }
   0x7   :  { %4998 = vmatpush1.bf16.msra.mxu0 %v7493_v6  ;;  %5557 = vmatpush1.bf16.msra.mxu1 %v7494_v7  ;;  %v7511_v18 = vld [vmem:[%s11366_s1 + $0x80] ss:$16 sps:$4 sm:$0xff]   ;;  %v7512_v19 = vld [vmem:[%s11366_s1 + $0x88] ss:$16 sps:$4 sm:$0xff]   ;;  %v7513_v20 = vld [vmem:[%s11366_s1 + $0xa4] ss:$16 sps:$4 sm:$0xff]  }
   0x8   :  { %4999 = vmatprep.subr.bf16.mxu0 %v7495_v8  ;;  %5558 = vmatprep.subr.bf16.mxu1 %v7497_v9  ;;  %v7515_v21 = vld [vmem:[%s11366_s1 + $0xac] ss:$16 sps:$4 sm:$0xff]   ;;  %v7517_v22 = vld [vmem:[%s11366_s1 + $0xa0] ss:$16 sps:$4 sm:$0xff]   ;;  %v7518_v23 = vld [vmem:[%s11366_s1 + $0xa8] ss:$16 sps:$4 sm:$0xff]  }
   0x9   :  { %v7519_v24 = vld [vmem:[%s11366_s1 + $0xc4] ss:$16 sps:$4 sm:$0xff]   ;;  %v7521_v25 = vld [vmem:[%s11366_s1 + $0xcc] ss:$16 sps:$4 sm:$0xff]   ;;  %v7523_v26 = vld [vmem:[%s11366_s1 + $0xc0] ss:$16 sps:$4 sm:$0xff]  }
   0xa   :  { %v7524_v27 = vld [vmem:[%s11366_s1 + $0xc8] ss:$16 sps:$4 sm:$0xff]   ;;  %v7525_v28 = vld [vmem:[%s11366_s1 + $0xe4] ss:$16 sps:$4 sm:$0xff]   ;;  %v7527_v29 = vld [vmem:[%s11366_s1 + $0xec] ss:$16 sps:$4 sm:$0xff]  }
   0xb   :  { %5000 = vmatpush1.bf16.msra.mxu0 %v7499_v10  ;;  %5559 = vmatpush1.bf16.msra.mxu1 %v7500_v11  ;;  %v7529_v30 = vld [vmem:[%s11366_s1 + $0xe0] ss:$16 sps:$4 sm:$0xff]   ;;  %v7530_v31 = vld [vmem:[%s11366_s1 + $0xe8] ss:$16 sps:$4 sm:$0xff]   ;;  %v7531_v32 = vld [vmem:[%s11366_s1 + $0x104] ss:$16 sps:$4 sm:$0xff]  }
   0xc   :  { %5001 = vmatprep.subr.bf16.mxu0 %v7501_v12  ;;  %5560 = vmatprep.subr.bf16.mxu1 %v7503_v13  ;;  %v7533_v33 = vld [vmem:[%s11366_s1 + $0x10c] ss:$16 sps:$4 sm:$0xff]   ;;  %v7535_v34 = vld [vmem:[%s11366_s1 + $0x100] ss:$16 sps:$4 sm:$0xff]   ;;  %v7536_v35 = vld [vmem:[%s11366_s1 + $0x108] ss:$16 sps:$4 sm:$0xff]  }
   0xd   :  { %v7537_v36 = vld [vmem:[%s11366_s1 + $0x124] ss:$16 sps:$4 sm:$0xff]   ;;  %v7539_v37 = vld [vmem:[%s11366_s1 + $0x12c] ss:$16 sps:$4 sm:$0xff]   ;;  %v7541_v38 = vld [vmem:[%s11366_s1 + $0x120] ss:$16 sps:$4 sm:$0xff]  }
   0xe   :  { %v7542_v39 = vld [vmem:[%s11366_s1 + $0x128] ss:$16 sps:$4 sm:$0xff]   ;;  %v7543_v40 = vld [vmem:[%s11366_s1 + $0x144] ss:$16 sps:$4 sm:$0xff]   ;;  %v7545_v41 = vld [vmem:[%s11366_s1 + $0x14c] ss:$16 sps:$4 sm:$0xff]  }
   0xf   :  { %5002 = vmatpush1.bf16.msra.mxu0 %v7505_v14  ;;  %5561 = vmatpush1.bf16.msra.mxu1 %v7506_v15  ;;  %v7547_v42 = vld [vmem:[%s11366_s1 + $0x140] ss:$16 sps:$4 sm:$0xff]   ;;  %v7548_v43 = vld [vmem:[%s11366_s1 + $0x148] ss:$16 sps:$4 sm:$0xff]   ;;  %v7549_v44 = vld [vmem:[%s11366_s1 + $0x164] ss:$16 sps:$4 sm:$0xff]  }
  0x10   :  { %5003 = vmatprep.subr.bf16.mxu0 %v7507_v16  ;;  %5562 = vmatprep.subr.bf16.mxu1 %v7509_v17  ;;  %v7551_v45 = vld [vmem:[%s11366_s1 + $0x16c] ss:$16 sps:$4 sm:$0xff]   ;;  %v7553_v46 = vld [vmem:[%s11366_s1 + $0x160] ss:$16 sps:$4 sm:$0xff]   ;;  %v7554_v47 = vld [vmem:[%s11366_s1 + $0x168] ss:$16 sps:$4 sm:$0xff]  }
  0x11   :  { %v7581_v48 = vld [vmem:[%s11367_s0 + $0x4] ss:$100 sps:$4 sm:$0xff]   ;;  %v7557_v50 = vld [vmem:[%s11366_s1 + $0x18c] ss:$16 sps:$4 sm:$0xff]   ;;  %v7559_v51 = vld [vmem:[%s11366_s1 + $0x180] ss:$16 sps:$4 sm:$0xff]  }
  0x12   :  { %v7555_v49 = vld [vmem:[%s11366_s1 + $0x184] ss:$16 sps:$4 sm:$0xff]   ;;  %5027 = vmatprep.mubr.bf16.mxu0 %v7581_v48  ;;  %5586 = vmatprep.mubr.bf16.mxu1 %v7581_v48  ;;  %v7560_v52 = vld [vmem:[%s11366_s1 + $0x188] ss:$16 sps:$4 sm:$0xff]   ;;  %v7563_v54 = vld [vmem:[%s11366_s1 + $0x1ac] ss:$16 sps:$4 sm:$0xff]  }
  0x13   :  { %5004 = vmatpush1.bf16.msra.mxu0 %v7511_v18  ;;  %5563 = vmatpush1.bf16.msra.mxu1 %v7512_v19  ;;  %v7561_v53 = vld [vmem:[%s11366_s1 + $0x1a4] ss:$16 sps:$4 sm:$0xff]   ;;  %v7565_v55 = vld [vmem:[%s11366_s1 + $0x1a0] ss:$16 sps:$4 sm:$0xff]   ;;  %v7566_v56 = vld [vmem:[%s11366_s1 + $0x1a8] ss:$16 sps:$4 sm:$0xff]  }
  0x14   :  { %5005 = vmatprep.subr.bf16.mxu0 %v7513_v20  ;;  %5564 = vmatprep.subr.bf16.mxu1 %v7515_v21  ;;  %v7567_v57 = vld [vmem:[%s11366_s1 + $0x1c4] ss:$16 sps:$4 sm:$0xff]   ;;  %v7569_v58 = vld [vmem:[%s11366_s1 + $0x1cc] ss:$16 sps:$4 sm:$0xff]   ;;  %v7571_v59 = vld [vmem:[%s11366_s1 + $0x1c0] ss:$16 sps:$4 sm:$0xff]  }
  0x15   :  { %v7572_v60 = vld [vmem:[%s11366_s1 + $0x1c8] ss:$16 sps:$4 sm:$0xff]   ;;  %v7573_v61 = vld [vmem:[%s11366_s1 + $0x1e4] ss:$16 sps:$4 sm:$0xff]   ;;  %v7575_v62 = vld [vmem:[%s11366_s1 + $0x1ec] ss:$16 sps:$4 sm:$0xff]  }
  0x16   :  { %v7577_v63 = vld [vmem:[%s11366_s1 + $0x1e0] ss:$16 sps:$4 sm:$0xff]   ;;  %v7578_v0 = vld [vmem:[%s11366_s1 + $0x1e8] ss:$16 sps:$4 sm:$0xff]   ;;  %v7584_v1 = vld [vmem:[%s11366_s1 + $0x204] ss:$16 sps:$4 sm:$0xff]  }
  0x17   :  { %5006 = vmatpush1.bf16.msra.mxu0 %v7517_v22  ;;  %5565 = vmatpush1.bf16.msra.mxu1 %v7518_v23  ;;  %v7587_v2 = vld [vmem:[%s11366_s1 + $0x20c] ss:$16 sps:$4 sm:$0xff]   ;;  %v7579_v3 = vld [vmem:[%s11367_s0] ss:$100 sps:$4 sm:$0xff]   ;;  %v7585_v5 = vld [vmem:[%s11366_s1 + $0x208] ss:$16 sps:$4 sm:$0xff]  }
  0x18   :  { %5007 = vmatprep.subr.bf16.mxu0 %v7519_v24  ;;  %5566 = vmatprep.subr.bf16.mxu1 %v7521_v25  ;;  %v7582_v4 = vld [vmem:[%s11366_s1 + $0x200] ss:$16 sps:$4 sm:$0xff]   ;;  %v7590_v6 = vld [vmem:[%s11366_s1 + $0x224] ss:$16 sps:$4 sm:$0xff]   ;;  %v7593_v7 = vld [vmem:[%s11366_s1 + $0x22c] ss:$16 sps:$4 sm:$0xff]  }
  0x19   :  { %v7588_v8 = vld [vmem:[%s11366_s1 + $0x220] ss:$16 sps:$4 sm:$0xff]   ;;  %v7591_v9 = vld [vmem:[%s11366_s1 + $0x228] ss:$16 sps:$4 sm:$0xff]   ;;  %v7596_v10 = vld [vmem:[%s11366_s1 + $0x244] ss:$16 sps:$4 sm:$0xff]  }
  0x1a   :  { %v7599_v11 = vld [vmem:[%s11366_s1 + $0x24c] ss:$16 sps:$4 sm:$0xff]   ;;  %v7594_v12 = vld [vmem:[%s11366_s1 + $0x240] ss:$16 sps:$4 sm:$0xff]   ;;  %v7597_v13 = vld [vmem:[%s11366_s1 + $0x248] ss:$16 sps:$4 sm:$0xff]  }
  0x1b   :  { %5008 = vmatpush1.bf16.msra.mxu0 %v7523_v26  ;;  %5567 = vmatpush1.bf16.msra.mxu1 %v7524_v27  ;;  %v7602_v14 = vld [vmem:[%s11366_s1 + $0x264] ss:$16 sps:$4 sm:$0xff]   ;;  %v7605_v15 = vld [vmem:[%s11366_s1 + $0x26c] ss:$16 sps:$4 sm:$0xff]   ;;  %v7600_v16 = vld [vmem:[%s11366_s1 + $0x260] ss:$16 sps:$4 sm:$0xff]  }
  0x1c   :  { %5009 = vmatprep.subr.bf16.mxu0 %v7525_v28  ;;  %5568 = vmatprep.subr.bf16.mxu1 %v7527_v29  ;;  %v7603_v17 = vld [vmem:[%s11366_s1 + $0x268] ss:$16 sps:$4 sm:$0xff]   ;;  %v7608_v18 = vld [vmem:[%s11366_s1 + $0x284] ss:$16 sps:$4 sm:$0xff]   ;;  %v7611_v19 = vld [vmem:[%s11366_s1 + $0x28c] ss:$16 sps:$4 sm:$0xff]  }
  0x1d   :  { %v7606_v20 = vld [vmem:[%s11366_s1 + $0x280] ss:$16 sps:$4 sm:$0xff]   ;;  %v7609_v21 = vld [vmem:[%s11366_s1 + $0x288] ss:$16 sps:$4 sm:$0xff]   ;;  %v7614_v22 = vld [vmem:[%s11366_s1 + $0x2a4] ss:$16 sps:$4 sm:$0xff]  }
  0x1e   :  { %v7617_v23 = vld [vmem:[%s11366_s1 + $0x2ac] ss:$16 sps:$4 sm:$0xff]   ;;  %v7612_v24 = vld [vmem:[%s11366_s1 + $0x2a0] ss:$16 sps:$4 sm:$0xff]   ;;  %v7615_v25 = vld [vmem:[%s11366_s1 + $0x2a8] ss:$16 sps:$4 sm:$0xff]  }
  0x1f   :  { %5010 = vmatpush1.bf16.msra.mxu0 %v7529_v30  ;;  %5569 = vmatpush1.bf16.msra.mxu1 %v7530_v31  ;;  %v7620_v26 = vld [vmem:[%s11366_s1 + $0x2c4] ss:$16 sps:$4 sm:$0xff]   ;;  %v7623_v27 = vld [vmem:[%s11366_s1 + $0x2cc] ss:$16 sps:$4 sm:$0xff]   ;;  %v7618_v28 = vld [vmem:[%s11366_s1 + $0x2c0] ss:$16 sps:$4 sm:$0xff]  }
  0x20   :  { %5011 = vmatprep.subr.bf16.mxu0 %v7531_v32  ;;  %5570 = vmatprep.subr.bf16.mxu1 %v7533_v33  ;;  %v7621_v29 = vld [vmem:[%s11366_s1 + $0x2c8] ss:$16 sps:$4 sm:$0xff]   ;;  %v7680_v30 = vld [vmem:[%s11367_s0 + $0xc] ss:$100 sps:$4 sm:$0xff]   ;;  %v7626_v31 = vld [vmem:[%s11366_s1 + $0x2e4] ss:$16 sps:$4 sm:$0xff]  }
  0x21   :  { %v7629_v32 = vld [vmem:[%s11366_s1 + $0x2ec] ss:$16 sps:$4 sm:$0xff]   ;;  %v7624_v33 = vld [vmem:[%s11366_s1 + $0x2e0] ss:$16 sps:$4 sm:$0xff]  }
  0x22   :  { %v7653_v48 = vld [vmem:[%s11366_s1 + $0x36c] ss:$16 sps:$4 sm:$0xff]  }
  0x23   :  { %5012 = vmatpush1.bf16.msra.mxu0 %v7535_v34  ;;  %5571 = vmatpush1.bf16.msra.mxu1 %v7536_v35  ;;  %v7627_v34 = vld [vmem:[%s11366_s1 + $0x2e8] ss:$16 sps:$4 sm:$0xff]   ;;  %v7632_v35 = vld [vmem:[%s11366_s1 + $0x304] ss:$16 sps:$4 sm:$0xff]  }
  0x24   :  { %5013 = vmatprep.subr.bf16.mxu0 %v7537_v36  ;;  %5572 = vmatprep.subr.bf16.mxu1 %v7539_v37  ;;  %v7635_v36 = vld [vmem:[%s11366_s1 + $0x30c] ss:$16 sps:$4 sm:$0xff]   ;;  %v7630_v37 = vld [vmem:[%s11366_s1 + $0x300] ss:$16 sps:$4 sm:$0xff]  }
  0x27   :  { %5014 = vmatpush1.bf16.msra.mxu0 %v7541_v38  ;;  %5573 = vmatpush1.bf16.msra.mxu1 %v7542_v39  ;;  %v7633_v38 = vld [vmem:[%s11366_s1 + $0x308] ss:$16 sps:$4 sm:$0xff]   ;;  %v7638_v39 = vld [vmem:[%s11366_s1 + $0x324] ss:$16 sps:$4 sm:$0xff]  }
  0x28   :  { %5015 = vmatprep.subr.bf16.mxu0 %v7543_v40  ;;  %5574 = vmatprep.subr.bf16.mxu1 %v7545_v41  ;;  %v7641_v40 = vld [vmem:[%s11366_s1 + $0x32c] ss:$16 sps:$4 sm:$0xff]   ;;  %v7636_v41 = vld [vmem:[%s11366_s1 + $0x320] ss:$16 sps:$4 sm:$0xff]  }
  0x2b   :  { %5016 = vmatpush1.bf16.msra.mxu0 %v7547_v42  ;;  %5575 = vmatpush1.bf16.msra.mxu1 %v7548_v43  ;;  %v7639_v42 = vld [vmem:[%s11366_s1 + $0x328] ss:$16 sps:$4 sm:$0xff]   ;;  %v7644_v43 = vld [vmem:[%s11366_s1 + $0x344] ss:$16 sps:$4 sm:$0xff]  }
  0x2c   :  { %5017 = vmatprep.subr.bf16.mxu0 %v7549_v44  ;;  %5576 = vmatprep.subr.bf16.mxu1 %v7551_v45  ;;  %v7647_v44 = vld [vmem:[%s11366_s1 + $0x34c] ss:$16 sps:$4 sm:$0xff]   ;;  %v7642_v45 = vld [vmem:[%s11366_s1 + $0x340] ss:$16 sps:$4 sm:$0xff]  }
  0x2f   :  { %5018 = vmatpush1.bf16.msra.mxu0 %v7553_v46  ;;  %5577 = vmatpush1.bf16.msra.mxu1 %v7554_v47  ;;  %v7645_v46 = vld [vmem:[%s11366_s1 + $0x348] ss:$16 sps:$4 sm:$0xff]   ;;  %v7650_v47 = vld [vmem:[%s11366_s1 + $0x364] ss:$16 sps:$4 sm:$0xff]  }
  0x30   :  { %5019 = vmatprep.subr.bf16.mxu0 %v7555_v49  ;;  %5578 = vmatprep.subr.bf16.mxu1 %v7557_v50  ;;  %v7648_v49 = vld [vmem:[%s11366_s1 + $0x360] ss:$16 sps:$4 sm:$0xff]   ;;  %v7651_v50 = vld [vmem:[%s11366_s1 + $0x368] ss:$16 sps:$4 sm:$0xff]  }
  0x33   :  { %5020 = vmatpush1.bf16.msra.mxu0 %v7559_v51  ;;  %5579 = vmatpush1.bf16.msra.mxu1 %v7560_v52  ;;  %v7656_v51 = vld [vmem:[%s11366_s1 + $0x384] ss:$16 sps:$4 sm:$0xff]   ;;  %v7659_v52 = vld [vmem:[%s11366_s1 + $0x38c] ss:$16 sps:$4 sm:$0xff]  }
  0x34   :  { %5021 = vmatprep.subr.bf16.mxu0 %v7561_v53  ;;  %5580 = vmatprep.subr.bf16.mxu1 %v7563_v54  ;;  %v7654_v53 = vld [vmem:[%s11366_s1 + $0x380] ss:$16 sps:$4 sm:$0xff]   ;;  %v7657_v54 = vld [vmem:[%s11366_s1 + $0x388] ss:$16 sps:$4 sm:$0xff]  }
  0x37   :  { %5022 = vmatpush1.bf16.msra.mxu0 %v7565_v55  ;;  %5581 = vmatpush1.bf16.msra.mxu1 %v7566_v56  ;;  %v7662_v55 = vld [vmem:[%s11366_s1 + $0x3a4] ss:$16 sps:$4 sm:$0xff]   ;;  %v7665_v56 = vld [vmem:[%s11366_s1 + $0x3ac] ss:$16 sps:$4 sm:$0xff]  }
  0x38   :  { %5023 = vmatprep.subr.bf16.mxu0 %v7567_v57  ;;  %5582 = vmatprep.subr.bf16.mxu1 %v7569_v58  ;;  %v7660_v57 = vld [vmem:[%s11366_s1 + $0x3a0] ss:$16 sps:$4 sm:$0xff]   ;;  %v7663_v58 = vld [vmem:[%s11366_s1 + $0x3a8] ss:$16 sps:$4 sm:$0xff]  }
  0x3b   :  { %5024 = vmatpush1.bf16.msra.mxu0 %v7571_v59  ;;  %5583 = vmatpush1.bf16.msra.mxu1 %v7572_v60  ;;  %v7668_v59 = vld [vmem:[%s11366_s1 + $0x3c4] ss:$16 sps:$4 sm:$0xff]   ;;  %v7671_v60 = vld [vmem:[%s11366_s1 + $0x3cc] ss:$16 sps:$4 sm:$0xff]  }
  0x3c   :  { %5025 = vmatprep.subr.bf16.mxu0 %v7573_v61  ;;  %5584 = vmatprep.subr.bf16.mxu1 %v7575_v62  ;;  %v7666_v61 = vld [vmem:[%s11366_s1 + $0x3c0] ss:$16 sps:$4 sm:$0xff]   ;;  %v7669_v62 = vld [vmem:[%s11366_s1 + $0x3c8] ss:$16 sps:$4 sm:$0xff]  }
  0x3f   :  { %5026 = vmatpush1.bf16.msra.mxu0 %v7577_v63  ;;  %5585 = vmatpush1.bf16.msra.mxu1 %v7578_v0  ;;  %v7674_v63 = vld [vmem:[%s11366_s1 + $0x3e4] ss:$16 sps:$4 sm:$0xff]   ;;  %v7677_v0 = vld [vmem:[%s11366_s1 + $0x3ec] ss:$16 sps:$4 sm:$0xff]  }
  0x40   :  { %5038 = vmatprep.subr.bf16.mxu0 %v7584_v1  ;;  %5597 = vmatprep.subr.bf16.mxu1 %v7587_v2  ;;  %v7672_v1 = vld [vmem:[%s11366_s1 + $0x3e0] ss:$16 sps:$4 sm:$0xff]   ;;  %v7675_v2 = vld [vmem:[%s11366_s1 + $0x3e8] ss:$16 sps:$4 sm:$0xff]  }
  0x42   :  { %5028 = vmatmul.mubr.bf16.vlgmr.msra.gmra.mrb[0].mxu0 %v7579_v3  ;;  %5587 = vmatmul.mubr.bf16.vlgmr.msra.gmra.mrb[0].mxu1 %v7579_v3  ;;  %v7683_v3 = vld [vmem:[%s11366_s1 + $0x404] ss:$16 sps:$4 sm:$0xff]  }
  0x43   :  { %5039 = vmatpush1.bf16.msra.mxu0 %v7582_v4  ;;  %5598 = vmatpush1.bf16.msra.mxu1 %v7585_v5  ;;  %v7686_v4 = vld [vmem:[%s11366_s1 + $0x40c] ss:$16 sps:$4 sm:$0xff]  }
  0x44   :  { %5040 = vmatprep.subr.bf16.mxu0 %v7590_v6  ;;  %5599 = vmatprep.subr.bf16.mxu1 %v7593_v7  ;;  %v7678_v5 = vld [vmem:[%s11367_s0 + $0x8] ss:$100 sps:$4 sm:$0xff]   ;;  %v7681_v6 = vld [vmem:[%s11366_s1 + $0x400] ss:$16 sps:$4 sm:$0xff]  }
  0x45   :  { %5070 = vmatprep.mubr.bf16.mxu0 %v7680_v30  ;;  %5629 = vmatprep.mubr.bf16.mxu1 %v7680_v30  ;;  %v7684_v7 = vld [vmem:[%s11366_s1 + $0x408] ss:$16 sps:$4 sm:$0xff]   ;;  %v7722_v30 = vld [vmem:[%s11366_s1 + $0x4cc] ss:$16 sps:$4 sm:$0xff]  }
  0x47   :  { %5041 = vmatpush1.bf16.msra.mxu0 %v7588_v8  ;;  %5600 = vmatpush1.bf16.msra.mxu1 %v7591_v9  ;;  %v7689_v8 = vld [vmem:[%s11366_s1 + $0x424] ss:$16 sps:$4 sm:$0xff]   ;;  %v7692_v9 = vld [vmem:[%s11366_s1 + $0x42c] ss:$16 sps:$4 sm:$0xff]  }
  0x48   :  { %5042 = vmatprep.subr.bf16.mxu0 %v7596_v10  ;;  %5601 = vmatprep.subr.bf16.mxu1 %v7599_v11  ;;  %v7687_v10 = vld [vmem:[%s11366_s1 + $0x420] ss:$16 sps:$4 sm:$0xff]   ;;  %v7690_v11 = vld [vmem:[%s11366_s1 + $0x428] ss:$16 sps:$4 sm:$0xff]  }
  0x4b   :  { %5043 = vmatpush1.bf16.msra.mxu0 %v7594_v12  ;;  %5602 = vmatpush1.bf16.msra.mxu1 %v7597_v13  ;;  %v7779_v12 = vld [vmem:[%s11367_s0 + $0x14] ss:$100 sps:$4 sm:$0xff]  }
  0x4c   :  { %5044 = vmatprep.subr.bf16.mxu0 %v7602_v14  ;;  %5603 = vmatprep.subr.bf16.mxu1 %v7605_v15  ;;  %v7695_v13 = vld [vmem:[%s11366_s1 + $0x444] ss:$16 sps:$4 sm:$0xff]   ;;  %v7698_v14 = vld [vmem:[%s11366_s1 + $0x44c] ss:$16 sps:$4 sm:$0xff]   ;;  %v7693_v15 = vld [vmem:[%s11366_s1 + $0x440] ss:$16 sps:$4 sm:$0xff]  }
  0x4f   :  { %5045 = vmatpush1.bf16.msra.mxu0 %v7600_v16  ;;  %5604 = vmatpush1.bf16.msra.mxu1 %v7603_v17  ;;  %v7696_v16 = vld [vmem:[%s11366_s1 + $0x448] ss:$16 sps:$4 sm:$0xff]   ;;  %v7701_v17 = vld [vmem:[%s11366_s1 + $0x464] ss:$16 sps:$4 sm:$0xff]  }
  0x50   :  { %5046 = vmatprep.subr.bf16.mxu0 %v7608_v18  ;;  %5605 = vmatprep.subr.bf16.mxu1 %v7611_v19  ;;  %v7704_v18 = vld [vmem:[%s11366_s1 + $0x46c] ss:$16 sps:$4 sm:$0xff]   ;;  %v7699_v19 = vld [vmem:[%s11366_s1 + $0x460] ss:$16 sps:$4 sm:$0xff]  }
  0x53   :  { %5047 = vmatpush1.bf16.msra.mxu0 %v7606_v20  ;;  %5606 = vmatpush1.bf16.msra.mxu1 %v7609_v21  ;;  %v7702_v20 = vld [vmem:[%s11366_s1 + $0x468] ss:$16 sps:$4 sm:$0xff]   ;;  %v7707_v21 = vld [vmem:[%s11366_s1 + $0x484] ss:$16 sps:$4 sm:$0xff]  }
  0x54   :  { %5048 = vmatprep.subr.bf16.mxu0 %v7614_v22  ;;  %5607 = vmatprep.subr.bf16.mxu1 %v7617_v23  ;;  %v7710_v22 = vld [vmem:[%s11366_s1 + $0x48c] ss:$16 sps:$4 sm:$0xff]   ;;  %v7705_v23 = vld [vmem:[%s11366_s1 + $0x480] ss:$16 sps:$4 sm:$0xff]  }
  0x57   :  { %5049 = vmatpush1.bf16.msra.mxu0 %v7612_v24  ;;  %5608 = vmatpush1.bf16.msra.mxu1 %v7615_v25  ;;  %v7708_v24 = vld [vmem:[%s11366_s1 + $0x488] ss:$16 sps:$4 sm:$0xff]   ;;  %v7713_v25 = vld [vmem:[%s11366_s1 + $0x4a4] ss:$16 sps:$4 sm:$0xff]  }
  0x58   :  { %5050 = vmatprep.subr.bf16.mxu0 %v7620_v26  ;;  %5609 = vmatprep.subr.bf16.mxu1 %v7623_v27  ;;  %v7716_v26 = vld [vmem:[%s11366_s1 + $0x4ac] ss:$16 sps:$4 sm:$0xff]   ;;  %v7711_v27 = vld [vmem:[%s11366_s1 + $0x4a0] ss:$16 sps:$4 sm:$0xff]  }
  0x5b   :  { %5051 = vmatpush1.bf16.msra.mxu0 %v7618_v28  ;;  %5610 = vmatpush1.bf16.msra.mxu1 %v7621_v29  ;;  %v7714_v28 = vld [vmem:[%s11366_s1 + $0x4a8] ss:$16 sps:$4 sm:$0xff]   ;;  %v7719_v29 = vld [vmem:[%s11366_s1 + $0x4c4] ss:$16 sps:$4 sm:$0xff]  }
  0x5c   :  { %5052 = vmatprep.subr.bf16.mxu0 %v7626_v31  ;;  %5611 = vmatprep.subr.bf16.mxu1 %v7629_v32  ;;  %v7717_v31 = vld [vmem:[%s11366_s1 + $0x4c0] ss:$16 sps:$4 sm:$0xff]   ;;  %v7720_v32 = vld [vmem:[%s11366_s1 + $0x4c8] ss:$16 sps:$4 sm:$0xff]  }
  0x5f   :  { %5053 = vmatpush1.bf16.msra.mxu0 %v7624_v33  ;;  %5612 = vmatpush1.bf16.msra.mxu1 %v7627_v34  ;;  %v7725_v33 = vld [vmem:[%s11366_s1 + $0x4e4] ss:$16 sps:$4 sm:$0xff]   ;;  %v7728_v34 = vld [vmem:[%s11366_s1 + $0x4ec] ss:$16 sps:$4 sm:$0xff]  }
  0x60   :  { %5054 = vmatprep.subr.bf16.mxu0 %v7632_v35  ;;  %5613 = vmatprep.subr.bf16.mxu1 %v7635_v36  ;;  %v7723_v35 = vld [vmem:[%s11366_s1 + $0x4e0] ss:$16 sps:$4 sm:$0xff]   ;;  %v7726_v36 = vld [vmem:[%s11366_s1 + $0x4e8] ss:$16 sps:$4 sm:$0xff]  }
  0x63   :  { %5055 = vmatpush1.bf16.msra.mxu0 %v7630_v37  ;;  %5614 = vmatpush1.bf16.msra.mxu1 %v7633_v38  ;;  %v7731_v37 = vld [vmem:[%s11366_s1 + $0x504] ss:$16 sps:$4 sm:$0xff]   ;;  %v7734_v38 = vld [vmem:[%s11366_s1 + $0x50c] ss:$16 sps:$4 sm:$0xff]  }
  0x64   :  { %5056 = vmatprep.subr.bf16.mxu0 %v7638_v39  ;;  %5615 = vmatprep.subr.bf16.mxu1 %v7641_v40  ;;  %v7729_v39 = vld [vmem:[%s11366_s1 + $0x500] ss:$16 sps:$4 sm:$0xff]   ;;  %v7732_v40 = vld [vmem:[%s11366_s1 + $0x508] ss:$16 sps:$4 sm:$0xff]  }
  0x67   :  { %5057 = vmatpush1.bf16.msra.mxu0 %v7636_v41  ;;  %5616 = vmatpush1.bf16.msra.mxu1 %v7639_v42  ;;  %v7737_v41 = vld [vmem:[%s11366_s1 + $0x524] ss:$16 sps:$4 sm:$0xff]   ;;  %v7740_v42 = vld [vmem:[%s11366_s1 + $0x52c] ss:$16 sps:$4 sm:$0xff]  }
  0x68   :  { %5058 = vmatprep.subr.bf16.mxu0 %v7644_v43  ;;  %5617 = vmatprep.subr.bf16.mxu1 %v7647_v44  ;;  %v7735_v43 = vld [vmem:[%s11366_s1 + $0x520] ss:$16 sps:$4 sm:$0xff]   ;;  %v7738_v44 = vld [vmem:[%s11366_s1 + $0x528] ss:$16 sps:$4 sm:$0xff]  }
  0x6b   :  { %5059 = vmatpush1.bf16.msra.mxu0 %v7642_v45  ;;  %5618 = vmatpush1.bf16.msra.mxu1 %v7645_v46  ;;  %v7743_v45 = vld [vmem:[%s11366_s1 + $0x544] ss:$16 sps:$4 sm:$0xff]   ;;  %v7746_v46 = vld [vmem:[%s11366_s1 + $0x54c] ss:$16 sps:$4 sm:$0xff]  }
  0x6c   :  { %5060 = vmatprep.subr.bf16.mxu0 %v7650_v47  ;;  %5619 = vmatprep.subr.bf16.mxu1 %v7653_v48  ;;  %v7741_v47 = vld [vmem:[%s11366_s1 + $0x540] ss:$16 sps:$4 sm:$0xff]   ;;  %v7744_v48 = vld [vmem:[%s11366_s1 + $0x548] ss:$16 sps:$4 sm:$0xff]  }
  0x6f   :  { %5061 = vmatpush1.bf16.msra.mxu0 %v7648_v49  ;;  %5620 = vmatpush1.bf16.msra.mxu1 %v7651_v50  ;;  %v7749_v49 = vld [vmem:[%s11366_s1 + $0x564] ss:$16 sps:$4 sm:$0xff]   ;;  %v7752_v50 = vld [vmem:[%s11366_s1 + $0x56c] ss:$16 sps:$4 sm:$0xff]  }
  0x70   :  { %5062 = vmatprep.subr.bf16.mxu0 %v7656_v51  ;;  %5621 = vmatprep.subr.bf16.mxu1 %v7659_v52  ;;  %v7747_v51 = vld [vmem:[%s11366_s1 + $0x560] ss:$16 sps:$4 sm:$0xff]   ;;  %v7750_v52 = vld [vmem:[%s11366_s1 + $0x568] ss:$16 sps:$4 sm:$0xff]  }
  0x73   :  { %5063 = vmatpush1.bf16.msra.mxu0 %v7654_v53  ;;  %5622 = vmatpush1.bf16.msra.mxu1 %v7657_v54  ;;  %v7755_v53 = vld [vmem:[%s11366_s1 + $0x584] ss:$16 sps:$4 sm:$0xff]   ;;  %v7758_v54 = vld [vmem:[%s11366_s1 + $0x58c] ss:$16 sps:$4 sm:$0xff]  }
  0x74   :  { %5064 = vmatprep.subr.bf16.mxu0 %v7662_v55  ;;  %5623 = vmatprep.subr.bf16.mxu1 %v7665_v56  ;;  %v7753_v55 = vld [vmem:[%s11366_s1 + $0x580] ss:$16 sps:$4 sm:$0xff]   ;;  %v7756_v56 = vld [vmem:[%s11366_s1 + $0x588] ss:$16 sps:$4 sm:$0xff]  }
  0x77   :  { %5065 = vmatpush1.bf16.msra.mxu0 %v7660_v57  ;;  %5624 = vmatpush1.bf16.msra.mxu1 %v7663_v58  ;;  %v7761_v57 = vld [vmem:[%s11366_s1 + $0x5a4] ss:$16 sps:$4 sm:$0xff]   ;;  %v7764_v58 = vld [vmem:[%s11366_s1 + $0x5ac] ss:$16 sps:$4 sm:$0xff]  }
  0x78   :  { %5066 = vmatprep.subr.bf16.mxu0 %v7668_v59  ;;  %5625 = vmatprep.subr.bf16.mxu1 %v7671_v60  ;;  %v7759_v59 = vld [vmem:[%s11366_s1 + $0x5a0] ss:$16 sps:$4 sm:$0xff]   ;;  %v7762_v60 = vld [vmem:[%s11366_s1 + $0x5a8] ss:$16 sps:$4 sm:$0xff]  }
  0x7b   :  { %5067 = vmatpush1.bf16.msra.mxu0 %v7666_v61  ;;  %5626 = vmatpush1.bf16.msra.mxu1 %v7669_v62  ;;  %v7767_v61 = vld [vmem:[%s11366_s1 + $0x5c4] ss:$16 sps:$4 sm:$0xff]   ;;  %v7770_v62 = vld [vmem:[%s11366_s1 + $0x5cc] ss:$16 sps:$4 sm:$0xff]  }
  0x7c   :  { %5068 = vmatprep.subr.bf16.mxu0 %v7674_v63  ;;  %5627 = vmatprep.subr.bf16.mxu1 %v7677_v0  ;;  %v7765_v63 = vld [vmem:[%s11366_s1 + $0x5c0] ss:$16 sps:$4 sm:$0xff]   ;;  %v7768_v0 = vld [vmem:[%s11366_s1 + $0x5c8] ss:$16 sps:$4 sm:$0xff]  }
  0x7f   :  { %5069 = vmatpush1.bf16.msra.mxu0 %v7672_v1  ;;  %5628 = vmatpush1.bf16.msra.mxu1 %v7675_v2  ;;  %v7773_v1 = vld [vmem:[%s11366_s1 + $0x5e4] ss:$16 sps:$4 sm:$0xff]   ;;  %v7776_v2 = vld [vmem:[%s11366_s1 + $0x5ec] ss:$16 sps:$4 sm:$0xff]  }
  0x80   :  { %5081 = vmatprep.subr.bf16.mxu0 %v7683_v3  ;;  %5640 = vmatprep.subr.bf16.mxu1 %v7686_v4  ;;  %v7771_v3 = vld [vmem:[%s11366_s1 + $0x5e0] ss:$16 sps:$4 sm:$0xff]   ;;  %v7774_v4 = vld [vmem:[%s11366_s1 + $0x5e8] ss:$16 sps:$4 sm:$0xff]  }
  0x82   :  { %5071 = vmatmul.mubr.bf16.vlgmr.msra.gmra.mrb[0].mxu0 %v7678_v5  ;;  %5630 = vmatmul.mubr.bf16.vlgmr.msra.gmra.mrb[0].mxu1 %v7678_v5  ;;  %v7782_v5 = vld [vmem:[%s11366_s1 + $0x604] ss:$16 sps:$4 sm:$0xff]  }
  0x83   :  { %5082 = vmatpush1.bf16.msra.mxu0 %v7681_v6  ;;  %5641 = vmatpush1.bf16.msra.mxu1 %v7684_v7  ;;  %v7785_v6 = vld [vmem:[%s11366_s1 + $0x60c] ss:$16 sps:$4 sm:$0xff]   ;;  %v7777_v7 = vld [vmem:[%s11367_s0 + $0x10] ss:$100 sps:$4 sm:$0xff]  }
  0x84   :  { %5083 = vmatprep.subr.bf16.mxu0 %v7689_v8  ;;  %5642 = vmatprep.subr.bf16.mxu1 %v7692_v9  ;;  %v7780_v8 = vld [vmem:[%s11366_s1 + $0x600] ss:$16 sps:$4 sm:$0xff]   ;;  %v7783_v9 = vld [vmem:[%s11366_s1 + $0x608] ss:$16 sps:$4 sm:$0xff]  }
  0x85   :  { %5113 = vmatprep.mubr.bf16.mxu0 %v7779_v12  ;;  %5672 = vmatprep.mubr.bf16.mxu1 %v7779_v12  ;;  %v7878_v12 = vld [vmem:[%s11367_s0 + $0x1c] ss:$100 sps:$4 sm:$0xff]  }
  0x87   :  { %5084 = vmatpush1.bf16.msra.mxu0 %v7687_v10  ;;  %5643 = vmatpush1.bf16.msra.mxu1 %v7690_v11  ;;  %v7788_v10 = vld [vmem:[%s11366_s1 + $0x624] ss:$16 sps:$4 sm:$0xff]   ;;  %v7791_v11 = vld [vmem:[%s11366_s1 + $0x62c] ss:$16 sps:$4 sm:$0xff]  }
  0x88   :  { %5085 = vmatprep.subr.bf16.mxu0 %v7695_v13  ;;  %5644 = vmatprep.subr.bf16.mxu1 %v7698_v14  ;;  %v7786_v13 = vld [vmem:[%s11366_s1 + $0x620] ss:$16 sps:$4 sm:$0xff]   ;;  %v7789_v14 = vld [vmem:[%s11366_s1 + $0x628] ss:$16 sps:$4 sm:$0xff]  }
  0x8b   :  { %5086 = vmatpush1.bf16.msra.mxu0 %v7693_v15  ;;  %5645 = vmatpush1.bf16.msra.mxu1 %v7696_v16  ;;  %v7794_v15 = vld [vmem:[%s11366_s1 + $0x644] ss:$16 sps:$4 sm:$0xff]   ;;  %v7797_v16 = vld [vmem:[%s11366_s1 + $0x64c] ss:$16 sps:$4 sm:$0xff]  }
  0x8c   :  { %5087 = vmatprep.subr.bf16.mxu0 %v7701_v17  ;;  %5646 = vmatprep.subr.bf16.mxu1 %v7704_v18  ;;  %v7792_v17 = vld [vmem:[%s11366_s1 + $0x640] ss:$16 sps:$4 sm:$0xff]   ;;  %v7795_v18 = vld [vmem:[%s11366_s1 + $0x648] ss:$16 sps:$4 sm:$0xff]  }
  0x8f   :  { %5088 = vmatpush1.bf16.msra.mxu0 %v7699_v19  ;;  %5647 = vmatpush1.bf16.msra.mxu1 %v7702_v20  ;;  %v7800_v19 = vld [vmem:[%s11366_s1 + $0x664] ss:$16 sps:$4 sm:$0xff]   ;;  %v7803_v20 = vld [vmem:[%s11366_s1 + $0x66c] ss:$16 sps:$4 sm:$0xff]  }
  0x90   :  { %5089 = vmatprep.subr.bf16.mxu0 %v7707_v21  ;;  %5648 = vmatprep.subr.bf16.mxu1 %v7710_v22  ;;  %v7798_v21 = vld [vmem:[%s11366_s1 + $0x660] ss:$16 sps:$4 sm:$0xff]   ;;  %v7801_v22 = vld [vmem:[%s11366_s1 + $0x668] ss:$16 sps:$4 sm:$0xff]  }
  0x93   :  { %5090 = vmatpush1.bf16.msra.mxu0 %v7705_v23  ;;  %5649 = vmatpush1.bf16.msra.mxu1 %v7708_v24  ;;  %v7806_v23 = vld [vmem:[%s11366_s1 + $0x684] ss:$16 sps:$4 sm:$0xff]   ;;  %v7809_v24 = vld [vmem:[%s11366_s1 + $0x68c] ss:$16 sps:$4 sm:$0xff]  }
  0x94   :  { %5091 = vmatprep.subr.bf16.mxu0 %v7713_v25  ;;  %5650 = vmatprep.subr.bf16.mxu1 %v7716_v26  ;;  %v7804_v25 = vld [vmem:[%s11366_s1 + $0x680] ss:$16 sps:$4 sm:$0xff]   ;;  %v7807_v26 = vld [vmem:[%s11366_s1 + $0x688] ss:$16 sps:$4 sm:$0xff]  }
  0x97   :  { %5092 = vmatpush1.bf16.msra.mxu0 %v7711_v27  ;;  %5651 = vmatpush1.bf16.msra.mxu1 %v7714_v28  ;;  %v7812_v27 = vld [vmem:[%s11366_s1 + $0x6a4] ss:$16 sps:$4 sm:$0xff]   ;;  %v7815_v28 = vld [vmem:[%s11366_s1 + $0x6ac] ss:$16 sps:$4 sm:$0xff]  }
  0x98   :  { %5093 = vmatprep.subr.bf16.mxu0 %v7719_v29  ;;  %5652 = vmatprep.subr.bf16.mxu1 %v7722_v30  ;;  %v7810_v29 = vld [vmem:[%s11366_s1 + $0x6a0] ss:$16 sps:$4 sm:$0xff]   ;;  %v7813_v30 = vld [vmem:[%s11366_s1 + $0x6a8] ss:$16 sps:$4 sm:$0xff]  }
  0x9b   :  { %5094 = vmatpush1.bf16.msra.mxu0 %v7717_v31  ;;  %5653 = vmatpush1.bf16.msra.mxu1 %v7720_v32  ;;  %v7818_v31 = vld [vmem:[%s11366_s1 + $0x6c4] ss:$16 sps:$4 sm:$0xff]   ;;  %v7821_v32 = vld [vmem:[%s11366_s1 + $0x6cc] ss:$16 sps:$4 sm:$0xff]  }
  0x9c   :  { %5095 = vmatprep.subr.bf16.mxu0 %v7725_v33  ;;  %5654 = vmatprep.subr.bf16.mxu1 %v7728_v34  ;;  %v7816_v33 = vld [vmem:[%s11366_s1 + $0x6c0] ss:$16 sps:$4 sm:$0xff]   ;;  %v7819_v34 = vld [vmem:[%s11366_s1 + $0x6c8] ss:$16 sps:$4 sm:$0xff]  }
  0x9f   :  { %5096 = vmatpush1.bf16.msra.mxu0 %v7723_v35  ;;  %5655 = vmatpush1.bf16.msra.mxu1 %v7726_v36  ;;  %v7824_v35 = vld [vmem:[%s11366_s1 + $0x6e4] ss:$16 sps:$4 sm:$0xff]   ;;  %v7827_v36 = vld [vmem:[%s11366_s1 + $0x6ec] ss:$16 sps:$4 sm:$0xff]  }
  0xa0   :  { %5097 = vmatprep.subr.bf16.mxu0 %v7731_v37  ;;  %5656 = vmatprep.subr.bf16.mxu1 %v7734_v38  ;;  %v7822_v37 = vld [vmem:[%s11366_s1 + $0x6e0] ss:$16 sps:$4 sm:$0xff]   ;;  %v7825_v38 = vld [vmem:[%s11366_s1 + $0x6e8] ss:$16 sps:$4 sm:$0xff]  }
  0xa3   :  { %5098 = vmatpush1.bf16.msra.mxu0 %v7729_v39  ;;  %5657 = vmatpush1.bf16.msra.mxu1 %v7732_v40  ;;  %v7830_v39 = vld [vmem:[%s11366_s1 + $0x704] ss:$16 sps:$4 sm:$0xff]   ;;  %v7833_v40 = vld [vmem:[%s11366_s1 + $0x70c] ss:$16 sps:$4 sm:$0xff]  }
  0xa4   :  { %5099 = vmatprep.subr.bf16.mxu0 %v7737_v41  ;;  %5658 = vmatprep.subr.bf16.mxu1 %v7740_v42  ;;  %v7828_v41 = vld [vmem:[%s11366_s1 + $0x700] ss:$16 sps:$4 sm:$0xff]   ;;  %v7831_v42 = vld [vmem:[%s11366_s1 + $0x708] ss:$16 sps:$4 sm:$0xff]  }
  0xa7   :  { %5100 = vmatpush1.bf16.msra.mxu0 %v7735_v43  ;;  %5659 = vmatpush1.bf16.msra.mxu1 %v7738_v44  ;;  %v7836_v43 = vld [vmem:[%s11366_s1 + $0x724] ss:$16 sps:$4 sm:$0xff]   ;;  %v7839_v44 = vld [vmem:[%s11366_s1 + $0x72c] ss:$16 sps:$4 sm:$0xff]  }
  0xa8   :  { %5101 = vmatprep.subr.bf16.mxu0 %v7743_v45  ;;  %5660 = vmatprep.subr.bf16.mxu1 %v7746_v46  ;;  %v7834_v45 = vld [vmem:[%s11366_s1 + $0x720] ss:$16 sps:$4 sm:$0xff]   ;;  %v7837_v46 = vld [vmem:[%s11366_s1 + $0x728] ss:$16 sps:$4 sm:$0xff]  }
  0xab   :  { %5102 = vmatpush1.bf16.msra.mxu0 %v7741_v47  ;;  %5661 = vmatpush1.bf16.msra.mxu1 %v7744_v48  ;;  %v7842_v47 = vld [vmem:[%s11366_s1 + $0x744] ss:$16 sps:$4 sm:$0xff]   ;;  %v7845_v48 = vld [vmem:[%s11366_s1 + $0x74c] ss:$16 sps:$4 sm:$0xff]  }
  0xac   :  { %5103 = vmatprep.subr.bf16.mxu0 %v7749_v49  ;;  %5662 = vmatprep.subr.bf16.mxu1 %v7752_v50  ;;  %v7840_v49 = vld [vmem:[%s11366_s1 + $0x740] ss:$16 sps:$4 sm:$0xff]   ;;  %v7843_v50 = vld [vmem:[%s11366_s1 + $0x748] ss:$16 sps:$4 sm:$0xff]  }
  0xaf   :  { %5104 = vmatpush1.bf16.msra.mxu0 %v7747_v51  ;;  %5663 = vmatpush1.bf16.msra.mxu1 %v7750_v52  ;;  %v7848_v51 = vld [vmem:[%s11366_s1 + $0x764] ss:$16 sps:$4 sm:$0xff]   ;;  %v7851_v52 = vld [vmem:[%s11366_s1 + $0x76c] ss:$16 sps:$4 sm:$0xff]  }
  0xb0   :  { %5105 = vmatprep.subr.bf16.mxu0 %v7755_v53  ;;  %5664 = vmatprep.subr.bf16.mxu1 %v7758_v54  ;;  %v7846_v53 = vld [vmem:[%s11366_s1 + $0x760] ss:$16 sps:$4 sm:$0xff]   ;;  %v7849_v54 = vld [vmem:[%s11366_s1 + $0x768] ss:$16 sps:$4 sm:$0xff]  }
  0xb3   :  { %5106 = vmatpush1.bf16.msra.mxu0 %v7753_v55  ;;  %5665 = vmatpush1.bf16.msra.mxu1 %v7756_v56  ;;  %v7854_v55 = vld [vmem:[%s11366_s1 + $0x784] ss:$16 sps:$4 sm:$0xff]   ;;  %v7857_v56 = vld [vmem:[%s11366_s1 + $0x78c] ss:$16 sps:$4 sm:$0xff]  }
  0xb4   :  { %5107 = vmatprep.subr.bf16.mxu0 %v7761_v57  ;;  %5666 = vmatprep.subr.bf16.mxu1 %v7764_v58  ;;  %v7852_v57 = vld [vmem:[%s11366_s1 + $0x780] ss:$16 sps:$4 sm:$0xff]   ;;  %v7855_v58 = vld [vmem:[%s11366_s1 + $0x788] ss:$16 sps:$4 sm:$0xff]  }
  0xb7   :  { %5108 = vmatpush1.bf16.msra.mxu0 %v7759_v59  ;;  %5667 = vmatpush1.bf16.msra.mxu1 %v7762_v60  ;;  %v7860_v59 = vld [vmem:[%s11366_s1 + $0x7a4] ss:$16 sps:$4 sm:$0xff]   ;;  %v7863_v60 = vld [vmem:[%s11366_s1 + $0x7ac] ss:$16 sps:$4 sm:$0xff]  }
  0xb8   :  { %5109 = vmatprep.subr.bf16.mxu0 %v7767_v61  ;;  %5668 = vmatprep.subr.bf16.mxu1 %v7770_v62  ;;  %v7858_v61 = vld [vmem:[%s11366_s1 + $0x7a0] ss:$16 sps:$4 sm:$0xff]   ;;  %v7861_v62 = vld [vmem:[%s11366_s1 + $0x7a8] ss:$16 sps:$4 sm:$0xff]  }
  0xbb   :  { %5110 = vmatpush1.bf16.msra.mxu0 %v7765_v63  ;;  %5669 = vmatpush1.bf16.msra.mxu1 %v7768_v0  ;;  %v7866_v63 = vld [vmem:[%s11366_s1 + $0x7c4] ss:$16 sps:$4 sm:$0xff]   ;;  %v7869_v0 = vld [vmem:[%s11366_s1 + $0x7cc] ss:$16 sps:$4 sm:$0xff]  }
  0xbc   :  { %5111 = vmatprep.subr.bf16.mxu0 %v7773_v1  ;;  %5670 = vmatprep.subr.bf16.mxu1 %v7776_v2  ;;  %v7864_v1 = vld [vmem:[%s11366_s1 + $0x7c0] ss:$16 sps:$4 sm:$0xff]   ;;  %v7867_v2 = vld [vmem:[%s11366_s1 + $0x7c8] ss:$16 sps:$4 sm:$0xff]  }
  0xbf   :  { %5112 = vmatpush1.bf16.msra.mxu0 %v7771_v3  ;;  %5671 = vmatpush1.bf16.msra.mxu1 %v7774_v4  ;;  %v7872_v3 = vld [vmem:[%s11366_s1 + $0x7e4] ss:$16 sps:$4 sm:$0xff]   ;;  %v7875_v4 = vld [vmem:[%s11366_s1 + $0x7ec] ss:$16 sps:$4 sm:$0xff]  }
  0xc0   :  { %5124 = vmatprep.subr.bf16.mxu0 %v7782_v5  ;;  %5683 = vmatprep.subr.bf16.mxu1 %v7785_v6  ;;  %v7870_v5 = vld [vmem:[%s11366_s1 + $0x7e0] ss:$16 sps:$4 sm:$0xff]   ;;  %v7873_v6 = vld [vmem:[%s11366_s1 + $0x7e8] ss:$16 sps:$4 sm:$0xff]  }
  0xc2   :  { %5114 = vmatmul.mubr.bf16.vlgmr.msra.gmra.mrb[0].mxu0 %v7777_v7  ;;  %5673 = vmatmul.mubr.bf16.vlgmr.msra.gmra.mrb[0].mxu1 %v7777_v7  ;;  %v7881_v7 = vld [vmem:[%s11366_s1 + $0x804] ss:$16 sps:$4 sm:$0xff]  }
  0xc3   :  { %5125 = vmatpush1.bf16.msra.mxu0 %v7780_v8  ;;  %5684 = vmatpush1.bf16.msra.mxu1 %v7783_v9  ;;  %v7884_v8 = vld [vmem:[%s11366_s1 + $0x80c] ss:$16 sps:$4 sm:$0xff]  }
  0xc4   :  { %5126 = vmatprep.subr.bf16.mxu0 %v7788_v10  ;;  %5685 = vmatprep.subr.bf16.mxu1 %v7791_v11  ;;  %v7876_v9 = vld [vmem:[%s11367_s0 + $0x18] ss:$100 sps:$4 sm:$0xff]   ;;  %v7879_v10 = vld [vmem:[%s11366_s1 + $0x800] ss:$16 sps:$4 sm:$0xff]  }
  0xc5   :  { %5156 = vmatprep.mubr.bf16.mxu0 %v7878_v12  ;;  %5715 = vmatprep.mubr.bf16.mxu1 %v7878_v12  ;;  %v7882_v11 = vld [vmem:[%s11366_s1 + $0x808] ss:$16 sps:$4 sm:$0xff]   ;;  %v7887_v12 = vld [vmem:[%s11366_s1 + $0x824] ss:$16 sps:$4 sm:$0xff]  }
  0xc7   :  { %5127 = vmatpush1.bf16.msra.mxu0 %v7786_v13  ;;  %5686 = vmatpush1.bf16.msra.mxu1 %v7789_v14  ;;  %v7890_v13 = vld [vmem:[%s11366_s1 + $0x82c] ss:$16 sps:$4 sm:$0xff]   ;;  %v7977_v14 = vld [vmem:[%s11367_s0 + $0x24] ss:$100 sps:$4 sm:$0xff]  }
  0xc8   :  { %5128 = vmatprep.subr.bf16.mxu0 %v7794_v15  ;;  %5687 = vmatprep.subr.bf16.mxu1 %v7797_v16  ;;  %v7885_v15 = vld [vmem:[%s11366_s1 + $0x820] ss:$16 sps:$4 sm:$0xff]   ;;  %v7888_v16 = vld [vmem:[%s11366_s1 + $0x828] ss:$16 sps:$4 sm:$0xff]  }
  0xcb   :  { %5129 = vmatpush1.bf16.msra.mxu0 %v7792_v17  ;;  %5688 = vmatpush1.bf16.msra.mxu1 %v7795_v18  ;;  %v7893_v17 = vld [vmem:[%s11366_s1 + $0x844] ss:$16 sps:$4 sm:$0xff]   ;;  %v7896_v18 = vld [vmem:[%s11366_s1 + $0x84c] ss:$16 sps:$4 sm:$0xff]  }
  0xcc   :  { %5130 = vmatprep.subr.bf16.mxu0 %v7800_v19  ;;  %5689 = vmatprep.subr.bf16.mxu1 %v7803_v20  ;;  %v7891_v19 = vld [vmem:[%s11366_s1 + $0x840] ss:$16 sps:$4 sm:$0xff]   ;;  %v7894_v20 = vld [vmem:[%s11366_s1 + $0x848] ss:$16 sps:$4 sm:$0xff]  }
  0xcf   :  { %5131 = vmatpush1.bf16.msra.mxu0 %v7798_v21  ;;  %5690 = vmatpush1.bf16.msra.mxu1 %v7801_v22  ;;  %v7899_v21 = vld [vmem:[%s11366_s1 + $0x864] ss:$16 sps:$4 sm:$0xff]   ;;  %v7902_v22 = vld [vmem:[%s11366_s1 + $0x86c] ss:$16 sps:$4 sm:$0xff]  }
  0xd0   :  { %5132 = vmatprep.subr.bf16.mxu0 %v7806_v23  ;;  %5691 = vmatprep.subr.bf16.mxu1 %v7809_v24  ;;  %v7897_v23 = vld [vmem:[%s11366_s1 + $0x860] ss:$16 sps:$4 sm:$0xff]   ;;  %v7900_v24 = vld [vmem:[%s11366_s1 + $0x868] ss:$16 sps:$4 sm:$0xff]  }
  0xd3   :  { %5133 = vmatpush1.bf16.msra.mxu0 %v7804_v25  ;;  %5692 = vmatpush1.bf16.msra.mxu1 %v7807_v26  ;;  %v7905_v25 = vld [vmem:[%s11366_s1 + $0x884] ss:$16 sps:$4 sm:$0xff]   ;;  %v7908_v26 = vld [vmem:[%s11366_s1 + $0x88c] ss:$16 sps:$4 sm:$0xff]  }
  0xd4   :  { %5134 = vmatprep.subr.bf16.mxu0 %v7812_v27  ;;  %5693 = vmatprep.subr.bf16.mxu1 %v7815_v28  ;;  %v7903_v27 = vld [vmem:[%s11366_s1 + $0x880] ss:$16 sps:$4 sm:$0xff]   ;;  %v7906_v28 = vld [vmem:[%s11366_s1 + $0x888] ss:$16 sps:$4 sm:$0xff]  }
  0xd7   :  { %5135 = vmatpush1.bf16.msra.mxu0 %v7810_v29  ;;  %5694 = vmatpush1.bf16.msra.mxu1 %v7813_v30  ;;  %v7911_v29 = vld [vmem:[%s11366_s1 + $0x8a4] ss:$16 sps:$4 sm:$0xff]   ;;  %v7914_v30 = vld [vmem:[%s11366_s1 + $0x8ac] ss:$16 sps:$4 sm:$0xff]  }
  0xd8   :  { %5136 = vmatprep.subr.bf16.mxu0 %v7818_v31  ;;  %5695 = vmatprep.subr.bf16.mxu1 %v7821_v32  ;;  %v7909_v31 = vld [vmem:[%s11366_s1 + $0x8a0] ss:$16 sps:$4 sm:$0xff]   ;;  %v7912_v32 = vld [vmem:[%s11366_s1 + $0x8a8] ss:$16 sps:$4 sm:$0xff]  }
  0xdb   :  { %5137 = vmatpush1.bf16.msra.mxu0 %v7816_v33  ;;  %5696 = vmatpush1.bf16.msra.mxu1 %v7819_v34  ;;  %v7917_v33 = vld [vmem:[%s11366_s1 + $0x8c4] ss:$16 sps:$4 sm:$0xff]   ;;  %v7920_v34 = vld [vmem:[%s11366_s1 + $0x8cc] ss:$16 sps:$4 sm:$0xff]  }
  0xdc   :  { %5138 = vmatprep.subr.bf16.mxu0 %v7824_v35  ;;  %5697 = vmatprep.subr.bf16.mxu1 %v7827_v36  ;;  %v7915_v35 = vld [vmem:[%s11366_s1 + $0x8c0] ss:$16 sps:$4 sm:$0xff]   ;;  %v7918_v36 = vld [vmem:[%s11366_s1 + $0x8c8] ss:$16 sps:$4 sm:$0xff]  }
  0xdf   :  { %5139 = vmatpush1.bf16.msra.mxu0 %v7822_v37  ;;  %5698 = vmatpush1.bf16.msra.mxu1 %v7825_v38  ;;  %v7923_v37 = vld [vmem:[%s11366_s1 + $0x8e4] ss:$16 sps:$4 sm:$0xff]   ;;  %v7926_v38 = vld [vmem:[%s11366_s1 + $0x8ec] ss:$16 sps:$4 sm:$0xff]  }
  0xe0   :  { %5140 = vmatprep.subr.bf16.mxu0 %v7830_v39  ;;  %5699 = vmatprep.subr.bf16.mxu1 %v7833_v40  ;;  %v7921_v39 = vld [vmem:[%s11366_s1 + $0x8e0] ss:$16 sps:$4 sm:$0xff]   ;;  %v7924_v40 = vld [vmem:[%s11366_s1 + $0x8e8] ss:$16 sps:$4 sm:$0xff]  }
  0xe3   :  { %5141 = vmatpush1.bf16.msra.mxu0 %v7828_v41  ;;  %5700 = vmatpush1.bf16.msra.mxu1 %v7831_v42  ;;  %v7929_v41 = vld [vmem:[%s11366_s1 + $0x904] ss:$16 sps:$4 sm:$0xff]   ;;  %v7932_v42 = vld [vmem:[%s11366_s1 + $0x90c] ss:$16 sps:$4 sm:$0xff]  }
  0xe4   :  { %5142 = vmatprep.subr.bf16.mxu0 %v7836_v43  ;;  %5701 = vmatprep.subr.bf16.mxu1 %v7839_v44  ;;  %v7927_v43 = vld [vmem:[%s11366_s1 + $0x900] ss:$16 sps:$4 sm:$0xff]   ;;  %v7930_v44 = vld [vmem:[%s11366_s1 + $0x908] ss:$16 sps:$4 sm:$0xff]  }
  0xe7   :  { %5143 = vmatpush1.bf16.msra.mxu0 %v7834_v45  ;;  %5702 = vmatpush1.bf16.msra.mxu1 %v7837_v46  ;;  %v7935_v45 = vld [vmem:[%s11366_s1 + $0x924] ss:$16 sps:$4 sm:$0xff]   ;;  %v7938_v46 = vld [vmem:[%s11366_s1 + $0x92c] ss:$16 sps:$4 sm:$0xff]  }
  0xe8   :  { %5144 = vmatprep.subr.bf16.mxu0 %v7842_v47  ;;  %5703 = vmatprep.subr.bf16.mxu1 %v7845_v48  ;;  %v7933_v47 = vld [vmem:[%s11366_s1 + $0x920] ss:$16 sps:$4 sm:$0xff]   ;;  %v7936_v48 = vld [vmem:[%s11366_s1 + $0x928] ss:$16 sps:$4 sm:$0xff]  }
  0xeb   :  { %5145 = vmatpush1.bf16.msra.mxu0 %v7840_v49  ;;  %5704 = vmatpush1.bf16.msra.mxu1 %v7843_v50  ;;  %v7941_v49 = vld [vmem:[%s11366_s1 + $0x944] ss:$16 sps:$4 sm:$0xff]   ;;  %v7944_v50 = vld [vmem:[%s11366_s1 + $0x94c] ss:$16 sps:$4 sm:$0xff]  }
  0xec   :  { %5146 = vmatprep.subr.bf16.mxu0 %v7848_v51  ;;  %5705 = vmatprep.subr.bf16.mxu1 %v7851_v52  ;;  %v7939_v51 = vld [vmem:[%s11366_s1 + $0x940] ss:$16 sps:$4 sm:$0xff]   ;;  %v7942_v52 = vld [vmem:[%s11366_s1 + $0x948] ss:$16 sps:$4 sm:$0xff]  }
  0xef   :  { %5147 = vmatpush1.bf16.msra.mxu0 %v7846_v53  ;;  %5706 = vmatpush1.bf16.msra.mxu1 %v7849_v54  ;;  %v7947_v53 = vld [vmem:[%s11366_s1 + $0x964] ss:$16 sps:$4 sm:$0xff]   ;;  %v7950_v54 = vld [vmem:[%s11366_s1 + $0x96c] ss:$16 sps:$4 sm:$0xff]  }
  0xf0   :  { %5148 = vmatprep.subr.bf16.mxu0 %v7854_v55  ;;  %5707 = vmatprep.subr.bf16.mxu1 %v7857_v56  ;;  %v7945_v55 = vld [vmem:[%s11366_s1 + $0x960] ss:$16 sps:$4 sm:$0xff]   ;;  %v7948_v56 = vld [vmem:[%s11366_s1 + $0x968] ss:$16 sps:$4 sm:$0xff]  }
  0xf3   :  { %5149 = vmatpush1.bf16.msra.mxu0 %v7852_v57  ;;  %5708 = vmatpush1.bf16.msra.mxu1 %v7855_v58  ;;  %v7953_v57 = vld [vmem:[%s11366_s1 + $0x984] ss:$16 sps:$4 sm:$0xff]   ;;  %v7956_v58 = vld [vmem:[%s11366_s1 + $0x98c] ss:$16 sps:$4 sm:$0xff]  }
  0xf4   :  { %5150 = vmatprep.subr.bf16.mxu0 %v7860_v59  ;;  %5709 = vmatprep.subr.bf16.mxu1 %v7863_v60  ;;  %v7951_v59 = vld [vmem:[%s11366_s1 + $0x980] ss:$16 sps:$4 sm:$0xff]   ;;  %v7954_v60 = vld [vmem:[%s11366_s1 + $0x988] ss:$16 sps:$4 sm:$0xff]  }
  0xf7   :  { %5151 = vmatpush1.bf16.msra.mxu0 %v7858_v61  ;;  %5710 = vmatpush1.bf16.msra.mxu1 %v7861_v62  ;;  %v7959_v61 = vld [vmem:[%s11366_s1 + $0x9a4] ss:$16 sps:$4 sm:$0xff]   ;;  %v7962_v62 = vld [vmem:[%s11366_s1 + $0x9ac] ss:$16 sps:$4 sm:$0xff]  }
  0xf8   :  { %5152 = vmatprep.subr.bf16.mxu0 %v7866_v63  ;;  %5711 = vmatprep.subr.bf16.mxu1 %v7869_v0  ;;  %v7957_v63 = vld [vmem:[%s11366_s1 + $0x9a0] ss:$16 sps:$4 sm:$0xff]   ;;  %v7960_v0 = vld [vmem:[%s11366_s1 + $0x9a8] ss:$16 sps:$4 sm:$0xff]  }
  0xfb   :  { %5153 = vmatpush1.bf16.msra.mxu0 %v7864_v1  ;;  %5712 = vmatpush1.bf16.msra.mxu1 %v7867_v2  ;;  %v7965_v1 = vld [vmem:[%s11366_s1 + $0x9c4] ss:$16 sps:$4 sm:$0xff]   ;;  %v7968_v2 = vld [vmem:[%s11366_s1 + $0x9cc] ss:$16 sps:$4 sm:$0xff]  }
  0xfc   :  { %5154 = vmatprep.subr.bf16.mxu0 %v7872_v3  ;;  %5713 = vmatprep.subr.bf16.mxu1 %v7875_v4  ;;  %v7963_v3 = vld [vmem:[%s11366_s1 + $0x9c0] ss:$16 sps:$4 sm:$0xff]   ;;  %v7966_v4 = vld [vmem:[%s11366_s1 + $0x9c8] ss:$16 sps:$4 sm:$0xff]  }
  0xff   :  { %5155 = vmatpush1.bf16.msra.mxu0 %v7870_v5  ;;  %5714 = vmatpush1.bf16.msra.mxu1 %v7873_v6  ;;  %v7971_v5 = vld [vmem:[%s11366_s1 + $0x9e4] ss:$16 sps:$4 sm:$0xff]   ;;  %v7974_v6 = vld [vmem:[%s11366_s1 + $0x9ec] ss:$16 sps:$4 sm:$0xff]  }
 0x100   :  { %5167 = vmatprep.subr.bf16.mxu0 %v7881_v7  ;;  %5726 = vmatprep.subr.bf16.mxu1 %v7884_v8  ;;  %v7969_v7 = vld [vmem:[%s11366_s1 + $0x9e0] ss:$16 sps:$4 sm:$0xff]   ;;  %v7972_v8 = vld [vmem:[%s11366_s1 + $0x9e8] ss:$16 sps:$4 sm:$0xff]  }
 0x102   :  { %5157 = vmatmul.mubr.bf16.vlgmr.msra.gmra.mrb[0].mxu0 %v7876_v9  ;;  %5716 = vmatmul.mubr.bf16.vlgmr.msra.gmra.mrb[0].mxu1 %v7876_v9  ;;  %v7975_v9 = vld [vmem:[%s11367_s0 + $0x20] ss:$100 sps:$4 sm:$0xff]  }
 0x103   :  { %5168 = vmatpush1.bf16.msra.mxu0 %v7879_v10  ;;  %5727 = vmatpush1.bf16.msra.mxu1 %v7882_v11  ;;  %v7980_v10 = vld [vmem:[%s11366_s1 + $0xa04] ss:$16 sps:$4 sm:$0xff]   ;;  %v7983_v11 = vld [vmem:[%s11366_s1 + $0xa0c] ss:$16 sps:$4 sm:$0xff]  }
 0x104   :  { %5169 = vmatprep.subr.bf16.mxu0 %v7887_v12  ;;  %5728 = vmatprep.subr.bf16.mxu1 %v7890_v13  ;;  %v7978_v12 = vld [vmem:[%s11366_s1 + $0xa00] ss:$16 sps:$4 sm:$0xff]   ;;  %v7981_v13 = vld [vmem:[%s11366_s1 + $0xa08] ss:$16 sps:$4 sm:$0xff]  }
 0x105   :  { %5199 = vmatprep.mubr.bf16.mxu0 %v7977_v14  ;;  %5758 = vmatprep.mubr.bf16.mxu1 %v7977_v14  ;;  %v7986_v14 = vld [vmem:[%s11366_s1 + $0xa24] ss:$16 sps:$4 sm:$0xff]  }
 0x107   :  { %5170 = vmatpush1.bf16.msra.mxu0 %v7885_v15  ;;  %5729 = vmatpush1.bf16.msra.mxu1 %v7888_v16  ;;  %v7989_v15 = vld [vmem:[%s11366_s1 + $0xa2c] ss:$16 sps:$4 sm:$0xff]  }
 0x108   :  { %5171 = vmatprep.subr.bf16.mxu0 %v7893_v17  ;;  %5730 = vmatprep.subr.bf16.mxu1 %v7896_v18  ;;  %v8076_v16 = vld [vmem:[%s11367_s0 + $0x2c] ss:$100 sps:$4 sm:$0xff]   ;;  %v7987_v18 = vld [vmem:[%s11366_s1 + $0xa28] ss:$16 sps:$4 sm:$0xff]  }
 0x109   :  { %v7984_v17 = vld [vmem:[%s11366_s1 + $0xa20] ss:$16 sps:$4 sm:$0xff]  }
 0x10b   :  { %5172 = vmatpush1.bf16.msra.mxu0 %v7891_v19  ;;  %5731 = vmatpush1.bf16.msra.mxu1 %v7894_v20  ;;  %v7992_v19 = vld [vmem:[%s11366_s1 + $0xa44] ss:$16 sps:$4 sm:$0xff]   ;;  %v7995_v20 = vld [vmem:[%s11366_s1 + $0xa4c] ss:$16 sps:$4 sm:$0xff]  }
 0x10c   :  { %5173 = vmatprep.subr.bf16.mxu0 %v7899_v21  ;;  %5732 = vmatprep.subr.bf16.mxu1 %v7902_v22  ;;  %v7990_v21 = vld [vmem:[%s11366_s1 + $0xa40] ss:$16 sps:$4 sm:$0xff]   ;;  %v7993_v22 = vld [vmem:[%s11366_s1 + $0xa48] ss:$16 sps:$4 sm:$0xff]  }
 0x10f   :  { %5174 = vmatpush1.bf16.msra.mxu0 %v7897_v23  ;;  %5733 = vmatpush1.bf16.msra.mxu1 %v7900_v24  ;;  %v7998_v23 = vld [vmem:[%s11366_s1 + $0xa64] ss:$16 sps:$4 sm:$0xff]   ;;  %v8001_v24 = vld [vmem:[%s11366_s1 + $0xa6c] ss:$16 sps:$4 sm:$0xff]  }
 0x110   :  { %5175 = vmatprep.subr.bf16.mxu0 %v7905_v25  ;;  %5734 = vmatprep.subr.bf16.mxu1 %v7908_v26  ;;  %v7996_v25 = vld [vmem:[%s11366_s1 + $0xa60] ss:$16 sps:$4 sm:$0xff]   ;;  %v7999_v26 = vld [vmem:[%s11366_s1 + $0xa68] ss:$16 sps:$4 sm:$0xff]  }
 0x113   :  { %5176 = vmatpush1.bf16.msra.mxu0 %v7903_v27  ;;  %5735 = vmatpush1.bf16.msra.mxu1 %v7906_v28  ;;  %v8004_v27 = vld [vmem:[%s11366_s1 + $0xa84] ss:$16 sps:$4 sm:$0xff]   ;;  %v8007_v28 = vld [vmem:[%s11366_s1 + $0xa8c] ss:$16 sps:$4 sm:$0xff]  }
 0x114   :  { %5177 = vmatprep.subr.bf16.mxu0 %v7911_v29  ;;  %5736 = vmatprep.subr.bf16.mxu1 %v7914_v30  ;;  %v8002_v29 = vld [vmem:[%s11366_s1 + $0xa80] ss:$16 sps:$4 sm:$0xff]   ;;  %v8005_v30 = vld [vmem:[%s11366_s1 + $0xa88] ss:$16 sps:$4 sm:$0xff]  }
 0x117   :  { %5178 = vmatpush1.bf16.msra.mxu0 %v7909_v31  ;;  %5737 = vmatpush1.bf16.msra.mxu1 %v7912_v32  ;;  %v8010_v31 = vld [vmem:[%s11366_s1 + $0xaa4] ss:$16 sps:$4 sm:$0xff]   ;;  %v8013_v32 = vld [vmem:[%s11366_s1 + $0xaac] ss:$16 sps:$4 sm:$0xff]  }
 0x118   :  { %5179 = vmatprep.subr.bf16.mxu0 %v7917_v33  ;;  %5738 = vmatprep.subr.bf16.mxu1 %v7920_v34  ;;  %v8008_v33 = vld [vmem:[%s11366_s1 + $0xaa0] ss:$16 sps:$4 sm:$0xff]   ;;  %v8011_v34 = vld [vmem:[%s11366_s1 + $0xaa8] ss:$16 sps:$4 sm:$0xff]  }
 0x11b   :  { %5180 = vmatpush1.bf16.msra.mxu0 %v7915_v35  ;;  %5739 = vmatpush1.bf16.msra.mxu1 %v7918_v36  ;;  %v8016_v35 = vld [vmem:[%s11366_s1 + $0xac4] ss:$16 sps:$4 sm:$0xff]   ;;  %v8019_v36 = vld [vmem:[%s11366_s1 + $0xacc] ss:$16 sps:$4 sm:$0xff]  }
 0x11c   :  { %5181 = vmatprep.subr.bf16.mxu0 %v7923_v37  ;;  %5740 = vmatprep.subr.bf16.mxu1 %v7926_v38  ;;  %v8014_v37 = vld [vmem:[%s11366_s1 + $0xac0] ss:$16 sps:$4 sm:$0xff]   ;;  %v8017_v38 = vld [vmem:[%s11366_s1 + $0xac8] ss:$16 sps:$4 sm:$0xff]  }
 0x11f   :  { %5182 = vmatpush1.bf16.msra.mxu0 %v7921_v39  ;;  %5741 = vmatpush1.bf16.msra.mxu1 %v7924_v40  ;;  %v8022_v39 = vld [vmem:[%s11366_s1 + $0xae4] ss:$16 sps:$4 sm:$0xff]   ;;  %v8025_v40 = vld [vmem:[%s11366_s1 + $0xaec] ss:$16 sps:$4 sm:$0xff]  }
 0x120   :  { %5183 = vmatprep.subr.bf16.mxu0 %v7929_v41  ;;  %5742 = vmatprep.subr.bf16.mxu1 %v7932_v42  ;;  %v8020_v41 = vld [vmem:[%s11366_s1 + $0xae0] ss:$16 sps:$4 sm:$0xff]   ;;  %v8023_v42 = vld [vmem:[%s11366_s1 + $0xae8] ss:$16 sps:$4 sm:$0xff]  }
 0x123   :  { %5184 = vmatpush1.bf16.msra.mxu0 %v7927_v43  ;;  %5743 = vmatpush1.bf16.msra.mxu1 %v7930_v44  ;;  %v8028_v43 = vld [vmem:[%s11366_s1 + $0xb04] ss:$16 sps:$4 sm:$0xff]   ;;  %v8031_v44 = vld [vmem:[%s11366_s1 + $0xb0c] ss:$16 sps:$4 sm:$0xff]  }
 0x124   :  { %5185 = vmatprep.subr.bf16.mxu0 %v7935_v45  ;;  %5744 = vmatprep.subr.bf16.mxu1 %v7938_v46  ;;  %v8026_v45 = vld [vmem:[%s11366_s1 + $0xb00] ss:$16 sps:$4 sm:$0xff]   ;;  %v8029_v46 = vld [vmem:[%s11366_s1 + $0xb08] ss:$16 sps:$4 sm:$0xff]  }
 0x127   :  { %5186 = vmatpush1.bf16.msra.mxu0 %v7933_v47  ;;  %5745 = vmatpush1.bf16.msra.mxu1 %v7936_v48  ;;  %v8034_v47 = vld [vmem:[%s11366_s1 + $0xb24] ss:$16 sps:$4 sm:$0xff]   ;;  %v8037_v48 = vld [vmem:[%s11366_s1 + $0xb2c] ss:$16 sps:$4 sm:$0xff]  }
 0x128   :  { %5187 = vmatprep.subr.bf16.mxu0 %v7941_v49  ;;  %5746 = vmatprep.subr.bf16.mxu1 %v7944_v50  ;;  %v8032_v49 = vld [vmem:[%s11366_s1 + $0xb20] ss:$16 sps:$4 sm:$0xff]   ;;  %v8035_v50 = vld [vmem:[%s11366_s1 + $0xb28] ss:$16 sps:$4 sm:$0xff]  }
 0x12b   :  { %5188 = vmatpush1.bf16.msra.mxu0 %v7939_v51  ;;  %5747 = vmatpush1.bf16.msra.mxu1 %v7942_v52  ;;  %v8040_v51 = vld [vmem:[%s11366_s1 + $0xb44] ss:$16 sps:$4 sm:$0xff]   ;;  %v8043_v52 = vld [vmem:[%s11366_s1 + $0xb4c] ss:$16 sps:$4 sm:$0xff]  }
 0x12c   :  { %5189 = vmatprep.subr.bf16.mxu0 %v7947_v53  ;;  %5748 = vmatprep.subr.bf16.mxu1 %v7950_v54  ;;  %v8038_v53 = vld [vmem:[%s11366_s1 + $0xb40] ss:$16 sps:$4 sm:$0xff]   ;;  %v8041_v54 = vld [vmem:[%s11366_s1 + $0xb48] ss:$16 sps:$4 sm:$0xff]  }
 0x12f   :  { %5190 = vmatpush1.bf16.msra.mxu0 %v7945_v55  ;;  %5749 = vmatpush1.bf16.msra.mxu1 %v7948_v56  ;;  %v8046_v55 = vld [vmem:[%s11366_s1 + $0xb64] ss:$16 sps:$4 sm:$0xff]   ;;  %v8049_v56 = vld [vmem:[%s11366_s1 + $0xb6c] ss:$16 sps:$4 sm:$0xff]  }
 0x130   :  { %5191 = vmatprep.subr.bf16.mxu0 %v7953_v57  ;;  %5750 = vmatprep.subr.bf16.mxu1 %v7956_v58  ;;  %v8044_v57 = vld [vmem:[%s11366_s1 + $0xb60] ss:$16 sps:$4 sm:$0xff]   ;;  %v8047_v58 = vld [vmem:[%s11366_s1 + $0xb68] ss:$16 sps:$4 sm:$0xff]  }
 0x133   :  { %5192 = vmatpush1.bf16.msra.mxu0 %v7951_v59  ;;  %5751 = vmatpush1.bf16.msra.mxu1 %v7954_v60  ;;  %v8052_v59 = vld [vmem:[%s11366_s1 + $0xb84] ss:$16 sps:$4 sm:$0xff]   ;;  %v8055_v60 = vld [vmem:[%s11366_s1 + $0xb8c] ss:$16 sps:$4 sm:$0xff]  }
 0x134   :  { %5193 = vmatprep.subr.bf16.mxu0 %v7959_v61  ;;  %5752 = vmatprep.subr.bf16.mxu1 %v7962_v62  ;;  %v8050_v61 = vld [vmem:[%s11366_s1 + $0xb80] ss:$16 sps:$4 sm:$0xff]   ;;  %v8053_v62 = vld [vmem:[%s11366_s1 + $0xb88] ss:$16 sps:$4 sm:$0xff]  }
 0x137   :  { %5194 = vmatpush1.bf16.msra.mxu0 %v7957_v63  ;;  %5753 = vmatpush1.bf16.msra.mxu1 %v7960_v0  ;;  %v8058_v63 = vld [vmem:[%s11366_s1 + $0xba4] ss:$16 sps:$4 sm:$0xff]   ;;  %v8061_v0 = vld [vmem:[%s11366_s1 + $0xbac] ss:$16 sps:$4 sm:$0xff]  }
 0x138   :  { %5195 = vmatprep.subr.bf16.mxu0 %v7965_v1  ;;  %5754 = vmatprep.subr.bf16.mxu1 %v7968_v2  ;;  %v8056_v1 = vld [vmem:[%s11366_s1 + $0xba0] ss:$16 sps:$4 sm:$0xff]   ;;  %v8059_v2 = vld [vmem:[%s11366_s1 + $0xba8] ss:$16 sps:$4 sm:$0xff]  }
 0x13b   :  { %5196 = vmatpush1.bf16.msra.mxu0 %v7963_v3  ;;  %5755 = vmatpush1.bf16.msra.mxu1 %v7966_v4  ;;  %v8064_v3 = vld [vmem:[%s11366_s1 + $0xbc4] ss:$16 sps:$4 sm:$0xff]   ;;  %v8067_v4 = vld [vmem:[%s11366_s1 + $0xbcc] ss:$16 sps:$4 sm:$0xff]  }
 0x13c   :  { %5197 = vmatprep.subr.bf16.mxu0 %v7971_v5  ;;  %5756 = vmatprep.subr.bf16.mxu1 %v7974_v6  ;;  %v8062_v5 = vld [vmem:[%s11366_s1 + $0xbc0] ss:$16 sps:$4 sm:$0xff]   ;;  %v8065_v6 = vld [vmem:[%s11366_s1 + $0xbc8] ss:$16 sps:$4 sm:$0xff]  }
 0x13f   :  { %5198 = vmatpush1.bf16.msra.mxu0 %v7969_v7  ;;  %5757 = vmatpush1.bf16.msra.mxu1 %v7972_v8  ;;  %v8070_v7 = vld [vmem:[%s11366_s1 + $0xbe4] ss:$16 sps:$4 sm:$0xff]   ;;  %v8073_v8 = vld [vmem:[%s11366_s1 + $0xbec] ss:$16 sps:$4 sm:$0xff]  }
 0x140   :  { %5210 = vmatprep.subr.bf16.mxu0 %v7980_v10  ;;  %5769 = vmatprep.subr.bf16.mxu1 %v7983_v11  ;;  %v8071_v10 = vld [vmem:[%s11366_s1 + $0xbe8] ss:$16 sps:$4 sm:$0xff]  }
 0x141   :  { %v8074_v11 = vld [vmem:[%s11367_s0 + $0x28] ss:$100 sps:$4 sm:$0xff]  }
 0x142   :  { %5200 = vmatmul.mubr.bf16.vlgmr.msra.gmra.mrb[0].mxu0 %v7975_v9  ;;  %5759 = vmatmul.mubr.bf16.vlgmr.msra.gmra.mrb[0].mxu1 %v7975_v9  ;;  %v8068_v9 = vld [vmem:[%s11366_s1 + $0xbe0] ss:$16 sps:$4 sm:$0xff]  }
 0x143   :  { %5211 = vmatpush1.bf16.msra.mxu0 %v7978_v12  ;;  %5770 = vmatpush1.bf16.msra.mxu1 %v7981_v13  ;;  %v8079_v12 = vld [vmem:[%s11366_s1 + $0xc04] ss:$16 sps:$4 sm:$0xff]   ;;  %v8082_v13 = vld [vmem:[%s11366_s1 + $0xc0c] ss:$16 sps:$4 sm:$0xff]  }
 0x144   :  { %5212 = vmatprep.subr.bf16.mxu0 %v7986_v14  ;;  %5771 = vmatprep.subr.bf16.mxu1 %v7989_v15  ;;  %v8077_v14 = vld [vmem:[%s11366_s1 + $0xc00] ss:$16 sps:$4 sm:$0xff]   ;;  %v8080_v15 = vld [vmem:[%s11366_s1 + $0xc08] ss:$16 sps:$4 sm:$0xff]  }
 0x145   :  { %5242 = vmatprep.mubr.bf16.mxu0 %v8076_v16  ;;  %5801 = vmatprep.mubr.bf16.mxu1 %v8076_v16  ;;  %v8085_v16 = vld [vmem:[%s11366_s1 + $0xc24] ss:$16 sps:$4 sm:$0xff]  }
 0x147   :  { %5213 = vmatpush1.bf16.msra.mxu0 %v7984_v17  ;;  %5772 = vmatpush1.bf16.msra.mxu1 %v7987_v18  ;;  %v8088_v17 = vld [vmem:[%s11366_s1 + $0xc2c] ss:$16 sps:$4 sm:$0xff]   ;;  %v8175_v18 = vld [vmem:[%s11367_s0 + $0x34] ss:$100 sps:$4 sm:$0xff]  }
 0x148   :  { %5214 = vmatprep.subr.bf16.mxu0 %v7992_v19  ;;  %5773 = vmatprep.subr.bf16.mxu1 %v7995_v20  ;;  %v8083_v19 = vld [vmem:[%s11366_s1 + $0xc20] ss:$16 sps:$4 sm:$0xff]   ;;  %v8086_v20 = vld [vmem:[%s11366_s1 + $0xc28] ss:$16 sps:$4 sm:$0xff]  }
 0x14b   :  { %5215 = vmatpush1.bf16.msra.mxu0 %v7990_v21  ;;  %5774 = vmatpush1.bf16.msra.mxu1 %v7993_v22  ;;  %v8091_v21 = vld [vmem:[%s11366_s1 + $0xc44] ss:$16 sps:$4 sm:$0xff]   ;;  %v8094_v22 = vld [vmem:[%s11366_s1 + $0xc4c] ss:$16 sps:$4 sm:$0xff]  }
 0x14c   :  { %5216 = vmatprep.subr.bf16.mxu0 %v7998_v23  ;;  %5775 = vmatprep.subr.bf16.mxu1 %v8001_v24  ;;  %v8089_v23 = vld [vmem:[%s11366_s1 + $0xc40] ss:$16 sps:$4 sm:$0xff]   ;;  %v8092_v24 = vld [vmem:[%s11366_s1 + $0xc48] ss:$16 sps:$4 sm:$0xff]  }
 0x14f   :  { %5217 = vmatpush1.bf16.msra.mxu0 %v7996_v25  ;;  %5776 = vmatpush1.bf16.msra.mxu1 %v7999_v26  ;;  %v8097_v25 = vld [vmem:[%s11366_s1 + $0xc64] ss:$16 sps:$4 sm:$0xff]   ;;  %v8100_v26 = vld [vmem:[%s11366_s1 + $0xc6c] ss:$16 sps:$4 sm:$0xff]  }
 0x150   :  { %5218 = vmatprep.subr.bf16.mxu0 %v8004_v27  ;;  %5777 = vmatprep.subr.bf16.mxu1 %v8007_v28  ;;  %v8095_v27 = vld [vmem:[%s11366_s1 + $0xc60] ss:$16 sps:$4 sm:$0xff]   ;;  %v8098_v28 = vld [vmem:[%s11366_s1 + $0xc68] ss:$16 sps:$4 sm:$0xff]  }
 0x153   :  { %5219 = vmatpush1.bf16.msra.mxu0 %v8002_v29  ;;  %5778 = vmatpush1.bf16.msra.mxu1 %v8005_v30  ;;  %v8103_v29 = vld [vmem:[%s11366_s1 + $0xc84] ss:$16 sps:$4 sm:$0xff]   ;;  %v8106_v30 = vld [vmem:[%s11366_s1 + $0xc8c] ss:$16 sps:$4 sm:$0xff]  }
 0x154   :  { %5220 = vmatprep.subr.bf16.mxu0 %v8010_v31  ;;  %5779 = vmatprep.subr.bf16.mxu1 %v8013_v32  ;;  %v8101_v31 = vld [vmem:[%s11366_s1 + $0xc80] ss:$16 sps:$4 sm:$0xff]   ;;  %v8104_v32 = vld [vmem:[%s11366_s1 + $0xc88] ss:$16 sps:$4 sm:$0xff]  }
 0x157   :  { %5221 = vmatpush1.bf16.msra.mxu0 %v8008_v33  ;;  %5780 = vmatpush1.bf16.msra.mxu1 %v8011_v34  ;;  %v8109_v33 = vld [vmem:[%s11366_s1 + $0xca4] ss:$16 sps:$4 sm:$0xff]   ;;  %v8112_v34 = vld [vmem:[%s11366_s1 + $0xcac] ss:$16 sps:$4 sm:$0xff]  }
 0x158   :  { %5222 = vmatprep.subr.bf16.mxu0 %v8016_v35  ;;  %5781 = vmatprep.subr.bf16.mxu1 %v8019_v36  ;;  %v8107_v35 = vld [vmem:[%s11366_s1 + $0xca0] ss:$16 sps:$4 sm:$0xff]   ;;  %v8110_v36 = vld [vmem:[%s11366_s1 + $0xca8] ss:$16 sps:$4 sm:$0xff]  }
 0x15b   :  { %5223 = vmatpush1.bf16.msra.mxu0 %v8014_v37  ;;  %5782 = vmatpush1.bf16.msra.mxu1 %v8017_v38  ;;  %v8115_v37 = vld [vmem:[%s11366_s1 + $0xcc4] ss:$16 sps:$4 sm:$0xff]   ;;  %v8118_v38 = vld [vmem:[%s11366_s1 + $0xccc] ss:$16 sps:$4 sm:$0xff]  }
 0x15c   :  { %5224 = vmatprep.subr.bf16.mxu0 %v8022_v39  ;;  %5783 = vmatprep.subr.bf16.mxu1 %v8025_v40  ;;  %v8113_v39 = vld [vmem:[%s11366_s1 + $0xcc0] ss:$16 sps:$4 sm:$0xff]   ;;  %v8116_v40 = vld [vmem:[%s11366_s1 + $0xcc8] ss:$16 sps:$4 sm:$0xff]  }
 0x15f   :  { %5225 = vmatpush1.bf16.msra.mxu0 %v8020_v41  ;;  %5784 = vmatpush1.bf16.msra.mxu1 %v8023_v42  ;;  %v8121_v41 = vld [vmem:[%s11366_s1 + $0xce4] ss:$16 sps:$4 sm:$0xff]   ;;  %v8124_v42 = vld [vmem:[%s11366_s1 + $0xcec] ss:$16 sps:$4 sm:$0xff]  }
 0x160   :  { %5226 = vmatprep.subr.bf16.mxu0 %v8028_v43  ;;  %5785 = vmatprep.subr.bf16.mxu1 %v8031_v44  ;;  %v8119_v43 = vld [vmem:[%s11366_s1 + $0xce0] ss:$16 sps:$4 sm:$0xff]   ;;  %v8122_v44 = vld [vmem:[%s11366_s1 + $0xce8] ss:$16 sps:$4 sm:$0xff]  }
 0x163   :  { %5227 = vmatpush1.bf16.msra.mxu0 %v8026_v45  ;;  %5786 = vmatpush1.bf16.msra.mxu1 %v8029_v46  ;;  %v8127_v45 = vld [vmem:[%s11366_s1 + $0xd04] ss:$16 sps:$4 sm:$0xff]   ;;  %v8130_v46 = vld [vmem:[%s11366_s1 + $0xd0c] ss:$16 sps:$4 sm:$0xff]  }
 0x164   :  { %5228 = vmatprep.subr.bf16.mxu0 %v8034_v47  ;;  %5787 = vmatprep.subr.bf16.mxu1 %v8037_v48  ;;  %v8125_v47 = vld [vmem:[%s11366_s1 + $0xd00] ss:$16 sps:$4 sm:$0xff]   ;;  %v8128_v48 = vld [vmem:[%s11366_s1 + $0xd08] ss:$16 sps:$4 sm:$0xff]  }
 0x167   :  { %5229 = vmatpush1.bf16.msra.mxu0 %v8032_v49  ;;  %5788 = vmatpush1.bf16.msra.mxu1 %v8035_v50  ;;  %v8133_v49 = vld [vmem:[%s11366_s1 + $0xd24] ss:$16 sps:$4 sm:$0xff]   ;;  %v8136_v50 = vld [vmem:[%s11366_s1 + $0xd2c] ss:$16 sps:$4 sm:$0xff]  }
 0x168   :  { %5230 = vmatprep.subr.bf16.mxu0 %v8040_v51  ;;  %5789 = vmatprep.subr.bf16.mxu1 %v8043_v52  ;;  %v8131_v51 = vld [vmem:[%s11366_s1 + $0xd20] ss:$16 sps:$4 sm:$0xff]   ;;  %v8134_v52 = vld [vmem:[%s11366_s1 + $0xd28] ss:$16 sps:$4 sm:$0xff]  }
 0x16b   :  { %5231 = vmatpush1.bf16.msra.mxu0 %v8038_v53  ;;  %5790 = vmatpush1.bf16.msra.mxu1 %v8041_v54  ;;  %v8139_v53 = vld [vmem:[%s11366_s1 + $0xd44] ss:$16 sps:$4 sm:$0xff]   ;;  %v8142_v54 = vld [vmem:[%s11366_s1 + $0xd4c] ss:$16 sps:$4 sm:$0xff]  }
 0x16c   :  { %5232 = vmatprep.subr.bf16.mxu0 %v8046_v55  ;;  %5791 = vmatprep.subr.bf16.mxu1 %v8049_v56  ;;  %v8137_v55 = vld [vmem:[%s11366_s1 + $0xd40] ss:$16 sps:$4 sm:$0xff]   ;;  %v8140_v56 = vld [vmem:[%s11366_s1 + $0xd48] ss:$16 sps:$4 sm:$0xff]  }
 0x16f   :  { %5233 = vmatpush1.bf16.msra.mxu0 %v8044_v57  ;;  %5792 = vmatpush1.bf16.msra.mxu1 %v8047_v58  ;;  %v8145_v57 = vld [vmem:[%s11366_s1 + $0xd64] ss:$16 sps:$4 sm:$0xff]   ;;  %v8148_v58 = vld [vmem:[%s11366_s1 + $0xd6c] ss:$16 sps:$4 sm:$0xff]  }
 0x170   :  { %5234 = vmatprep.subr.bf16.mxu0 %v8052_v59  ;;  %5793 = vmatprep.subr.bf16.mxu1 %v8055_v60  ;;  %v8143_v59 = vld [vmem:[%s11366_s1 + $0xd60] ss:$16 sps:$4 sm:$0xff]   ;;  %v8146_v60 = vld [vmem:[%s11366_s1 + $0xd68] ss:$16 sps:$4 sm:$0xff]  }
 0x173   :  { %5235 = vmatpush1.bf16.msra.mxu0 %v8050_v61  ;;  %5794 = vmatpush1.bf16.msra.mxu1 %v8053_v62  ;;  %v8151_v61 = vld [vmem:[%s11366_s1 + $0xd84] ss:$16 sps:$4 sm:$0xff]   ;;  %v8154_v62 = vld [vmem:[%s11366_s1 + $0xd8c] ss:$16 sps:$4 sm:$0xff]  }
 0x174   :  { %5236 = vmatprep.subr.bf16.mxu0 %v8058_v63  ;;  %5795 = vmatprep.subr.bf16.mxu1 %v8061_v0  ;;  %v8149_v63 = vld [vmem:[%s11366_s1 + $0xd80] ss:$16 sps:$4 sm:$0xff]   ;;  %v8152_v0 = vld [vmem:[%s11366_s1 + $0xd88] ss:$16 sps:$4 sm:$0xff]  }
 0x177   :  { %5237 = vmatpush1.bf16.msra.mxu0 %v8056_v1  ;;  %5796 = vmatpush1.bf16.msra.mxu1 %v8059_v2  ;;  %v8157_v1 = vld [vmem:[%s11366_s1 + $0xda4] ss:$16 sps:$4 sm:$0xff]   ;;  %v8160_v2 = vld [vmem:[%s11366_s1 + $0xdac] ss:$16 sps:$4 sm:$0xff]  }
 0x178   :  { %5238 = vmatprep.subr.bf16.mxu0 %v8064_v3  ;;  %5797 = vmatprep.subr.bf16.mxu1 %v8067_v4  ;;  %v8155_v3 = vld [vmem:[%s11366_s1 + $0xda0] ss:$16 sps:$4 sm:$0xff]   ;;  %v8158_v4 = vld [vmem:[%s11366_s1 + $0xda8] ss:$16 sps:$4 sm:$0xff]  }
 0x17b   :  { %5239 = vmatpush1.bf16.msra.mxu0 %v8062_v5  ;;  %5798 = vmatpush1.bf16.msra.mxu1 %v8065_v6  ;;  %v8163_v5 = vld [vmem:[%s11366_s1 + $0xdc4] ss:$16 sps:$4 sm:$0xff]   ;;  %v8166_v6 = vld [vmem:[%s11366_s1 + $0xdcc] ss:$16 sps:$4 sm:$0xff]  }
 0x17c   :  { %5240 = vmatprep.subr.bf16.mxu0 %v8070_v7  ;;  %5799 = vmatprep.subr.bf16.mxu1 %v8073_v8  ;;  %v8161_v7 = vld [vmem:[%s11366_s1 + $0xdc0] ss:$16 sps:$4 sm:$0xff]   ;;  %v8164_v8 = vld [vmem:[%s11366_s1 + $0xdc8] ss:$16 sps:$4 sm:$0xff]  }
 0x17f   :  { %5241 = vmatpush1.bf16.msra.mxu0 %v8068_v9  ;;  %5800 = vmatpush1.bf16.msra.mxu1 %v8071_v10  ;;  %v8169_v9 = vld [vmem:[%s11366_s1 + $0xde4] ss:$16 sps:$4 sm:$0xff]   ;;  %v8172_v10 = vld [vmem:[%s11366_s1 + $0xdec] ss:$16 sps:$4 sm:$0xff]  }
 0x180   :  { %5253 = vmatprep.subr.bf16.mxu0 %v8079_v12  ;;  %5812 = vmatprep.subr.bf16.mxu1 %v8082_v13  ;;  %v8170_v12 = vld [vmem:[%s11366_s1 + $0xde8] ss:$16 sps:$4 sm:$0xff]   ;;  %v8173_v13 = vld [vmem:[%s11367_s0 + $0x30] ss:$100 sps:$4 sm:$0xff]  }
 0x182   :  { %5243 = vmatmul.mubr.bf16.vlgmr.msra.gmra.mrb[0].mxu0 %v8074_v11  ;;  %5802 = vmatmul.mubr.bf16.vlgmr.msra.gmra.mrb[0].mxu1 %v8074_v11  ;;  %v8167_v11 = vld [vmem:[%s11366_s1 + $0xde0] ss:$16 sps:$4 sm:$0xff]  }
 0x183   :  { %5254 = vmatpush1.bf16.msra.mxu0 %v8077_v14  ;;  %5813 = vmatpush1.bf16.msra.mxu1 %v8080_v15  ;;  %v8178_v14 = vld [vmem:[%s11366_s1 + $0xe04] ss:$16 sps:$4 sm:$0xff]   ;;  %v8181_v15 = vld [vmem:[%s11366_s1 + $0xe0c] ss:$16 sps:$4 sm:$0xff]  }
 0x184   :  { %5255 = vmatprep.subr.bf16.mxu0 %v8085_v16  ;;  %5814 = vmatprep.subr.bf16.mxu1 %v8088_v17  ;;  %v8176_v16 = vld [vmem:[%s11366_s1 + $0xe00] ss:$16 sps:$4 sm:$0xff]   ;;  %v8179_v17 = vld [vmem:[%s11366_s1 + $0xe08] ss:$16 sps:$4 sm:$0xff]  }
 0x185   :  { %5285 = vmatprep.mubr.bf16.mxu0 %v8175_v18  ;;  %5844 = vmatprep.mubr.bf16.mxu1 %v8175_v18  ;;  %v8184_v18 = vld [vmem:[%s11366_s1 + $0xe24] ss:$16 sps:$4 sm:$0xff]  }
 0x187   :  { %5256 = vmatpush1.bf16.msra.mxu0 %v8083_v19  ;;  %5815 = vmatpush1.bf16.msra.mxu1 %v8086_v20  ;;  %v8187_v19 = vld [vmem:[%s11366_s1 + $0xe2c] ss:$16 sps:$4 sm:$0xff]  }
 0x188   :  { %5257 = vmatprep.subr.bf16.mxu0 %v8091_v21  ;;  %5816 = vmatprep.subr.bf16.mxu1 %v8094_v22  ;;  %v8274_v20 = vld [vmem:[%s11367_s0 + $0x3c] ss:$100 sps:$4 sm:$0xff]   ;;  %v8185_v22 = vld [vmem:[%s11366_s1 + $0xe28] ss:$16 sps:$4 sm:$0xff]  }
 0x189   :  { %v8182_v21 = vld [vmem:[%s11366_s1 + $0xe20] ss:$16 sps:$4 sm:$0xff]  }
 0x18b   :  { %5258 = vmatpush1.bf16.msra.mxu0 %v8089_v23  ;;  %5817 = vmatpush1.bf16.msra.mxu1 %v8092_v24  ;;  %v8190_v23 = vld [vmem:[%s11366_s1 + $0xe44] ss:$16 sps:$4 sm:$0xff]   ;;  %v8193_v24 = vld [vmem:[%s11366_s1 + $0xe4c] ss:$16 sps:$4 sm:$0xff]  }
 0x18c   :  { %5259 = vmatprep.subr.bf16.mxu0 %v8097_v25  ;;  %5818 = vmatprep.subr.bf16.mxu1 %v8100_v26  ;;  %v8188_v25 = vld [vmem:[%s11366_s1 + $0xe40] ss:$16 sps:$4 sm:$0xff]   ;;  %v8191_v26 = vld [vmem:[%s11366_s1 + $0xe48] ss:$16 sps:$4 sm:$0xff]  }
 0x18f   :  { %5260 = vmatpush1.bf16.msra.mxu0 %v8095_v27  ;;  %5819 = vmatpush1.bf16.msra.mxu1 %v8098_v28  ;;  %v8196_v27 = vld [vmem:[%s11366_s1 + $0xe64] ss:$16 sps:$4 sm:$0xff]   ;;  %v8199_v28 = vld [vmem:[%s11366_s1 + $0xe6c] ss:$16 sps:$4 sm:$0xff]  }
 0x190   :  { %5261 = vmatprep.subr.bf16.mxu0 %v8103_v29  ;;  %5820 = vmatprep.subr.bf16.mxu1 %v8106_v30  ;;  %v8194_v29 = vld [vmem:[%s11366_s1 + $0xe60] ss:$16 sps:$4 sm:$0xff]   ;;  %v8197_v30 = vld [vmem:[%s11366_s1 + $0xe68] ss:$16 sps:$4 sm:$0xff]  }
 0x193   :  { %5262 = vmatpush1.bf16.msra.mxu0 %v8101_v31  ;;  %5821 = vmatpush1.bf16.msra.mxu1 %v8104_v32  ;;  %v8202_v31 = vld [vmem:[%s11366_s1 + $0xe84] ss:$16 sps:$4 sm:$0xff]   ;;  %v8205_v32 = vld [vmem:[%s11366_s1 + $0xe8c] ss:$16 sps:$4 sm:$0xff]  }
 0x194   :  { %5263 = vmatprep.subr.bf16.mxu0 %v8109_v33  ;;  %5822 = vmatprep.subr.bf16.mxu1 %v8112_v34  ;;  %v8200_v33 = vld [vmem:[%s11366_s1 + $0xe80] ss:$16 sps:$4 sm:$0xff]   ;;  %v8203_v34 = vld [vmem:[%s11366_s1 + $0xe88] ss:$16 sps:$4 sm:$0xff]  }
 0x197   :  { %5264 = vmatpush1.bf16.msra.mxu0 %v8107_v35  ;;  %5823 = vmatpush1.bf16.msra.mxu1 %v8110_v36  ;;  %v8208_v35 = vld [vmem:[%s11366_s1 + $0xea4] ss:$16 sps:$4 sm:$0xff]   ;;  %v8211_v36 = vld [vmem:[%s11366_s1 + $0xeac] ss:$16 sps:$4 sm:$0xff]  }
 0x198   :  { %5265 = vmatprep.subr.bf16.mxu0 %v8115_v37  ;;  %5824 = vmatprep.subr.bf16.mxu1 %v8118_v38  ;;  %v8206_v37 = vld [vmem:[%s11366_s1 + $0xea0] ss:$16 sps:$4 sm:$0xff]   ;;  %v8209_v38 = vld [vmem:[%s11366_s1 + $0xea8] ss:$16 sps:$4 sm:$0xff]  }
 0x19b   :  { %5266 = vmatpush1.bf16.msra.mxu0 %v8113_v39  ;;  %5825 = vmatpush1.bf16.msra.mxu1 %v8116_v40  ;;  %v8214_v39 = vld [vmem:[%s11366_s1 + $0xec4] ss:$16 sps:$4 sm:$0xff]   ;;  %v8217_v40 = vld [vmem:[%s11366_s1 + $0xecc] ss:$16 sps:$4 sm:$0xff]  }
 0x19c   :  { %5267 = vmatprep.subr.bf16.mxu0 %v8121_v41  ;;  %5826 = vmatprep.subr.bf16.mxu1 %v8124_v42  ;;  %v8212_v41 = vld [vmem:[%s11366_s1 + $0xec0] ss:$16 sps:$4 sm:$0xff]   ;;  %v8215_v42 = vld [vmem:[%s11366_s1 + $0xec8] ss:$16 sps:$4 sm:$0xff]  }
 0x19f   :  { %5268 = vmatpush1.bf16.msra.mxu0 %v8119_v43  ;;  %5827 = vmatpush1.bf16.msra.mxu1 %v8122_v44  ;;  %v8220_v43 = vld [vmem:[%s11366_s1 + $0xee4] ss:$16 sps:$4 sm:$0xff]   ;;  %v8223_v44 = vld [vmem:[%s11366_s1 + $0xeec] ss:$16 sps:$4 sm:$0xff]  }
 0x1a0   :  { %5269 = vmatprep.subr.bf16.mxu0 %v8127_v45  ;;  %5828 = vmatprep.subr.bf16.mxu1 %v8130_v46  ;;  %v8218_v45 = vld [vmem:[%s11366_s1 + $0xee0] ss:$16 sps:$4 sm:$0xff]   ;;  %v8221_v46 = vld [vmem:[%s11366_s1 + $0xee8] ss:$16 sps:$4 sm:$0xff]  }
 0x1a3   :  { %5270 = vmatpush1.bf16.msra.mxu0 %v8125_v47  ;;  %5829 = vmatpush1.bf16.msra.mxu1 %v8128_v48  ;;  %v8226_v47 = vld [vmem:[%s11366_s1 + $0xf04] ss:$16 sps:$4 sm:$0xff]   ;;  %v8229_v48 = vld [vmem:[%s11366_s1 + $0xf0c] ss:$16 sps:$4 sm:$0xff]  }
 0x1a4   :  { %5271 = vmatprep.subr.bf16.mxu0 %v8133_v49  ;;  %5830 = vmatprep.subr.bf16.mxu1 %v8136_v50  ;;  %v8224_v49 = vld [vmem:[%s11366_s1 + $0xf00] ss:$16 sps:$4 sm:$0xff]   ;;  %v8227_v50 = vld [vmem:[%s11366_s1 + $0xf08] ss:$16 sps:$4 sm:$0xff]  }
 0x1a7   :  { %5272 = vmatpush1.bf16.msra.mxu0 %v8131_v51  ;;  %5831 = vmatpush1.bf16.msra.mxu1 %v8134_v52  ;;  %v8232_v51 = vld [vmem:[%s11366_s1 + $0xf24] ss:$16 sps:$4 sm:$0xff]   ;;  %v8235_v52 = vld [vmem:[%s11366_s1 + $0xf2c] ss:$16 sps:$4 sm:$0xff]  }
 0x1a8   :  { %5273 = vmatprep.subr.bf16.mxu0 %v8139_v53  ;;  %5832 = vmatprep.subr.bf16.mxu1 %v8142_v54  ;;  %v8230_v53 = vld [vmem:[%s11366_s1 + $0xf20] ss:$16 sps:$4 sm:$0xff]   ;;  %v8233_v54 = vld [vmem:[%s11366_s1 + $0xf28] ss:$16 sps:$4 sm:$0xff]  }
 0x1ab   :  { %5274 = vmatpush1.bf16.msra.mxu0 %v8137_v55  ;;  %5833 = vmatpush1.bf16.msra.mxu1 %v8140_v56  ;;  %v8238_v55 = vld [vmem:[%s11366_s1 + $0xf44] ss:$16 sps:$4 sm:$0xff]   ;;  %v8241_v56 = vld [vmem:[%s11366_s1 + $0xf4c] ss:$16 sps:$4 sm:$0xff]  }
 0x1ac   :  { %5275 = vmatprep.subr.bf16.mxu0 %v8145_v57  ;;  %5834 = vmatprep.subr.bf16.mxu1 %v8148_v58  ;;  %v8236_v57 = vld [vmem:[%s11366_s1 + $0xf40] ss:$16 sps:$4 sm:$0xff]   ;;  %v8239_v58 = vld [vmem:[%s11366_s1 + $0xf48] ss:$16 sps:$4 sm:$0xff]  }
 0x1af   :  { %5276 = vmatpush1.bf16.msra.mxu0 %v8143_v59  ;;  %5835 = vmatpush1.bf16.msra.mxu1 %v8146_v60  ;;  %v8244_v59 = vld [vmem:[%s11366_s1 + $0xf64] ss:$16 sps:$4 sm:$0xff]   ;;  %v8247_v60 = vld [vmem:[%s11366_s1 + $0xf6c] ss:$16 sps:$4 sm:$0xff]  }
 0x1b0   :  { %5277 = vmatprep.subr.bf16.mxu0 %v8151_v61  ;;  %5836 = vmatprep.subr.bf16.mxu1 %v8154_v62  ;;  %v8242_v61 = vld [vmem:[%s11366_s1 + $0xf60] ss:$16 sps:$4 sm:$0xff]   ;;  %v8245_v62 = vld [vmem:[%s11366_s1 + $0xf68] ss:$16 sps:$4 sm:$0xff]  }
 0x1b3   :  { %5278 = vmatpush1.bf16.msra.mxu0 %v8149_v63  ;;  %5837 = vmatpush1.bf16.msra.mxu1 %v8152_v0  ;;  %v8250_v63 = vld [vmem:[%s11366_s1 + $0xf84] ss:$16 sps:$4 sm:$0xff]   ;;  %v8253_v0 = vld [vmem:[%s11366_s1 + $0xf8c] ss:$16 sps:$4 sm:$0xff]  }
 0x1b4   :  { %5279 = vmatprep.subr.bf16.mxu0 %v8157_v1  ;;  %5838 = vmatprep.subr.bf16.mxu1 %v8160_v2  ;;  %v8248_v1 = vld [vmem:[%s11366_s1 + $0xf80] ss:$16 sps:$4 sm:$0xff]   ;;  %v8251_v2 = vld [vmem:[%s11366_s1 + $0xf88] ss:$16 sps:$4 sm:$0xff]  }
 0x1b7   :  { %5280 = vmatpush1.bf16.msra.mxu0 %v8155_v3  ;;  %5839 = vmatpush1.bf16.msra.mxu1 %v8158_v4  ;;  %v8256_v3 = vld [vmem:[%s11366_s1 + $0xfa4] ss:$16 sps:$4 sm:$0xff]   ;;  %v8259_v4 = vld [vmem:[%s11366_s1 + $0xfac] ss:$16 sps:$4 sm:$0xff]  }
 0x1b8   :  { %5281 = vmatprep.subr.bf16.mxu0 %v8163_v5  ;;  %5840 = vmatprep.subr.bf16.mxu1 %v8166_v6  ;;  %v8254_v5 = vld [vmem:[%s11366_s1 + $0xfa0] ss:$16 sps:$4 sm:$0xff]   ;;  %v8257_v6 = vld [vmem:[%s11366_s1 + $0xfa8] ss:$16 sps:$4 sm:$0xff]  }
 0x1bb   :  { %5282 = vmatpush1.bf16.msra.mxu0 %v8161_v7  ;;  %5841 = vmatpush1.bf16.msra.mxu1 %v8164_v8  ;;  %v8262_v7 = vld [vmem:[%s11366_s1 + $0xfc4] ss:$16 sps:$4 sm:$0xff]   ;;  %v8265_v8 = vld [vmem:[%s11366_s1 + $0xfcc] ss:$16 sps:$4 sm:$0xff]  }
 0x1bc   :  { %5283 = vmatprep.subr.bf16.mxu0 %v8169_v9  ;;  %5842 = vmatprep.subr.bf16.mxu1 %v8172_v10  ;;  %v8260_v9 = vld [vmem:[%s11366_s1 + $0xfc0] ss:$16 sps:$4 sm:$0xff]   ;;  %v8263_v10 = vld [vmem:[%s11366_s1 + $0xfc8] ss:$16 sps:$4 sm:$0xff]  }
 0x1bf   :  { %5284 = vmatpush1.bf16.msra.mxu0 %v8167_v11  ;;  %5843 = vmatpush1.bf16.msra.mxu1 %v8170_v12  ;;  %v8268_v11 = vld [vmem:[%s11366_s1 + $0xfe4] ss:$16 sps:$4 sm:$0xff]   ;;  %v8271_v12 = vld [vmem:[%s11366_s1 + $0xfec] ss:$16 sps:$4 sm:$0xff]  }
 0x1c0   :  { %5296 = vmatprep.subr.bf16.mxu0 %v8178_v14  ;;  %5855 = vmatprep.subr.bf16.mxu1 %v8181_v15  ;;  %v8269_v14 = vld [vmem:[%s11366_s1 + $0xfe8] ss:$16 sps:$4 sm:$0xff]   ;;  %v8277_v15 = vld [vmem:[%s11366_s1 + $0x1004] ss:$16 sps:$4 sm:$0xff]  }
 0x1c2   :  { %5286 = vmatmul.mubr.bf16.vlgmr.msra.gmra.mrb[0].mxu0 %v8173_v13  ;;  %5845 = vmatmul.mubr.bf16.vlgmr.msra.gmra.mrb[0].mxu1 %v8173_v13  ;;  %v8266_v13 = vld [vmem:[%s11366_s1 + $0xfe0] ss:$16 sps:$4 sm:$0xff]  }
 0x1c3   :  { %5297 = vmatpush1.bf16.msra.mxu0 %v8176_v16  ;;  %5856 = vmatpush1.bf16.msra.mxu1 %v8179_v17  ;;  %v8280_v16 = vld [vmem:[%s11366_s1 + $0x100c] ss:$16 sps:$4 sm:$0xff]  }
 0x1c4   :  { %5298 = vmatprep.subr.bf16.mxu0 %v8184_v18  ;;  %5857 = vmatprep.subr.bf16.mxu1 %v8187_v19  ;;  %v8272_v17 = vld [vmem:[%s11367_s0 + $0x38] ss:$100 sps:$4 sm:$0xff]   ;;  %v8275_v18 = vld [vmem:[%s11366_s1 + $0x1000] ss:$16 sps:$4 sm:$0xff]  }
 0x1c5   :  { %5328 = vmatprep.mubr.bf16.mxu0 %v8274_v20  ;;  %5887 = vmatprep.mubr.bf16.mxu1 %v8274_v20  ;;  %v8278_v19 = vld [vmem:[%s11366_s1 + $0x1008] ss:$16 sps:$4 sm:$0xff]   ;;  %v8283_v20 = vld [vmem:[%s11366_s1 + $0x1024] ss:$16 sps:$4 sm:$0xff]  }
 0x1c7   :  { %5299 = vmatpush1.bf16.msra.mxu0 %v8182_v21  ;;  %5858 = vmatpush1.bf16.msra.mxu1 %v8185_v22  ;;  %v8286_v21 = vld [vmem:[%s11366_s1 + $0x102c] ss:$16 sps:$4 sm:$0xff]   ;;  %v8373_v22 = vld [vmem:[%s11367_s0 + $0x44] ss:$100 sps:$4 sm:$0xff]  }
 0x1c8   :  { %5300 = vmatprep.subr.bf16.mxu0 %v8190_v23  ;;  %5859 = vmatprep.subr.bf16.mxu1 %v8193_v24  ;;  %v8281_v23 = vld [vmem:[%s11366_s1 + $0x1020] ss:$16 sps:$4 sm:$0xff]   ;;  %v8284_v24 = vld [vmem:[%s11366_s1 + $0x1028] ss:$16 sps:$4 sm:$0xff]  }
 0x1cb   :  { %5301 = vmatpush1.bf16.msra.mxu0 %v8188_v25  ;;  %5860 = vmatpush1.bf16.msra.mxu1 %v8191_v26  ;;  %v8289_v25 = vld [vmem:[%s11366_s1 + $0x1044] ss:$16 sps:$4 sm:$0xff]   ;;  %v8292_v26 = vld [vmem:[%s11366_s1 + $0x104c] ss:$16 sps:$4 sm:$0xff]  }
 0x1cc   :  { %5302 = vmatprep.subr.bf16.mxu0 %v8196_v27  ;;  %5861 = vmatprep.subr.bf16.mxu1 %v8199_v28  ;;  %v8287_v27 = vld [vmem:[%s11366_s1 + $0x1040] ss:$16 sps:$4 sm:$0xff]   ;;  %v8290_v28 = vld [vmem:[%s11366_s1 + $0x1048] ss:$16 sps:$4 sm:$0xff]  }
 0x1cf   :  { %5303 = vmatpush1.bf16.msra.mxu0 %v8194_v29  ;;  %5862 = vmatpush1.bf16.msra.mxu1 %v8197_v30  ;;  %v8295_v29 = vld [vmem:[%s11366_s1 + $0x1064] ss:$16 sps:$4 sm:$0xff]   ;;  %v8298_v30 = vld [vmem:[%s11366_s1 + $0x106c] ss:$16 sps:$4 sm:$0xff]  }
 0x1d0   :  { %5304 = vmatprep.subr.bf16.mxu0 %v8202_v31  ;;  %5863 = vmatprep.subr.bf16.mxu1 %v8205_v32  ;;  %v8293_v31 = vld [vmem:[%s11366_s1 + $0x1060] ss:$16 sps:$4 sm:$0xff]   ;;  %v8296_v32 = vld [vmem:[%s11366_s1 + $0x1068] ss:$16 sps:$4 sm:$0xff]  }
 0x1d3   :  { %5305 = vmatpush1.bf16.msra.mxu0 %v8200_v33  ;;  %5864 = vmatpush1.bf16.msra.mxu1 %v8203_v34  ;;  %v8301_v33 = vld [vmem:[%s11366_s1 + $0x1084] ss:$16 sps:$4 sm:$0xff]   ;;  %v8304_v34 = vld [vmem:[%s11366_s1 + $0x108c] ss:$16 sps:$4 sm:$0xff]  }
 0x1d4   :  { %5306 = vmatprep.subr.bf16.mxu0 %v8208_v35  ;;  %5865 = vmatprep.subr.bf16.mxu1 %v8211_v36  ;;  %v8299_v35 = vld [vmem:[%s11366_s1 + $0x1080] ss:$16 sps:$4 sm:$0xff]   ;;  %v8302_v36 = vld [vmem:[%s11366_s1 + $0x1088] ss:$16 sps:$4 sm:$0xff]  }
 0x1d7   :  { %5307 = vmatpush1.bf16.msra.mxu0 %v8206_v37  ;;  %5866 = vmatpush1.bf16.msra.mxu1 %v8209_v38  ;;  %v8307_v37 = vld [vmem:[%s11366_s1 + $0x10a4] ss:$16 sps:$4 sm:$0xff]   ;;  %v8310_v38 = vld [vmem:[%s11366_s1 + $0x10ac] ss:$16 sps:$4 sm:$0xff]  }
 0x1d8   :  { %5308 = vmatprep.subr.bf16.mxu0 %v8214_v39  ;;  %5867 = vmatprep.subr.bf16.mxu1 %v8217_v40  ;;  %v8305_v39 = vld [vmem:[%s11366_s1 + $0x10a0] ss:$16 sps:$4 sm:$0xff]   ;;  %v8308_v40 = vld [vmem:[%s11366_s1 + $0x10a8] ss:$16 sps:$4 sm:$0xff]  }
 0x1db   :  { %5309 = vmatpush1.bf16.msra.mxu0 %v8212_v41  ;;  %5868 = vmatpush1.bf16.msra.mxu1 %v8215_v42  ;;  %v8313_v41 = vld [vmem:[%s11366_s1 + $0x10c4] ss:$16 sps:$4 sm:$0xff]   ;;  %v8316_v42 = vld [vmem:[%s11366_s1 + $0x10cc] ss:$16 sps:$4 sm:$0xff]  }
 0x1dc   :  { %5310 = vmatprep.subr.bf16.mxu0 %v8220_v43  ;;  %5869 = vmatprep.subr.bf16.mxu1 %v8223_v44  ;;  %v8311_v43 = vld [vmem:[%s11366_s1 + $0x10c0] ss:$16 sps:$4 sm:$0xff]   ;;  %v8314_v44 = vld [vmem:[%s11366_s1 + $0x10c8] ss:$16 sps:$4 sm:$0xff]  }
 0x1df   :  { %5311 = vmatpush1.bf16.msra.mxu0 %v8218_v45  ;;  %5870 = vmatpush1.bf16.msra.mxu1 %v8221_v46  ;;  %v8319_v45 = vld [vmem:[%s11366_s1 + $0x10e4] ss:$16 sps:$4 sm:$0xff]   ;;  %v8322_v46 = vld [vmem:[%s11366_s1 + $0x10ec] ss:$16 sps:$4 sm:$0xff]  }
 0x1e0   :  { %5312 = vmatprep.subr.bf16.mxu0 %v8226_v47  ;;  %5871 = vmatprep.subr.bf16.mxu1 %v8229_v48  ;;  %v8317_v47 = vld [vmem:[%s11366_s1 + $0x10e0] ss:$16 sps:$4 sm:$0xff]   ;;  %v8320_v48 = vld [vmem:[%s11366_s1 + $0x10e8] ss:$16 sps:$4 sm:$0xff]  }
 0x1e3   :  { %5313 = vmatpush1.bf16.msra.mxu0 %v8224_v49  ;;  %5872 = vmatpush1.bf16.msra.mxu1 %v8227_v50  ;;  %v8325_v49 = vld [vmem:[%s11366_s1 + $0x1104] ss:$16 sps:$4 sm:$0xff]   ;;  %v8328_v50 = vld [vmem:[%s11366_s1 + $0x110c] ss:$16 sps:$4 sm:$0xff]  }
 0x1e4   :  { %5314 = vmatprep.subr.bf16.mxu0 %v8232_v51  ;;  %5873 = vmatprep.subr.bf16.mxu1 %v8235_v52  ;;  %v8323_v51 = vld [vmem:[%s11366_s1 + $0x1100] ss:$16 sps:$4 sm:$0xff]   ;;  %v8326_v52 = vld [vmem:[%s11366_s1 + $0x1108] ss:$16 sps:$4 sm:$0xff]  }
 0x1e7   :  { %5315 = vmatpush1.bf16.msra.mxu0 %v8230_v53  ;;  %5874 = vmatpush1.bf16.msra.mxu1 %v8233_v54  ;;  %v8331_v53 = vld [vmem:[%s11366_s1 + $0x1124] ss:$16 sps:$4 sm:$0xff]   ;;  %v8334_v54 = vld [vmem:[%s11366_s1 + $0x112c] ss:$16 sps:$4 sm:$0xff]  }
 0x1e8   :  { %5316 = vmatprep.subr.bf16.mxu0 %v8238_v55  ;;  %5875 = vmatprep.subr.bf16.mxu1 %v8241_v56  ;;  %v8329_v55 = vld [vmem:[%s11366_s1 + $0x1120] ss:$16 sps:$4 sm:$0xff]   ;;  %v8332_v56 = vld [vmem:[%s11366_s1 + $0x1128] ss:$16 sps:$4 sm:$0xff]  }
 0x1eb   :  { %5317 = vmatpush1.bf16.msra.mxu0 %v8236_v57  ;;  %5876 = vmatpush1.bf16.msra.mxu1 %v8239_v58  ;;  %v8337_v57 = vld [vmem:[%s11366_s1 + $0x1144] ss:$16 sps:$4 sm:$0xff]   ;;  %v8340_v58 = vld [vmem:[%s11366_s1 + $0x114c] ss:$16 sps:$4 sm:$0xff]  }
 0x1ec   :  { %5318 = vmatprep.subr.bf16.mxu0 %v8244_v59  ;;  %5877 = vmatprep.subr.bf16.mxu1 %v8247_v60  ;;  %v8335_v59 = vld [vmem:[%s11366_s1 + $0x1140] ss:$16 sps:$4 sm:$0xff]   ;;  %v8338_v60 = vld [vmem:[%s11366_s1 + $0x1148] ss:$16 sps:$4 sm:$0xff]  }
 0x1ef   :  { %5319 = vmatpush1.bf16.msra.mxu0 %v8242_v61  ;;  %5878 = vmatpush1.bf16.msra.mxu1 %v8245_v62  ;;  %v8343_v61 = vld [vmem:[%s11366_s1 + $0x1164] ss:$16 sps:$4 sm:$0xff]   ;;  %v8346_v62 = vld [vmem:[%s11366_s1 + $0x116c] ss:$16 sps:$4 sm:$0xff]  }
 0x1f0   :  { %5320 = vmatprep.subr.bf16.mxu0 %v8250_v63  ;;  %5879 = vmatprep.subr.bf16.mxu1 %v8253_v0  ;;  %v8341_v63 = vld [vmem:[%s11366_s1 + $0x1160] ss:$16 sps:$4 sm:$0xff]   ;;  %v8344_v0 = vld [vmem:[%s11366_s1 + $0x1168] ss:$16 sps:$4 sm:$0xff]  }
 0x1f3   :  { %5321 = vmatpush1.bf16.msra.mxu0 %v8248_v1  ;;  %5880 = vmatpush1.bf16.msra.mxu1 %v8251_v2  ;;  %v8349_v1 = vld [vmem:[%s11366_s1 + $0x1184] ss:$16 sps:$4 sm:$0xff]   ;;  %v8352_v2 = vld [vmem:[%s11366_s1 + $0x118c] ss:$16 sps:$4 sm:$0xff]  }
 0x1f4   :  { %5322 = vmatprep.subr.bf16.mxu0 %v8256_v3  ;;  %5881 = vmatprep.subr.bf16.mxu1 %v8259_v4  ;;  %v8347_v3 = vld [vmem:[%s11366_s1 + $0x1180] ss:$16 sps:$4 sm:$0xff]   ;;  %v8350_v4 = vld [vmem:[%s11366_s1 + $0x1188] ss:$16 sps:$4 sm:$0xff]  }
 0x1f7   :  { %5323 = vmatpush1.bf16.msra.mxu0 %v8254_v5  ;;  %5882 = vmatpush1.bf16.msra.mxu1 %v8257_v6  ;;  %v8355_v5 = vld [vmem:[%s11366_s1 + $0x11a4] ss:$16 sps:$4 sm:$0xff]   ;;  %v8358_v6 = vld [vmem:[%s11366_s1 + $0x11ac] ss:$16 sps:$4 sm:$0xff]  }
 0x1f8   :  { %5324 = vmatprep.subr.bf16.mxu0 %v8262_v7  ;;  %5883 = vmatprep.subr.bf16.mxu1 %v8265_v8  ;;  %v8353_v7 = vld [vmem:[%s11366_s1 + $0x11a0] ss:$16 sps:$4 sm:$0xff]   ;;  %v8356_v8 = vld [vmem:[%s11366_s1 + $0x11a8] ss:$16 sps:$4 sm:$0xff]  }
 0x1fb   :  { %5325 = vmatpush1.bf16.msra.mxu0 %v8260_v9  ;;  %5884 = vmatpush1.bf16.msra.mxu1 %v8263_v10  ;;  %v8361_v9 = vld [vmem:[%s11366_s1 + $0x11c4] ss:$16 sps:$4 sm:$0xff]   ;;  %v8364_v10 = vld [vmem:[%s11366_s1 + $0x11cc] ss:$16 sps:$4 sm:$0xff]  }
 0x1fc   :  { %5326 = vmatprep.subr.bf16.mxu0 %v8268_v11  ;;  %5885 = vmatprep.subr.bf16.mxu1 %v8271_v12  ;;  %v8359_v11 = vld [vmem:[%s11366_s1 + $0x11c0] ss:$16 sps:$4 sm:$0xff]   ;;  %v8362_v12 = vld [vmem:[%s11366_s1 + $0x11c8] ss:$16 sps:$4 sm:$0xff]  }
 0x1ff   :  { %5327 = vmatpush1.bf16.msra.mxu0 %v8266_v13  ;;  %5886 = vmatpush1.bf16.msra.mxu1 %v8269_v14  ;;  %v8367_v13 = vld [vmem:[%s11366_s1 + $0x11e4] ss:$16 sps:$4 sm:$0xff]   ;;  %v8370_v14 = vld [vmem:[%s11366_s1 + $0x11ec] ss:$16 sps:$4 sm:$0xff]  }
 0x200   :  { %5339 = vmatprep.subr.bf16.mxu0 %v8277_v15  ;;  %5898 = vmatprep.subr.bf16.mxu1 %v8280_v16  ;;  %v8365_v15 = vld [vmem:[%s11366_s1 + $0x11e0] ss:$16 sps:$4 sm:$0xff]   ;;  %v8368_v16 = vld [vmem:[%s11366_s1 + $0x11e8] ss:$16 sps:$4 sm:$0xff]  }
 0x202   :  { %5329 = vmatmul.mubr.bf16.vlgmr.msra.gmra.mrb[0].mxu0 %v8272_v17  ;;  %5888 = vmatmul.mubr.bf16.vlgmr.msra.gmra.mrb[0].mxu1 %v8272_v17  ;;  %v8376_v17 = vld [vmem:[%s11366_s1 + $0x1204] ss:$16 sps:$4 sm:$0xff]  }
 0x203   :  { %5340 = vmatpush1.bf16.msra.mxu0 %v8275_v18  ;;  %5899 = vmatpush1.bf16.msra.mxu1 %v8278_v19  ;;  %v8379_v18 = vld [vmem:[%s11366_s1 + $0x120c] ss:$16 sps:$4 sm:$0xff]   ;;  %v8371_v19 = vld [vmem:[%s11367_s0 + $0x40] ss:$100 sps:$4 sm:$0xff]  }
 0x204   :  { %5341 = vmatprep.subr.bf16.mxu0 %v8283_v20  ;;  %5900 = vmatprep.subr.bf16.mxu1 %v8286_v21  ;;  %v8374_v20 = vld [vmem:[%s11366_s1 + $0x1200] ss:$16 sps:$4 sm:$0xff]   ;;  %v8377_v21 = vld [vmem:[%s11366_s1 + $0x1208] ss:$16 sps:$4 sm:$0xff]  }
 0x205   :  { %5371 = vmatprep.mubr.bf16.mxu0 %v8373_v22  ;;  %5930 = vmatprep.mubr.bf16.mxu1 %v8373_v22  ;;  %v8382_v22 = vld [vmem:[%s11366_s1 + $0x1224] ss:$16 sps:$4 sm:$0xff]  }
 0x207   :  { %5342 = vmatpush1.bf16.msra.mxu0 %v8281_v23  ;;  %5901 = vmatpush1.bf16.msra.mxu1 %v8284_v24  ;;  %v8385_v23 = vld [vmem:[%s11366_s1 + $0x122c] ss:$16 sps:$4 sm:$0xff]  }
 0x208   :  { %5343 = vmatprep.subr.bf16.mxu0 %v8289_v25  ;;  %5902 = vmatprep.subr.bf16.mxu1 %v8292_v26  ;;  %v8472_v24 = vld [vmem:[%s11367_s0 + $0x4c] ss:$100 sps:$4 sm:$0xff]   ;;  %v8383_v26 = vld [vmem:[%s11366_s1 + $0x1228] ss:$16 sps:$4 sm:$0xff]  }
 0x209   :  { %v8380_v25 = vld [vmem:[%s11366_s1 + $0x1220] ss:$16 sps:$4 sm:$0xff]  }
 0x20b   :  { %5344 = vmatpush1.bf16.msra.mxu0 %v8287_v27  ;;  %5903 = vmatpush1.bf16.msra.mxu1 %v8290_v28  ;;  %v8388_v27 = vld [vmem:[%s11366_s1 + $0x1244] ss:$16 sps:$4 sm:$0xff]   ;;  %v8391_v28 = vld [vmem:[%s11366_s1 + $0x124c] ss:$16 sps:$4 sm:$0xff]  }
 0x20c   :  { %5345 = vmatprep.subr.bf16.mxu0 %v8295_v29  ;;  %5904 = vmatprep.subr.bf16.mxu1 %v8298_v30  ;;  %v8386_v29 = vld [vmem:[%s11366_s1 + $0x1240] ss:$16 sps:$4 sm:$0xff]   ;;  %v8389_v30 = vld [vmem:[%s11366_s1 + $0x1248] ss:$16 sps:$4 sm:$0xff]  }
 0x20f   :  { %5346 = vmatpush1.bf16.msra.mxu0 %v8293_v31  ;;  %5905 = vmatpush1.bf16.msra.mxu1 %v8296_v32  ;;  %v8394_v31 = vld [vmem:[%s11366_s1 + $0x1264] ss:$16 sps:$4 sm:$0xff]   ;;  %v8397_v32 = vld [vmem:[%s11366_s1 + $0x126c] ss:$16 sps:$4 sm:$0xff]  }
 0x210   :  { %5347 = vmatprep.subr.bf16.mxu0 %v8301_v33  ;;  %5906 = vmatprep.subr.bf16.mxu1 %v8304_v34  ;;  %v8392_v33 = vld [vmem:[%s11366_s1 + $0x1260] ss:$16 sps:$4 sm:$0xff]   ;;  %v8395_v34 = vld [vmem:[%s11366_s1 + $0x1268] ss:$16 sps:$4 sm:$0xff]  }
 0x213   :  { %5348 = vmatpush1.bf16.msra.mxu0 %v8299_v35  ;;  %5907 = vmatpush1.bf16.msra.mxu1 %v8302_v36  ;;  %v8400_v35 = vld [vmem:[%s11366_s1 + $0x1284] ss:$16 sps:$4 sm:$0xff]   ;;  %v8403_v36 = vld [vmem:[%s11366_s1 + $0x128c] ss:$16 sps:$4 sm:$0xff]  }
 0x214   :  { %5349 = vmatprep.subr.bf16.mxu0 %v8307_v37  ;;  %5908 = vmatprep.subr.bf16.mxu1 %v8310_v38  ;;  %v8398_v37 = vld [vmem:[%s11366_s1 + $0x1280] ss:$16 sps:$4 sm:$0xff]   ;;  %v8401_v38 = vld [vmem:[%s11366_s1 + $0x1288] ss:$16 sps:$4 sm:$0xff]  }
 0x217   :  { %5350 = vmatpush1.bf16.msra.mxu0 %v8305_v39  ;;  %5909 = vmatpush1.bf16.msra.mxu1 %v8308_v40  ;;  %v8406_v39 = vld [vmem:[%s11366_s1 + $0x12a4] ss:$16 sps:$4 sm:$0xff]   ;;  %v8409_v40 = vld [vmem:[%s11366_s1 + $0x12ac] ss:$16 sps:$4 sm:$0xff]  }
 0x218   :  { %5351 = vmatprep.subr.bf16.mxu0 %v8313_v41  ;;  %5910 = vmatprep.subr.bf16.mxu1 %v8316_v42  ;;  %v8404_v41 = vld [vmem:[%s11366_s1 + $0x12a0] ss:$16 sps:$4 sm:$0xff]   ;;  %v8407_v42 = vld [vmem:[%s11366_s1 + $0x12a8] ss:$16 sps:$4 sm:$0xff]  }
 0x21b   :  { %5352 = vmatpush1.bf16.msra.mxu0 %v8311_v43  ;;  %5911 = vmatpush1.bf16.msra.mxu1 %v8314_v44  ;;  %v8412_v43 = vld [vmem:[%s11366_s1 + $0x12c4] ss:$16 sps:$4 sm:$0xff]   ;;  %v8415_v44 = vld [vmem:[%s11366_s1 + $0x12cc] ss:$16 sps:$4 sm:$0xff]  }
 0x21c   :  { %5353 = vmatprep.subr.bf16.mxu0 %v8319_v45  ;;  %5912 = vmatprep.subr.bf16.mxu1 %v8322_v46  ;;  %v8410_v45 = vld [vmem:[%s11366_s1 + $0x12c0] ss:$16 sps:$4 sm:$0xff]   ;;  %v8413_v46 = vld [vmem:[%s11366_s1 + $0x12c8] ss:$16 sps:$4 sm:$0xff]  }
 0x21f   :  { %5354 = vmatpush1.bf16.msra.mxu0 %v8317_v47  ;;  %5913 = vmatpush1.bf16.msra.mxu1 %v8320_v48  ;;  %v8418_v47 = vld [vmem:[%s11366_s1 + $0x12e4] ss:$16 sps:$4 sm:$0xff]   ;;  %v8421_v48 = vld [vmem:[%s11366_s1 + $0x12ec] ss:$16 sps:$4 sm:$0xff]  }
 0x220   :  { %5355 = vmatprep.subr.bf16.mxu0 %v8325_v49  ;;  %5914 = vmatprep.subr.bf16.mxu1 %v8328_v50  ;;  %v8416_v49 = vld [vmem:[%s11366_s1 + $0x12e0] ss:$16 sps:$4 sm:$0xff]   ;;  %v8419_v50 = vld [vmem:[%s11366_s1 + $0x12e8] ss:$16 sps:$4 sm:$0xff]  }
 0x223   :  { %5356 = vmatpush1.bf16.msra.mxu0 %v8323_v51  ;;  %5915 = vmatpush1.bf16.msra.mxu1 %v8326_v52  ;;  %v8424_v51 = vld [vmem:[%s11366_s1 + $0x1304] ss:$16 sps:$4 sm:$0xff]   ;;  %v8427_v52 = vld [vmem:[%s11366_s1 + $0x130c] ss:$16 sps:$4 sm:$0xff]  }
 0x224   :  { %5357 = vmatprep.subr.bf16.mxu0 %v8331_v53  ;;  %5916 = vmatprep.subr.bf16.mxu1 %v8334_v54  ;;  %v8422_v53 = vld [vmem:[%s11366_s1 + $0x1300] ss:$16 sps:$4 sm:$0xff]   ;;  %v8425_v54 = vld [vmem:[%s11366_s1 + $0x1308] ss:$16 sps:$4 sm:$0xff]  }
 0x227   :  { %5358 = vmatpush1.bf16.msra.mxu0 %v8329_v55  ;;  %5917 = vmatpush1.bf16.msra.mxu1 %v8332_v56  ;;  %v8430_v55 = vld [vmem:[%s11366_s1 + $0x1324] ss:$16 sps:$4 sm:$0xff]   ;;  %v8433_v56 = vld [vmem:[%s11366_s1 + $0x132c] ss:$16 sps:$4 sm:$0xff]  }
 0x228   :  { %5359 = vmatprep.subr.bf16.mxu0 %v8337_v57  ;;  %5918 = vmatprep.subr.bf16.mxu1 %v8340_v58  ;;  %v8428_v57 = vld [vmem:[%s11366_s1 + $0x1320] ss:$16 sps:$4 sm:$0xff]   ;;  %v8431_v58 = vld [vmem:[%s11366_s1 + $0x1328] ss:$16 sps:$4 sm:$0xff]  }
 0x22b   :  { %5360 = vmatpush1.bf16.msra.mxu0 %v8335_v59  ;;  %5919 = vmatpush1.bf16.msra.mxu1 %v8338_v60  ;;  %v8436_v59 = vld [vmem:[%s11366_s1 + $0x1344] ss:$16 sps:$4 sm:$0xff]   ;;  %v8439_v60 = vld [vmem:[%s11366_s1 + $0x134c] ss:$16 sps:$4 sm:$0xff]  }
 0x22c   :  { %5361 = vmatprep.subr.bf16.mxu0 %v8343_v61  ;;  %5920 = vmatprep.subr.bf16.mxu1 %v8346_v62  ;;  %v8434_v61 = vld [vmem:[%s11366_s1 + $0x1340] ss:$16 sps:$4 sm:$0xff]   ;;  %v8437_v62 = vld [vmem:[%s11366_s1 + $0x1348] ss:$16 sps:$4 sm:$0xff]  }
 0x22f   :  { %5362 = vmatpush1.bf16.msra.mxu0 %v8341_v63  ;;  %5921 = vmatpush1.bf16.msra.mxu1 %v8344_v0  ;;  %v8442_v63 = vld [vmem:[%s11366_s1 + $0x1364] ss:$16 sps:$4 sm:$0xff]   ;;  %v8445_v0 = vld [vmem:[%s11366_s1 + $0x136c] ss:$16 sps:$4 sm:$0xff]  }
 0x230   :  { %5363 = vmatprep.subr.bf16.mxu0 %v8349_v1  ;;  %5922 = vmatprep.subr.bf16.mxu1 %v8352_v2  ;;  %v8440_v1 = vld [vmem:[%s11366_s1 + $0x1360] ss:$16 sps:$4 sm:$0xff]   ;;  %v8443_v2 = vld [vmem:[%s11366_s1 + $0x1368] ss:$16 sps:$4 sm:$0xff]  }
 0x233   :  { %5364 = vmatpush1.bf16.msra.mxu0 %v8347_v3  ;;  %5923 = vmatpush1.bf16.msra.mxu1 %v8350_v4  ;;  %v8448_v3 = vld [vmem:[%s11366_s1 + $0x1384] ss:$16 sps:$4 sm:$0xff]   ;;  %v8451_v4 = vld [vmem:[%s11366_s1 + $0x138c] ss:$16 sps:$4 sm:$0xff]  }
 0x234   :  { %5365 = vmatprep.subr.bf16.mxu0 %v8355_v5  ;;  %5924 = vmatprep.subr.bf16.mxu1 %v8358_v6  ;;  %v8446_v5 = vld [vmem:[%s11366_s1 + $0x1380] ss:$16 sps:$4 sm:$0xff]   ;;  %v8449_v6 = vld [vmem:[%s11366_s1 + $0x1388] ss:$16 sps:$4 sm:$0xff]  }
 0x237   :  { %5366 = vmatpush1.bf16.msra.mxu0 %v8353_v7  ;;  %5925 = vmatpush1.bf16.msra.mxu1 %v8356_v8  ;;  %v8454_v7 = vld [vmem:[%s11366_s1 + $0x13a4] ss:$16 sps:$4 sm:$0xff]   ;;  %v8457_v8 = vld [vmem:[%s11366_s1 + $0x13ac] ss:$16 sps:$4 sm:$0xff]  }
 0x238   :  { %5367 = vmatprep.subr.bf16.mxu0 %v8361_v9  ;;  %5926 = vmatprep.subr.bf16.mxu1 %v8364_v10  ;;  %v8452_v9 = vld [vmem:[%s11366_s1 + $0x13a0] ss:$16 sps:$4 sm:$0xff]   ;;  %v8455_v10 = vld [vmem:[%s11366_s1 + $0x13a8] ss:$16 sps:$4 sm:$0xff]  }
 0x23b   :  { %5368 = vmatpush1.bf16.msra.mxu0 %v8359_v11  ;;  %5927 = vmatpush1.bf16.msra.mxu1 %v8362_v12  ;;  %v8460_v11 = vld [vmem:[%s11366_s1 + $0x13c4] ss:$16 sps:$4 sm:$0xff]   ;;  %v8463_v12 = vld [vmem:[%s11366_s1 + $0x13cc] ss:$16 sps:$4 sm:$0xff]  }
 0x23c   :  { %5369 = vmatprep.subr.bf16.mxu0 %v8367_v13  ;;  %5928 = vmatprep.subr.bf16.mxu1 %v8370_v14  ;;  %v8458_v13 = vld [vmem:[%s11366_s1 + $0x13c0] ss:$16 sps:$4 sm:$0xff]   ;;  %v8461_v14 = vld [vmem:[%s11366_s1 + $0x13c8] ss:$16 sps:$4 sm:$0xff]  }
 0x23f   :  { %5370 = vmatpush1.bf16.msra.mxu0 %v8365_v15  ;;  %5929 = vmatpush1.bf16.msra.mxu1 %v8368_v16  ;;  %v8466_v15 = vld [vmem:[%s11366_s1 + $0x13e4] ss:$16 sps:$4 sm:$0xff]   ;;  %v8469_v16 = vld [vmem:[%s11366_s1 + $0x13ec] ss:$16 sps:$4 sm:$0xff]  }
 0x240   :  { %5382 = vmatprep.subr.bf16.mxu0 %v8376_v17  ;;  %5941 = vmatprep.subr.bf16.mxu1 %v8379_v18  ;;  %v8464_v17 = vld [vmem:[%s11366_s1 + $0x13e0] ss:$16 sps:$4 sm:$0xff]   ;;  %v8467_v18 = vld [vmem:[%s11366_s1 + $0x13e8] ss:$16 sps:$4 sm:$0xff]  }
 0x242   :  { %5372 = vmatmul.mubr.bf16.vlgmr.msra.gmra.mrb[0].mxu0 %v8371_v19  ;;  %5931 = vmatmul.mubr.bf16.vlgmr.msra.gmra.mrb[0].mxu1 %v8371_v19  ;;  %v8475_v19 = vld [vmem:[%s11366_s1 + $0x1404] ss:$16 sps:$4 sm:$0xff]  }
 0x243   :  { %5383 = vmatpush1.bf16.msra.mxu0 %v8374_v20  ;;  %5942 = vmatpush1.bf16.msra.mxu1 %v8377_v21  ;;  %v8478_v20 = vld [vmem:[%s11366_s1 + $0x140c] ss:$16 sps:$4 sm:$0xff]  }
 0x244   :  { %5384 = vmatprep.subr.bf16.mxu0 %v8382_v22  ;;  %5943 = vmatprep.subr.bf16.mxu1 %v8385_v23  ;;  %v8470_v21 = vld [vmem:[%s11367_s0 + $0x48] ss:$100 sps:$4 sm:$0xff]   ;;  %v8473_v22 = vld [vmem:[%s11366_s1 + $0x1400] ss:$16 sps:$4 sm:$0xff]  }
 0x245   :  { %5414 = vmatprep.mubr.bf16.mxu0 %v8472_v24  ;;  %5973 = vmatprep.mubr.bf16.mxu1 %v8472_v24  ;;  %v8476_v23 = vld [vmem:[%s11366_s1 + $0x1408] ss:$16 sps:$4 sm:$0xff]   ;;  %v8481_v24 = vld [vmem:[%s11366_s1 + $0x1424] ss:$16 sps:$4 sm:$0xff]  }
 0x247   :  { %5385 = vmatpush1.bf16.msra.mxu0 %v8380_v25  ;;  %5944 = vmatpush1.bf16.msra.mxu1 %v8383_v26  ;;  %v8484_v25 = vld [vmem:[%s11366_s1 + $0x142c] ss:$16 sps:$4 sm:$0xff]   ;;  %v8571_v26 = vld [vmem:[%s11367_s0 + $0x54] ss:$100 sps:$4 sm:$0xff]  }
 0x248   :  { %5386 = vmatprep.subr.bf16.mxu0 %v8388_v27  ;;  %5945 = vmatprep.subr.bf16.mxu1 %v8391_v28  ;;  %v8479_v27 = vld [vmem:[%s11366_s1 + $0x1420] ss:$16 sps:$4 sm:$0xff]   ;;  %v8482_v28 = vld [vmem:[%s11366_s1 + $0x1428] ss:$16 sps:$4 sm:$0xff]  }
 0x24b   :  { %5387 = vmatpush1.bf16.msra.mxu0 %v8386_v29  ;;  %5946 = vmatpush1.bf16.msra.mxu1 %v8389_v30  ;;  %v8487_v29 = vld [vmem:[%s11366_s1 + $0x1444] ss:$16 sps:$4 sm:$0xff]   ;;  %v8490_v30 = vld [vmem:[%s11366_s1 + $0x144c] ss:$16 sps:$4 sm:$0xff]  }
 0x24c   :  { %5388 = vmatprep.subr.bf16.mxu0 %v8394_v31  ;;  %5947 = vmatprep.subr.bf16.mxu1 %v8397_v32  ;;  %v8485_v31 = vld [vmem:[%s11366_s1 + $0x1440] ss:$16 sps:$4 sm:$0xff]   ;;  %v8488_v32 = vld [vmem:[%s11366_s1 + $0x1448] ss:$16 sps:$4 sm:$0xff]  }
 0x24f   :  { %5389 = vmatpush1.bf16.msra.mxu0 %v8392_v33  ;;  %5948 = vmatpush1.bf16.msra.mxu1 %v8395_v34  ;;  %v8493_v33 = vld [vmem:[%s11366_s1 + $0x1464] ss:$16 sps:$4 sm:$0xff]   ;;  %v8496_v34 = vld [vmem:[%s11366_s1 + $0x146c] ss:$16 sps:$4 sm:$0xff]  }
 0x250   :  { %5390 = vmatprep.subr.bf16.mxu0 %v8400_v35  ;;  %5949 = vmatprep.subr.bf16.mxu1 %v8403_v36  ;;  %v8491_v35 = vld [vmem:[%s11366_s1 + $0x1460] ss:$16 sps:$4 sm:$0xff]   ;;  %v8494_v36 = vld [vmem:[%s11366_s1 + $0x1468] ss:$16 sps:$4 sm:$0xff]  }
 0x253   :  { %5391 = vmatpush1.bf16.msra.mxu0 %v8398_v37  ;;  %5950 = vmatpush1.bf16.msra.mxu1 %v8401_v38  ;;  %v8499_v37 = vld [vmem:[%s11366_s1 + $0x1484] ss:$16 sps:$4 sm:$0xff]   ;;  %v8502_v38 = vld [vmem:[%s11366_s1 + $0x148c] ss:$16 sps:$4 sm:$0xff]  }
 0x254   :  { %5392 = vmatprep.subr.bf16.mxu0 %v8406_v39  ;;  %5951 = vmatprep.subr.bf16.mxu1 %v8409_v40  ;;  %v8497_v39 = vld [vmem:[%s11366_s1 + $0x1480] ss:$16 sps:$4 sm:$0xff]   ;;  %v8500_v40 = vld [vmem:[%s11366_s1 + $0x1488] ss:$16 sps:$4 sm:$0xff]  }
 0x257   :  { %5393 = vmatpush1.bf16.msra.mxu0 %v8404_v41  ;;  %5952 = vmatpush1.bf16.msra.mxu1 %v8407_v42  ;;  %v8505_v41 = vld [vmem:[%s11366_s1 + $0x14a4] ss:$16 sps:$4 sm:$0xff]   ;;  %v8508_v42 = vld [vmem:[%s11366_s1 + $0x14ac] ss:$16 sps:$4 sm:$0xff]  }
 0x258   :  { %5394 = vmatprep.subr.bf16.mxu0 %v8412_v43  ;;  %5953 = vmatprep.subr.bf16.mxu1 %v8415_v44  ;;  %v8503_v43 = vld [vmem:[%s11366_s1 + $0x14a0] ss:$16 sps:$4 sm:$0xff]   ;;  %v8506_v44 = vld [vmem:[%s11366_s1 + $0x14a8] ss:$16 sps:$4 sm:$0xff]  }
 0x25b   :  { %5395 = vmatpush1.bf16.msra.mxu0 %v8410_v45  ;;  %5954 = vmatpush1.bf16.msra.mxu1 %v8413_v46  ;;  %v8511_v45 = vld [vmem:[%s11366_s1 + $0x14c4] ss:$16 sps:$4 sm:$0xff]   ;;  %v8514_v46 = vld [vmem:[%s11366_s1 + $0x14cc] ss:$16 sps:$4 sm:$0xff]  }
 0x25c   :  { %5396 = vmatprep.subr.bf16.mxu0 %v8418_v47  ;;  %5955 = vmatprep.subr.bf16.mxu1 %v8421_v48  ;;  %v8509_v47 = vld [vmem:[%s11366_s1 + $0x14c0] ss:$16 sps:$4 sm:$0xff]   ;;  %v8512_v48 = vld [vmem:[%s11366_s1 + $0x14c8] ss:$16 sps:$4 sm:$0xff]  }
 0x25f   :  { %5397 = vmatpush1.bf16.msra.mxu0 %v8416_v49  ;;  %5956 = vmatpush1.bf16.msra.mxu1 %v8419_v50  ;;  %v8517_v49 = vld [vmem:[%s11366_s1 + $0x14e4] ss:$16 sps:$4 sm:$0xff]   ;;  %v8520_v50 = vld [vmem:[%s11366_s1 + $0x14ec] ss:$16 sps:$4 sm:$0xff]  }
 0x260   :  { %5398 = vmatprep.subr.bf16.mxu0 %v8424_v51  ;;  %5957 = vmatprep.subr.bf16.mxu1 %v8427_v52  ;;  %v8515_v51 = vld [vmem:[%s11366_s1 + $0x14e0] ss:$16 sps:$4 sm:$0xff]   ;;  %v8518_v52 = vld [vmem:[%s11366_s1 + $0x14e8] ss:$16 sps:$4 sm:$0xff]  }
 0x263   :  { %5399 = vmatpush1.bf16.msra.mxu0 %v8422_v53  ;;  %5958 = vmatpush1.bf16.msra.mxu1 %v8425_v54  ;;  %v8523_v53 = vld [vmem:[%s11366_s1 + $0x1504] ss:$16 sps:$4 sm:$0xff]   ;;  %v8526_v54 = vld [vmem:[%s11366_s1 + $0x150c] ss:$16 sps:$4 sm:$0xff]  }
 0x264   :  { %5400 = vmatprep.subr.bf16.mxu0 %v8430_v55  ;;  %5959 = vmatprep.subr.bf16.mxu1 %v8433_v56  ;;  %v8521_v55 = vld [vmem:[%s11366_s1 + $0x1500] ss:$16 sps:$4 sm:$0xff]   ;;  %v8524_v56 = vld [vmem:[%s11366_s1 + $0x1508] ss:$16 sps:$4 sm:$0xff]  }
 0x267   :  { %5401 = vmatpush1.bf16.msra.mxu0 %v8428_v57  ;;  %5960 = vmatpush1.bf16.msra.mxu1 %v8431_v58  ;;  %v8529_v57 = vld [vmem:[%s11366_s1 + $0x1524] ss:$16 sps:$4 sm:$0xff]   ;;  %v8532_v58 = vld [vmem:[%s11366_s1 + $0x152c] ss:$16 sps:$4 sm:$0xff]  }
 0x268   :  { %5402 = vmatprep.subr.bf16.mxu0 %v8436_v59  ;;  %5961 = vmatprep.subr.bf16.mxu1 %v8439_v60  ;;  %v8527_v59 = vld [vmem:[%s11366_s1 + $0x1520] ss:$16 sps:$4 sm:$0xff]   ;;  %v8530_v60 = vld [vmem:[%s11366_s1 + $0x1528] ss:$16 sps:$4 sm:$0xff]  }
 0x26b   :  { %5403 = vmatpush1.bf16.msra.mxu0 %v8434_v61  ;;  %5962 = vmatpush1.bf16.msra.mxu1 %v8437_v62  ;;  %v8535_v61 = vld [vmem:[%s11366_s1 + $0x1544] ss:$16 sps:$4 sm:$0xff]   ;;  %v8538_v62 = vld [vmem:[%s11366_s1 + $0x154c] ss:$16 sps:$4 sm:$0xff]  }
 0x26c   :  { %5404 = vmatprep.subr.bf16.mxu0 %v8442_v63  ;;  %5963 = vmatprep.subr.bf16.mxu1 %v8445_v0  ;;  %v8533_v63 = vld [vmem:[%s11366_s1 + $0x1540] ss:$16 sps:$4 sm:$0xff]   ;;  %v8536_v0 = vld [vmem:[%s11366_s1 + $0x1548] ss:$16 sps:$4 sm:$0xff]  }
 0x26f   :  { %5405 = vmatpush1.bf16.msra.mxu0 %v8440_v1  ;;  %5964 = vmatpush1.bf16.msra.mxu1 %v8443_v2  ;;  %v8541_v1 = vld [vmem:[%s11366_s1 + $0x1564] ss:$16 sps:$4 sm:$0xff]   ;;  %v8544_v2 = vld [vmem:[%s11366_s1 + $0x156c] ss:$16 sps:$4 sm:$0xff]  }
 0x270   :  { %5406 = vmatprep.subr.bf16.mxu0 %v8448_v3  ;;  %5965 = vmatprep.subr.bf16.mxu1 %v8451_v4  ;;  %v8539_v3 = vld [vmem:[%s11366_s1 + $0x1560] ss:$16 sps:$4 sm:$0xff]   ;;  %v8542_v4 = vld [vmem:[%s11366_s1 + $0x1568] ss:$16 sps:$4 sm:$0xff]  }
 0x273   :  { %5407 = vmatpush1.bf16.msra.mxu0 %v8446_v5  ;;  %5966 = vmatpush1.bf16.msra.mxu1 %v8449_v6  ;;  %v8547_v5 = vld [vmem:[%s11366_s1 + $0x1584] ss:$16 sps:$4 sm:$0xff]   ;;  %v8550_v6 = vld [vmem:[%s11366_s1 + $0x158c] ss:$16 sps:$4 sm:$0xff]  }
 0x274   :  { %5408 = vmatprep.subr.bf16.mxu0 %v8454_v7  ;;  %5967 = vmatprep.subr.bf16.mxu1 %v8457_v8  ;;  %v8545_v7 = vld [vmem:[%s11366_s1 + $0x1580] ss:$16 sps:$4 sm:$0xff]   ;;  %v8548_v8 = vld [vmem:[%s11366_s1 + $0x1588] ss:$16 sps:$4 sm:$0xff]  }
 0x277   :  { %5409 = vmatpush1.bf16.msra.mxu0 %v8452_v9  ;;  %5968 = vmatpush1.bf16.msra.mxu1 %v8455_v10  ;;  %v8553_v9 = vld [vmem:[%s11366_s1 + $0x15a4] ss:$16 sps:$4 sm:$0xff]   ;;  %v8556_v10 = vld [vmem:[%s11366_s1 + $0x15ac] ss:$16 sps:$4 sm:$0xff]  }
 0x278   :  { %5410 = vmatprep.subr.bf16.mxu0 %v8460_v11  ;;  %5969 = vmatprep.subr.bf16.mxu1 %v8463_v12  ;;  %v8551_v11 = vld [vmem:[%s11366_s1 + $0x15a0] ss:$16 sps:$4 sm:$0xff]   ;;  %v8554_v12 = vld [vmem:[%s11366_s1 + $0x15a8] ss:$16 sps:$4 sm:$0xff]  }
 0x27b   :  { %5411 = vmatpush1.bf16.msra.mxu0 %v8458_v13  ;;  %5970 = vmatpush1.bf16.msra.mxu1 %v8461_v14  ;;  %v8559_v13 = vld [vmem:[%s11366_s1 + $0x15c4] ss:$16 sps:$4 sm:$0xff]   ;;  %v8562_v14 = vld [vmem:[%s11366_s1 + $0x15cc] ss:$16 sps:$4 sm:$0xff]  }
 0x27c   :  { %5412 = vmatprep.subr.bf16.mxu0 %v8466_v15  ;;  %5971 = vmatprep.subr.bf16.mxu1 %v8469_v16  ;;  %v8557_v15 = vld [vmem:[%s11366_s1 + $0x15c0] ss:$16 sps:$4 sm:$0xff]   ;;  %v8560_v16 = vld [vmem:[%s11366_s1 + $0x15c8] ss:$16 sps:$4 sm:$0xff]  }
 0x27f   :  { %5413 = vmatpush1.bf16.msra.mxu0 %v8464_v17  ;;  %5972 = vmatpush1.bf16.msra.mxu1 %v8467_v18  ;;  %v8565_v17 = vld [vmem:[%s11366_s1 + $0x15e4] ss:$16 sps:$4 sm:$0xff]   ;;  %v8568_v18 = vld [vmem:[%s11366_s1 + $0x15ec] ss:$16 sps:$4 sm:$0xff]  }
 0x280   :  { %5425 = vmatprep.subr.bf16.mxu0 %v8475_v19  ;;  %5984 = vmatprep.subr.bf16.mxu1 %v8478_v20  ;;  %v8563_v19 = vld [vmem:[%s11366_s1 + $0x15e0] ss:$16 sps:$4 sm:$0xff]   ;;  %v8566_v20 = vld [vmem:[%s11366_s1 + $0x15e8] ss:$16 sps:$4 sm:$0xff]  }
 0x282   :  { %5415 = vmatmul.mubr.bf16.vlgmr.msra.gmra.mrb[0].mxu0 %v8470_v21  ;;  %5974 = vmatmul.mubr.bf16.vlgmr.msra.gmra.mrb[0].mxu1 %v8470_v21  ;;  %v8574_v21 = vld [vmem:[%s11366_s1 + $0x1604] ss:$16 sps:$4 sm:$0xff]  }
 0x283   :  { %5426 = vmatpush1.bf16.msra.mxu0 %v8473_v22  ;;  %5985 = vmatpush1.bf16.msra.mxu1 %v8476_v23  ;;  %v8577_v22 = vld [vmem:[%s11366_s1 + $0x160c] ss:$16 sps:$4 sm:$0xff]   ;;  %v8569_v23 = vld [vmem:[%s11367_s0 + $0x50] ss:$100 sps:$4 sm:$0xff]  }
 0x284   :  { %5427 = vmatprep.subr.bf16.mxu0 %v8481_v24  ;;  %5986 = vmatprep.subr.bf16.mxu1 %v8484_v25  ;;  %v8572_v24 = vld [vmem:[%s11366_s1 + $0x1600] ss:$16 sps:$4 sm:$0xff]   ;;  %v8575_v25 = vld [vmem:[%s11366_s1 + $0x1608] ss:$16 sps:$4 sm:$0xff]  }
 0x285   :  { %5457 = vmatprep.mubr.bf16.mxu0 %v8571_v26  ;;  %6016 = vmatprep.mubr.bf16.mxu1 %v8571_v26  ;;  %v8580_v26 = vld [vmem:[%s11366_s1 + $0x1624] ss:$16 sps:$4 sm:$0xff]  }
 0x287   :  { %5428 = vmatpush1.bf16.msra.mxu0 %v8479_v27  ;;  %5987 = vmatpush1.bf16.msra.mxu1 %v8482_v28  ;;  %v8583_v27 = vld [vmem:[%s11366_s1 + $0x162c] ss:$16 sps:$4 sm:$0xff]  }
 0x288   :  { %5429 = vmatprep.subr.bf16.mxu0 %v8487_v29  ;;  %5988 = vmatprep.subr.bf16.mxu1 %v8490_v30  ;;  %v8670_v28 = vld [vmem:[%s11367_s0 + $0x5c] ss:$100 sps:$4 sm:$0xff]   ;;  %v8581_v30 = vld [vmem:[%s11366_s1 + $0x1628] ss:$16 sps:$4 sm:$0xff]  }
 0x289   :  { %v8578_v29 = vld [vmem:[%s11366_s1 + $0x1620] ss:$16 sps:$4 sm:$0xff]  }
 0x28b   :  { %5430 = vmatpush1.bf16.msra.mxu0 %v8485_v31  ;;  %5989 = vmatpush1.bf16.msra.mxu1 %v8488_v32  ;;  %v8586_v31 = vld [vmem:[%s11366_s1 + $0x1644] ss:$16 sps:$4 sm:$0xff]   ;;  %v8589_v32 = vld [vmem:[%s11366_s1 + $0x164c] ss:$16 sps:$4 sm:$0xff]  }
 0x28c   :  { %5431 = vmatprep.subr.bf16.mxu0 %v8493_v33  ;;  %5990 = vmatprep.subr.bf16.mxu1 %v8496_v34  ;;  %v8584_v33 = vld [vmem:[%s11366_s1 + $0x1640] ss:$16 sps:$4 sm:$0xff]   ;;  %v8587_v34 = vld [vmem:[%s11366_s1 + $0x1648] ss:$16 sps:$4 sm:$0xff]  }
 0x28f   :  { %5432 = vmatpush1.bf16.msra.mxu0 %v8491_v35  ;;  %5991 = vmatpush1.bf16.msra.mxu1 %v8494_v36  ;;  %v8592_v35 = vld [vmem:[%s11366_s1 + $0x1664] ss:$16 sps:$4 sm:$0xff]   ;;  %v8595_v36 = vld [vmem:[%s11366_s1 + $0x166c] ss:$16 sps:$4 sm:$0xff]  }
 0x290   :  { %5433 = vmatprep.subr.bf16.mxu0 %v8499_v37  ;;  %5992 = vmatprep.subr.bf16.mxu1 %v8502_v38  ;;  %v8590_v37 = vld [vmem:[%s11366_s1 + $0x1660] ss:$16 sps:$4 sm:$0xff]   ;;  %v8593_v38 = vld [vmem:[%s11366_s1 + $0x1668] ss:$16 sps:$4 sm:$0xff]  }
 0x293   :  { %5434 = vmatpush1.bf16.msra.mxu0 %v8497_v39  ;;  %5993 = vmatpush1.bf16.msra.mxu1 %v8500_v40  ;;  %v8598_v39 = vld [vmem:[%s11366_s1 + $0x1684] ss:$16 sps:$4 sm:$0xff]   ;;  %v8601_v40 = vld [vmem:[%s11366_s1 + $0x168c] ss:$16 sps:$4 sm:$0xff]  }
 0x294   :  { %5435 = vmatprep.subr.bf16.mxu0 %v8505_v41  ;;  %5994 = vmatprep.subr.bf16.mxu1 %v8508_v42  ;;  %v8596_v41 = vld [vmem:[%s11366_s1 + $0x1680] ss:$16 sps:$4 sm:$0xff]   ;;  %v8599_v42 = vld [vmem:[%s11366_s1 + $0x1688] ss:$16 sps:$4 sm:$0xff]  }
 0x297   :  { %5436 = vmatpush1.bf16.msra.mxu0 %v8503_v43  ;;  %5995 = vmatpush1.bf16.msra.mxu1 %v8506_v44  ;;  %v8604_v43 = vld [vmem:[%s11366_s1 + $0x16a4] ss:$16 sps:$4 sm:$0xff]   ;;  %v8607_v44 = vld [vmem:[%s11366_s1 + $0x16ac] ss:$16 sps:$4 sm:$0xff]  }
 0x298   :  { %5437 = vmatprep.subr.bf16.mxu0 %v8511_v45  ;;  %5996 = vmatprep.subr.bf16.mxu1 %v8514_v46  ;;  %v8602_v45 = vld [vmem:[%s11366_s1 + $0x16a0] ss:$16 sps:$4 sm:$0xff]   ;;  %v8605_v46 = vld [vmem:[%s11366_s1 + $0x16a8] ss:$16 sps:$4 sm:$0xff]  }
 0x29b   :  { %5438 = vmatpush1.bf16.msra.mxu0 %v8509_v47  ;;  %5997 = vmatpush1.bf16.msra.mxu1 %v8512_v48  ;;  %v8610_v47 = vld [vmem:[%s11366_s1 + $0x16c4] ss:$16 sps:$4 sm:$0xff]   ;;  %v8613_v48 = vld [vmem:[%s11366_s1 + $0x16cc] ss:$16 sps:$4 sm:$0xff]  }
 0x29c   :  { %5439 = vmatprep.subr.bf16.mxu0 %v8517_v49  ;;  %5998 = vmatprep.subr.bf16.mxu1 %v8520_v50  ;;  %v8608_v49 = vld [vmem:[%s11366_s1 + $0x16c0] ss:$16 sps:$4 sm:$0xff]   ;;  %v8611_v50 = vld [vmem:[%s11366_s1 + $0x16c8] ss:$16 sps:$4 sm:$0xff]  }
 0x29f   :  { %5440 = vmatpush1.bf16.msra.mxu0 %v8515_v51  ;;  %5999 = vmatpush1.bf16.msra.mxu1 %v8518_v52  ;;  %v8616_v51 = vld [vmem:[%s11366_s1 + $0x16e4] ss:$16 sps:$4 sm:$0xff]   ;;  %v8619_v52 = vld [vmem:[%s11366_s1 + $0x16ec] ss:$16 sps:$4 sm:$0xff]  }
 0x2a0   :  { %5441 = vmatprep.subr.bf16.mxu0 %v8523_v53  ;;  %6000 = vmatprep.subr.bf16.mxu1 %v8526_v54  ;;  %v8614_v53 = vld [vmem:[%s11366_s1 + $0x16e0] ss:$16 sps:$4 sm:$0xff]   ;;  %v8617_v54 = vld [vmem:[%s11366_s1 + $0x16e8] ss:$16 sps:$4 sm:$0xff]  }
 0x2a3   :  { %5442 = vmatpush1.bf16.msra.mxu0 %v8521_v55  ;;  %6001 = vmatpush1.bf16.msra.mxu1 %v8524_v56  ;;  %v8622_v55 = vld [vmem:[%s11366_s1 + $0x1704] ss:$16 sps:$4 sm:$0xff]   ;;  %v8625_v56 = vld [vmem:[%s11366_s1 + $0x170c] ss:$16 sps:$4 sm:$0xff]  }
 0x2a4   :  { %5443 = vmatprep.subr.bf16.mxu0 %v8529_v57  ;;  %6002 = vmatprep.subr.bf16.mxu1 %v8532_v58  ;;  %v8620_v57 = vld [vmem:[%s11366_s1 + $0x1700] ss:$16 sps:$4 sm:$0xff]   ;;  %v8623_v58 = vld [vmem:[%s11366_s1 + $0x1708] ss:$16 sps:$4 sm:$0xff]  }
 0x2a7   :  { %5444 = vmatpush1.bf16.msra.mxu0 %v8527_v59  ;;  %6003 = vmatpush1.bf16.msra.mxu1 %v8530_v60  ;;  %v8628_v59 = vld [vmem:[%s11366_s1 + $0x1724] ss:$16 sps:$4 sm:$0xff]   ;;  %v8631_v60 = vld [vmem:[%s11366_s1 + $0x172c] ss:$16 sps:$4 sm:$0xff]  }
 0x2a8   :  { %5445 = vmatprep.subr.bf16.mxu0 %v8535_v61  ;;  %6004 = vmatprep.subr.bf16.mxu1 %v8538_v62  ;;  %v8626_v61 = vld [vmem:[%s11366_s1 + $0x1720] ss:$16 sps:$4 sm:$0xff]   ;;  %v8629_v62 = vld [vmem:[%s11366_s1 + $0x1728] ss:$16 sps:$4 sm:$0xff]  }
 0x2ab   :  { %5446 = vmatpush1.bf16.msra.mxu0 %v8533_v63  ;;  %6005 = vmatpush1.bf16.msra.mxu1 %v8536_v0  ;;  %v8634_v63 = vld [vmem:[%s11366_s1 + $0x1744] ss:$16 sps:$4 sm:$0xff]   ;;  %v8637_v0 = vld [vmem:[%s11366_s1 + $0x174c] ss:$16 sps:$4 sm:$0xff]  }
 0x2ac   :  { %5447 = vmatprep.subr.bf16.mxu0 %v8541_v1  ;;  %6006 = vmatprep.subr.bf16.mxu1 %v8544_v2  ;;  %v8632_v1 = vld [vmem:[%s11366_s1 + $0x1740] ss:$16 sps:$4 sm:$0xff]   ;;  %v8635_v2 = vld [vmem:[%s11366_s1 + $0x1748] ss:$16 sps:$4 sm:$0xff]  }
 0x2af   :  { %5448 = vmatpush1.bf16.msra.mxu0 %v8539_v3  ;;  %6007 = vmatpush1.bf16.msra.mxu1 %v8542_v4  ;;  %v8640_v3 = vld [vmem:[%s11366_s1 + $0x1764] ss:$16 sps:$4 sm:$0xff]   ;;  %v8643_v4 = vld [vmem:[%s11366_s1 + $0x176c] ss:$16 sps:$4 sm:$0xff]  }
 0x2b0   :  { %5449 = vmatprep.subr.bf16.mxu0 %v8547_v5  ;;  %6008 = vmatprep.subr.bf16.mxu1 %v8550_v6  ;;  %v8638_v5 = vld [vmem:[%s11366_s1 + $0x1760] ss:$16 sps:$4 sm:$0xff]   ;;  %v8641_v6 = vld [vmem:[%s11366_s1 + $0x1768] ss:$16 sps:$4 sm:$0xff]  }
 0x2b3   :  { %5450 = vmatpush1.bf16.msra.mxu0 %v8545_v7  ;;  %6009 = vmatpush1.bf16.msra.mxu1 %v8548_v8  ;;  %v8646_v7 = vld [vmem:[%s11366_s1 + $0x1784] ss:$16 sps:$4 sm:$0xff]   ;;  %v8649_v8 = vld [vmem:[%s11366_s1 + $0x178c] ss:$16 sps:$4 sm:$0xff]  }
 0x2b4   :  { %5451 = vmatprep.subr.bf16.mxu0 %v8553_v9  ;;  %6010 = vmatprep.subr.bf16.mxu1 %v8556_v10  ;;  %v8644_v9 = vld [vmem:[%s11366_s1 + $0x1780] ss:$16 sps:$4 sm:$0xff]   ;;  %v8647_v10 = vld [vmem:[%s11366_s1 + $0x1788] ss:$16 sps:$4 sm:$0xff]  }
 0x2b7   :  { %5452 = vmatpush1.bf16.msra.mxu0 %v8551_v11  ;;  %6011 = vmatpush1.bf16.msra.mxu1 %v8554_v12  ;;  %v8652_v11 = vld [vmem:[%s11366_s1 + $0x17a4] ss:$16 sps:$4 sm:$0xff]   ;;  %v8655_v12 = vld [vmem:[%s11366_s1 + $0x17ac] ss:$16 sps:$4 sm:$0xff]  }
 0x2b8   :  { %5453 = vmatprep.subr.bf16.mxu0 %v8559_v13  ;;  %6012 = vmatprep.subr.bf16.mxu1 %v8562_v14  ;;  %v8650_v13 = vld [vmem:[%s11366_s1 + $0x17a0] ss:$16 sps:$4 sm:$0xff]   ;;  %v8653_v14 = vld [vmem:[%s11366_s1 + $0x17a8] ss:$16 sps:$4 sm:$0xff]  }
 0x2bb   :  { %5454 = vmatpush1.bf16.msra.mxu0 %v8557_v15  ;;  %6013 = vmatpush1.bf16.msra.mxu1 %v8560_v16  ;;  %v8658_v15 = vld [vmem:[%s11366_s1 + $0x17c4] ss:$16 sps:$4 sm:$0xff]   ;;  %v8661_v16 = vld [vmem:[%s11366_s1 + $0x17cc] ss:$16 sps:$4 sm:$0xff]  }
 0x2bc   :  { %5455 = vmatprep.subr.bf16.mxu0 %v8565_v17  ;;  %6014 = vmatprep.subr.bf16.mxu1 %v8568_v18  ;;  %v8656_v17 = vld [vmem:[%s11366_s1 + $0x17c0] ss:$16 sps:$4 sm:$0xff]   ;;  %v8659_v18 = vld [vmem:[%s11366_s1 + $0x17c8] ss:$16 sps:$4 sm:$0xff]  }
 0x2bf   :  { %5456 = vmatpush1.bf16.msra.mxu0 %v8563_v19  ;;  %6015 = vmatpush1.bf16.msra.mxu1 %v8566_v20  ;;  %v8664_v19 = vld [vmem:[%s11366_s1 + $0x17e4] ss:$16 sps:$4 sm:$0xff]   ;;  %v8667_v20 = vld [vmem:[%s11366_s1 + $0x17ec] ss:$16 sps:$4 sm:$0xff]  }
 0x2c0   :  { %5468 = vmatprep.subr.bf16.mxu0 %v8574_v21  ;;  %6027 = vmatprep.subr.bf16.mxu1 %v8577_v22  ;;  %v8662_v21 = vld [vmem:[%s11366_s1 + $0x17e0] ss:$16 sps:$4 sm:$0xff]   ;;  %v8665_v22 = vld [vmem:[%s11366_s1 + $0x17e8] ss:$16 sps:$4 sm:$0xff]  }
 0x2c2   :  { %5458 = vmatmul.mubr.bf16.vlgmr.msra.gmra.mrb[0].mxu0 %v8569_v23  ;;  %6017 = vmatmul.mubr.bf16.vlgmr.msra.gmra.mrb[0].mxu1 %v8569_v23  ;;  %v8673_v23 = vld [vmem:[%s11366_s1 + $0x1804] ss:$16 sps:$4 sm:$0xff]  }
 0x2c3   :  { %5469 = vmatpush1.bf16.msra.mxu0 %v8572_v24  ;;  %6028 = vmatpush1.bf16.msra.mxu1 %v8575_v25  ;;  %v8676_v24 = vld [vmem:[%s11366_s1 + $0x180c] ss:$16 sps:$4 sm:$0xff]  }
 0x2c4   :  { %5470 = vmatprep.subr.bf16.mxu0 %v8580_v26  ;;  %6029 = vmatprep.subr.bf16.mxu1 %v8583_v27  ;;  %v8668_v25 = vld [vmem:[%s11367_s0 + $0x58] ss:$100 sps:$4 sm:$0xff]   ;;  %v8671_v26 = vld [vmem:[%s11366_s1 + $0x1800] ss:$16 sps:$4 sm:$0xff]  }
 0x2c5   :  { %5500 = vmatprep.mubr.bf16.mxu0 %v8670_v28  ;;  %6059 = vmatprep.mubr.bf16.mxu1 %v8670_v28  ;;  %v8674_v27 = vld [vmem:[%s11366_s1 + $0x1808] ss:$16 sps:$4 sm:$0xff]   ;;  %v8679_v28 = vld [vmem:[%s11366_s1 + $0x1824] ss:$16 sps:$4 sm:$0xff]  }
 0x2c7   :  { %5471 = vmatpush1.bf16.msra.mxu0 %v8578_v29  ;;  %6030 = vmatpush1.bf16.msra.mxu1 %v8581_v30  ;;  %v8682_v29 = vld [vmem:[%s11366_s1 + $0x182c] ss:$16 sps:$4 sm:$0xff]   ;;  %v8677_v30 = vld [vmem:[%s11366_s1 + $0x1820] ss:$16 sps:$4 sm:$0xff]  }
 0x2c8   :  { %5472 = vmatprep.subr.bf16.mxu0 %v8586_v31  ;;  %6031 = vmatprep.subr.bf16.mxu1 %v8589_v32  ;;  %v8680_v31 = vld [vmem:[%s11366_s1 + $0x1828] ss:$16 sps:$4 sm:$0xff]   ;;  %v8685_v32 = vld [vmem:[%s11366_s1 + $0x1844] ss:$16 sps:$4 sm:$0xff]  }
 0x2cb   :  { %5473 = vmatpush1.bf16.msra.mxu0 %v8584_v33  ;;  %6032 = vmatpush1.bf16.msra.mxu1 %v8587_v34  ;;  %v8688_v33 = vld [vmem:[%s11366_s1 + $0x184c] ss:$16 sps:$4 sm:$0xff]   ;;  %v8752_v34 = vmov 0  }
 0x2cc   :  { %5474 = vmatprep.subr.bf16.mxu0 %v8592_v35  ;;  %6033 = vmatprep.subr.bf16.mxu1 %v8595_v36  ;;  %v8683_v35 = vld [vmem:[%s11366_s1 + $0x1840] ss:$16 sps:$4 sm:$0xff]   ;;  %v8686_v36 = vld [vmem:[%s11366_s1 + $0x1848] ss:$16 sps:$4 sm:$0xff]  }
 0x2cf   :  { %5475 = vmatpush1.bf16.msra.mxu0 %v8590_v37  ;;  %6034 = vmatpush1.bf16.msra.mxu1 %v8593_v38  ;;  %v8691_v37 = vld [vmem:[%s11366_s1 + $0x1864] ss:$16 sps:$4 sm:$0xff]   ;;  %v8694_v38 = vld [vmem:[%s11366_s1 + $0x186c] ss:$16 sps:$4 sm:$0xff]  }
 0x2d0   :  { %5476 = vmatprep.subr.bf16.mxu0 %v8598_v39  ;;  %6035 = vmatprep.subr.bf16.mxu1 %v8601_v40  ;;  %v8689_v39 = vld [vmem:[%s11366_s1 + $0x1860] ss:$16 sps:$4 sm:$0xff]   ;;  %v8692_v40 = vld [vmem:[%s11366_s1 + $0x1868] ss:$16 sps:$4 sm:$0xff]  }
 0x2d3   :  { %5477 = vmatpush1.bf16.msra.mxu0 %v8596_v41  ;;  %6036 = vmatpush1.bf16.msra.mxu1 %v8599_v42  ;;  %v8697_v41 = vld [vmem:[%s11366_s1 + $0x1884] ss:$16 sps:$4 sm:$0xff]   ;;  %v8700_v42 = vld [vmem:[%s11366_s1 + $0x188c] ss:$16 sps:$4 sm:$0xff]  }
 0x2d4   :  { %5478 = vmatprep.subr.bf16.mxu0 %v8604_v43  ;;  %6037 = vmatprep.subr.bf16.mxu1 %v8607_v44  ;;  %v8695_v43 = vld [vmem:[%s11366_s1 + $0x1880] ss:$16 sps:$4 sm:$0xff]   ;;  %v8698_v44 = vld [vmem:[%s11366_s1 + $0x1888] ss:$16 sps:$4 sm:$0xff]  }
 0x2d7   :  { %5479 = vmatpush1.bf16.msra.mxu0 %v8602_v45  ;;  %6038 = vmatpush1.bf16.msra.mxu1 %v8605_v46  ;;  %v8703_v45 = vld [vmem:[%s11366_s1 + $0x18a4] ss:$16 sps:$4 sm:$0xff]   ;;  %v8706_v46 = vld [vmem:[%s11366_s1 + $0x18ac] ss:$16 sps:$4 sm:$0xff]  }
 0x2d8   :  { %5480 = vmatprep.subr.bf16.mxu0 %v8610_v47  ;;  %6039 = vmatprep.subr.bf16.mxu1 %v8613_v48  ;;  %v8701_v47 = vld [vmem:[%s11366_s1 + $0x18a0] ss:$16 sps:$4 sm:$0xff]   ;;  %v8704_v48 = vld [vmem:[%s11366_s1 + $0x18a8] ss:$16 sps:$4 sm:$0xff]  }
 0x2db   :  { %5481 = vmatpush1.bf16.msra.mxu0 %v8608_v49  ;;  %6040 = vmatpush1.bf16.msra.mxu1 %v8611_v50  ;;  %v8709_v49 = vld [vmem:[%s11366_s1 + $0x18c4] ss:$16 sps:$4 sm:$0xff]   ;;  %v8712_v50 = vld [vmem:[%s11366_s1 + $0x18cc] ss:$16 sps:$4 sm:$0xff]  }
 0x2dc   :  { %5482 = vmatprep.subr.bf16.mxu0 %v8616_v51  ;;  %6041 = vmatprep.subr.bf16.mxu1 %v8619_v52  ;;  %v8707_v51 = vld [vmem:[%s11366_s1 + $0x18c0] ss:$16 sps:$4 sm:$0xff]   ;;  %v8710_v52 = vld [vmem:[%s11366_s1 + $0x18c8] ss:$16 sps:$4 sm:$0xff]  }
 0x2df   :  { %5483 = vmatpush1.bf16.msra.mxu0 %v8614_v53  ;;  %6042 = vmatpush1.bf16.msra.mxu1 %v8617_v54  ;;  %v8715_v53 = vld [vmem:[%s11366_s1 + $0x18e4] ss:$16 sps:$4 sm:$0xff]   ;;  %v8718_v54 = vld [vmem:[%s11366_s1 + $0x18ec] ss:$16 sps:$4 sm:$0xff]  }
 0x2e0   :  { %5484 = vmatprep.subr.bf16.mxu0 %v8622_v55  ;;  %6043 = vmatprep.subr.bf16.mxu1 %v8625_v56  ;;  %v8713_v55 = vld [vmem:[%s11366_s1 + $0x18e0] ss:$16 sps:$4 sm:$0xff]   ;;  %v8716_v56 = vld [vmem:[%s11366_s1 + $0x18e8] ss:$16 sps:$4 sm:$0xff]  }
 0x2e3   :  { %5485 = vmatpush1.bf16.msra.mxu0 %v8620_v57  ;;  %6044 = vmatpush1.bf16.msra.mxu1 %v8623_v58  ;;  %v8720_v57 = vld [vmem:[%s11368_s3 + $0x40] sm:$0xff]  }
 0x2e4   :  { %5486 = vmatprep.subr.bf16.mxu0 %v8628_v59  ;;  %6045 = vmatprep.subr.bf16.mxu1 %v8631_v60  ;;  %v8721_v58 = vld [vmem:[%s11368_s3 + $0xc0] sm:$0xff]  }
 0x2e5   :  { %v8719_v59 = vld [vmem:[%s11367_s0 + $0x60] ss:$100 sps:$4 sm:$0xff]  }
 0x2e6   :  { %v8722_v60 = vld [vmem:[%s11368_s3] sm:$0xff]  }
 0x2e7   :  { %5487 = vmatpush1.bf16.msra.mxu0 %v8626_v61  ;;  %6046 = vmatpush1.bf16.msra.mxu1 %v8629_v62  ;;  %v8723_v61 = vld [vmem:[%s11368_s3 + $0x80] sm:$0xff]   ;;  %v8724_v62 = vld [vmem:[%s11368_s3 + $0x48] sm:$0xff]  }
 0x2e8   :  { %5488 = vmatprep.subr.bf16.mxu0 %v8634_v63  ;;  %6047 = vmatprep.subr.bf16.mxu1 %v8637_v0  ;;  %v8725_v63 = vld [vmem:[%s11368_s3 + $0xc8] sm:$0xff]  }
 0x2e9   :  { %v8726_v0 = vld [vmem:[%s11368_s3 + $0x8] sm:$0xff]  }
 0x2eb   :  { %5489 = vmatpush1.bf16.msra.mxu0 %v8632_v1  ;;  %6048 = vmatpush1.bf16.msra.mxu1 %v8635_v2  ;;  %v8727_v1 = vld [vmem:[%s11368_s3 + $0x88] sm:$0xff]   ;;  %v8728_v2 = vld [vmem:[%s11368_s3 + $0x50] sm:$0xff]  }
 0x2ec   :  { %5490 = vmatprep.subr.bf16.mxu0 %v8640_v3  ;;  %6049 = vmatprep.subr.bf16.mxu1 %v8643_v4  ;;  %v8729_v3 = vld [vmem:[%s11368_s3 + $0xd0] sm:$0xff]  }
 0x2ed   :  { %v8730_v4 = vld [vmem:[%s11368_s3 + $0x10] sm:$0xff]  }
 0x2ef   :  { %5491 = vmatpush1.bf16.msra.mxu0 %v8638_v5  ;;  %6050 = vmatpush1.bf16.msra.mxu1 %v8641_v6  ;;  %v8731_v5 = vld [vmem:[%s11368_s3 + $0x90] sm:$0xff]   ;;  %v8732_v6 = vld [vmem:[%s11368_s3 + $0x58] sm:$0xff]  }
 0x2f0   :  { %5492 = vmatprep.subr.bf16.mxu0 %v8646_v7  ;;  %6051 = vmatprep.subr.bf16.mxu1 %v8649_v8  ;;  %v8733_v7 = vld [vmem:[%s11368_s3 + $0xd8] sm:$0xff]  }
 0x2f1   :  { %v8734_v8 = vld [vmem:[%s11368_s3 + $0x18] sm:$0xff]  }
 0x2f3   :  { %5493 = vmatpush1.bf16.msra.mxu0 %v8644_v9  ;;  %6052 = vmatpush1.bf16.msra.mxu1 %v8647_v10  ;;  %v8735_v9 = vld [vmem:[%s11368_s3 + $0x98] sm:$0xff]   ;;  %v8736_v10 = vld [vmem:[%s11368_s3 + $0x60] sm:$0xff]  }
 0x2f4   :  { %5494 = vmatprep.subr.bf16.mxu0 %v8652_v11  ;;  %6053 = vmatprep.subr.bf16.mxu1 %v8655_v12  ;;  %v8737_v11 = vld [vmem:[%s11368_s3 + $0xe0] sm:$0xff]  }
 0x2f5   :  { %v8738_v12 = vld [vmem:[%s11368_s3 + $0x20] sm:$0xff]  }
 0x2f7   :  { %5495 = vmatpush1.bf16.msra.mxu0 %v8650_v13  ;;  %6054 = vmatpush1.bf16.msra.mxu1 %v8653_v14  ;;  %v8739_v13 = vld [vmem:[%s11368_s3 + $0xa0] sm:$0xff]   ;;  %v8740_v14 = vld [vmem:[%s11368_s3 + $0x68] sm:$0xff]  }
 0x2f8   :  { %5496 = vmatprep.subr.bf16.mxu0 %v8658_v15  ;;  %6055 = vmatprep.subr.bf16.mxu1 %v8661_v16  ;;  %v8741_v15 = vld [vmem:[%s11368_s3 + $0xe8] sm:$0xff]  }
 0x2f9   :  { %v8742_v16 = vld [vmem:[%s11368_s3 + $0x28] sm:$0xff]  }
 0x2fb   :  { %5497 = vmatpush1.bf16.msra.mxu0 %v8656_v17  ;;  %6056 = vmatpush1.bf16.msra.mxu1 %v8659_v18  ;;  %v8743_v17 = vld [vmem:[%s11368_s3 + $0xa8] sm:$0xff]   ;;  %v8744_v18 = vld [vmem:[%s11368_s3 + $0x70] sm:$0xff]  }
 0x2fc   :  { %5498 = vmatprep.subr.bf16.mxu0 %v8664_v19  ;;  %6057 = vmatprep.subr.bf16.mxu1 %v8667_v20  ;;  %v8745_v19 = vld [vmem:[%s11368_s3 + $0xf0] sm:$0xff]  }
 0x2fd   :  { %v8746_v20 = vld [vmem:[%s11368_s3 + $0x30] sm:$0xff]  }
 0x2ff   :  { %5499 = vmatpush1.bf16.msra.mxu0 %v8662_v21  ;;  %6058 = vmatpush1.bf16.msra.mxu1 %v8665_v22  ;;  %v8747_v21 = vld [vmem:[%s11368_s3 + $0xb0] sm:$0xff]   ;;  %v8748_v22 = vld [vmem:[%s11368_s3 + $0x78] sm:$0xff]  }
 0x300   :  { %5511 = vmatprep.subr.bf16.mxu0 %v8673_v23  ;;  %6070 = vmatprep.subr.bf16.mxu1 %v8676_v24  ;;  %v8749_v23 = vld [vmem:[%s11368_s3 + $0xf8] sm:$0xff]  }
 0x301   :  { %v8750_v24 = vld [vmem:[%s11368_s3 + $0x38] sm:$0xff]  }
 0x302   :  { %5501 = vmatmul.mubr.bf16.vlgmr.msra.gmra.mrb[0].mxu0 %v8668_v25  ;;  %6060 = vmatmul.mubr.bf16.vlgmr.msra.gmra.mrb[0].mxu1 %v8668_v25  ;;  %v8751_v25 = vld [vmem:[%s11368_s3 + $0xb8] sm:$0xff]  }
 0x303   :  { %5512 = vmatpush1.bf16.msra.mxu0 %v8671_v26  ;;  %6071 = vmatpush1.bf16.msra.mxu1 %v8674_v27  ;;  %v849_v26 = vlaneseq }
 0x304   :  { %5513 = vmatprep.subr.bf16.mxu0 %v8679_v28  ;;  %6072 = vmatprep.subr.bf16.mxu1 %v8682_v29 }
 0x305   :  { %5543 = vmatprep.mubr.bf16.mxu0 %v8752_v34  ;;  %6102 = vmatprep.mubr.bf16.mxu1 %v8752_v34  ;;  %v850_v27 = vshrl.u32 %v849_v26, 7 }
 0x307   :  { %5514 = vmatpush1.bf16.msra.mxu0 %v8677_v30  ;;  %6073 = vmatpush1.bf16.msra.mxu1 %v8680_v31  ;;  %v851_v28 = vsub.s32 0, %v850_v27  ;;  %v859_v29 = vsub.s32 2, %v850_v27  ;;  %v847_v30 = vld [vmem:[%s11369_s2] sm:$0xf]  ;;  %v855_v31 = vsub.s32 1, %v850_v27 }
 0x308   :  { %5515 = vmatprep.subr.bf16.mxu0 %v8685_v32  ;;  %6074 = vmatprep.subr.bf16.mxu1 %v8688_v33  ;;  %v863_v32 = vsub.s32 3, %v850_v27 }
 0x309   :  { %v852_v33 = vrot.slane %v847_v30, %v851_v28  ;;  %v860_v34 = vrot.slane %v847_v30, %v859_v29 }
 0x30b   :  { %5516 = vmatpush1.bf16.msra.mxu0 %v8683_v35  ;;  %6075 = vmatpush1.bf16.msra.mxu1 %v8686_v36  ;;  %v856_v35 = vrot.slane %v847_v30, %v855_v31  ;;  %v864_v36 = vrot.slane %v847_v30, %v863_v32 }
 0x30c   :  { %5517 = vmatprep.subr.bf16.mxu0 %v8691_v37  ;;  %6076 = vmatprep.subr.bf16.mxu1 %v8694_v38 }
 0x30f   :  { %5518 = vmatpush1.bf16.msra.mxu0 %v8689_v39  ;;  %6077 = vmatpush1.bf16.msra.mxu1 %v8692_v40 }
 0x310   :  { %5519 = vmatprep.subr.bf16.mxu0 %v8697_v41  ;;  %6078 = vmatprep.subr.bf16.mxu1 %v8700_v42 }
 0x313   :  { %5520 = vmatpush1.bf16.msra.mxu0 %v8695_v43  ;;  %6079 = vmatpush1.bf16.msra.mxu1 %v8698_v44 }
 0x314   :  { %5521 = vmatprep.subr.bf16.mxu0 %v8703_v45  ;;  %6080 = vmatprep.subr.bf16.mxu1 %v8706_v46 }
 0x317   :  { %5522 = vmatpush1.bf16.msra.mxu0 %v8701_v47  ;;  %6081 = vmatpush1.bf16.msra.mxu1 %v8704_v48 }
 0x318   :  { %5523 = vmatprep.subr.bf16.mxu0 %v8709_v49  ;;  %6082 = vmatprep.subr.bf16.mxu1 %v8712_v50 }
 0x31b   :  { %5524 = vmatpush1.bf16.msra.mxu0 %v8707_v51  ;;  %6083 = vmatpush1.bf16.msra.mxu1 %v8710_v52 }
 0x31c   :  { %5525 = vmatprep.subr.bf16.mxu0 %v8715_v53  ;;  %6084 = vmatprep.subr.bf16.mxu1 %v8718_v54 }
 0x31f   :  { %5526 = vmatpush1.bf16.msra.mxu0 %v8713_v55  ;;  %6085 = vmatpush1.bf16.msra.mxu1 %v8716_v56 }
 0x320   :  { %7334 = vmatprep.subr.bf16.mxu0 %v8720_v57  ;;  %7356 = vmatprep.subr.bf16.mxu1 %v8721_v58 }
 0x322   :  { %5544 = vmatmul.mubr.bf16.vlgmr.msra.gmra.mrb[0].mxu0 %v8719_v59  ;;  %6103 = vmatmul.mubr.bf16.vlgmr.msra.gmra.mrb[0].mxu1 %v8719_v59 }
 0x323   :  { %7335 = vmatpush3.bf16.msra.mxu0 %v8722_v60  ;;  %7357 = vmatpush3.bf16.msra.mxu1 %v8723_v61 }
 0x324   :  { %7336 = vmatprep.subr.bf16.mxu0 %v8724_v62  ;;  %7358 = vmatprep.subr.bf16.mxu1 %v8725_v63 }
 0x327   :  { %7337 = vmatpush3.bf16.msra.mxu0 %v8726_v0  ;;  %7359 = vmatpush3.bf16.msra.mxu1 %v8727_v1 }
 0x328   :  { %7338 = vmatprep.subr.bf16.mxu0 %v8728_v2  ;;  %7360 = vmatprep.subr.bf16.mxu1 %v8729_v3  ;;  %v7301_v3 = vld [vmem:[%s11370_s4] ss:$0 sm:$0xff] }
 0x32b   :  { %7339 = vmatpush3.bf16.msra.mxu0 %v8730_v4  ;;  %7361 = vmatpush3.bf16.msra.mxu1 %v8731_v5 }
 0x32c   :  { %7340 = vmatprep.subr.bf16.mxu0 %v8732_v6  ;;  %7362 = vmatprep.subr.bf16.mxu1 %v8733_v7 }
 0x32f   :  { %7341 = vmatpush3.bf16.msra.mxu0 %v8734_v8  ;;  %7363 = vmatpush3.bf16.msra.mxu1 %v8735_v9 }
 0x330   :  { %7342 = vmatprep.subr.bf16.mxu0 %v8736_v10  ;;  %7364 = vmatprep.subr.bf16.mxu1 %v8737_v11 }
 0x333   :  { %7343 = vmatpush3.bf16.msra.mxu0 %v8738_v12  ;;  %7365 = vmatpush3.bf16.msra.mxu1 %v8739_v13 }
 0x334   :  { %7344 = vmatprep.subr.bf16.mxu0 %v8740_v14  ;;  %7366 = vmatprep.subr.bf16.mxu1 %v8741_v15 }
 0x337   :  { %7345 = vmatpush3.bf16.msra.mxu0 %v8742_v16  ;;  %7367 = vmatpush3.bf16.msra.mxu1 %v8743_v17 }
 0x338   :  { %7346 = vmatprep.subr.bf16.mxu0 %v8744_v18  ;;  %7368 = vmatprep.subr.bf16.mxu1 %v8745_v19 }
 0x33b   :  { %7347 = vmatpush3.bf16.msra.mxu0 %v8746_v20  ;;  %7369 = vmatpush3.bf16.msra.mxu1 %v8747_v21 }
 0x33c   :  { %7348 = vmatprep.subr.bf16.mxu0 %v8748_v22  ;;  %7370 = vmatprep.subr.bf16.mxu1 %v8749_v23 }
 0x33f   :  { %7349 = vmatpush3.bf16.msra.mxu0 %v8750_v24  ;;  %7371 = vmatpush3.bf16.msra.mxu1 %v8751_v25 }
 0x3f5   :  { %v5545_v37 = vpop.f32.mrb[0].mxu0  ;;  %v6104_v38 = vpop.f32.mrb[0].mxu1 }
 0x3f6   :  { %v7378_v39 = vadd.f32 %v5545_v37, %v852_v33  ;;  %v7382_v40 = vadd.f32 %v6104_v38, %v860_v34  ;;  %v5547_v41 = vpop.f32.mrb[1].mxu0  ;;  %v6106_v42 = vpop.f32.mrb[1].mxu1 }
 0x3f7   :  { %v7379_v43 = vadd.f32 %v5547_v41, %v856_v35  ;;  %v7383_v44 = vadd.f32 %v6106_v42, %v864_v36  ;;  %v5549_v45 = vpop.f32.mrb[2].mxu0  ;;  %v6108_v46 = vpop.f32.mrb[2].mxu1 }
 0x3f8   :  { %v7380_v47 = vadd.f32 %v5549_v45, %v852_v33  ;;  %v7384_v48 = vadd.f32 %v6108_v46, %v860_v34  ;;  %v5551_v49 = vpop.f32.mrb[3].mxu0  ;;  %v6110_v50 = vpop.f32.mrb[3].mxu1  ;;  %v6113_v53 = vmax.f32 %v7378_v39, 0.0  ;;  %v6115_v54 = vmax.f32 %v7382_v40, 0.0 }
 0x3f9   :  { %v7381_v51 = vadd.f32 %v5551_v49, %v856_v35  ;;  %v7385_v52 = vadd.f32 %v6110_v50, %v864_v36  ;;  %v6114_v57 = vmax.f32 %v7379_v43, 0.0  ;;  %v6116_v58 = vmax.f32 %v7383_v44, 0.0 }
 0x3fa   :  { %v6117_v55 = vmax.f32 %v7380_v47, 0.0  ;;  %v6119_v56 = vmax.f32 %v7384_v48, 0.0 }
 0x3fb   :  { %v6118_v59 = vmax.f32 %v7381_v51, 0.0  ;;  %v6120_v60 = vmax.f32 %v7385_v52, 0.0 }
 0x3fc   :  { %v6121_v61 = vpack.c.bf16 %v6117_v55, %v6113_v53  ;;  %v6123_v62 = vpack.c.bf16 %v6119_v56, %v6115_v54 }
 0x3fd   :  { %v6122_v63 = vpack.c.bf16 %v6118_v59, %v6114_v57  ;;  %v6124_v0 = vpack.c.bf16 %v6120_v60, %v6116_v58 }
 0x3ff   :  { %6420 = vmatprep.mubr.bf16.mxu0 %v6122_v63  ;;  %6461 = vmatprep.mubr.bf16.mxu1 %v6124_v0 }
 0x400   :  { %6421 = vmatmul.mubr.bf16.vlgmr.msra.gmra.mrb[4].mxu0 %v6121_v61  ;;  %6462 = vmatmul.mubr.bf16.vlgmr.msra.gmra.mrb[4].mxu1 %v6123_v62 }
 0x4d3   :  { %v7350_v1 = vpop.f32.mrb[4].mxu0  ;;  %v7372_v2 = vpop.f32.mrb[4].mxu1 }
 0x4d4   :  { %v7351_v4 = vpop.f32.mrb[5].mxu0  ;;  %v7373_v5 = vpop.f32.mrb[5].mxu1 }
 0x4d5   :  { %v7352_v6 = vadd.f32 %v7351_v4, %v7350_v1  ;;  %v7374_v7 = vadd.f32 %v7373_v5, %v7372_v2  ;;  %v7353_v8 = vpop.f32.mrb[6].mxu0  ;;  %v7375_v9 = vpop.f32.mrb[6].mxu1 }
 0x4d6   :  { %v7354_v10 = vpop.f32.mrb[7].mxu0  ;;  %v7376_v11 = vpop.f32.mrb[7].mxu1 }
 0x4d7   :  { %v6423_v12 = vadd.f32 %v7352_v6, %v7301_v3  ;;  %v7355_v13 = vadd.f32 %v7354_v10, %v7353_v8  ;;  %v7377_v14 = vadd.f32 %v7376_v11, %v7375_v9 }
 0x4d9   :  { %v6464_v15 = vadd.f32 %v7374_v7, %v6423_v12  ;;  %v6426_v16 = vadd.f32 %v7355_v13, %v7301_v3 }
 0x4db   :  { %6470 = vst [vmem:[%s11371_s5] sm:$0xff] %v6464_v15  ;;  %v6467_v17 = vadd.f32 %v7377_v14, %v6426_v16 }
 0x4dd   :  { %6471 = vst [vmem:[%s11371_s5 + $0x8] sm:$0xff] %v6467_v17 }

</bundles_post_ra>
